<compile_context>
chip_gen: v6e
topology: v6e:2x2x1
jax: 0.10.0
libtpu: 0.0.40
codegen_flags: <defaults>
</compile_context>

<pallas_src>
import jax
import jax.numpy as jnp
from jax import lax
from jax.experimental import pallas as pl
from jax.experimental.pallas import tpu as pltpu


# ----------------------------------------------------------------------------
# Pallas kernel builder: full Refine forward for one batch element.
# ----------------------------------------------------------------------------
def _make_refine_kernel(H, W, HW, HWp, pad, c_stage):
    def kernel(f_ref, pmu_ref, wmask_ref,
               w1_ref, b1_ref, w2_ref, b2_ref, w3_ref, b3_ref,
               w4_ref, b4_ref, w5_ref, b5_ref,
               o_ref, xpad_ref):
        # Zero only the left/right lane borders of the flat padded scratch.
        # Done every grid step so it stays correct when steps are sharded
        # across TensorCores.  (Interior [pad, pad+HWp) is rewritten per conv.)
        zeros_border = jnp.zeros((c_stage, pad), jnp.float32)
        xpad_ref[:, 0:pad] = zeros_border
        xpad_ref[:, pad + HWp:2 * pad + HWp] = zeros_border

        wm = wmask_ref[...]
        mask_l = wm[0:1, :] > 0.5   # input column x-1 exists (tap dx = -1)
        mask_r = wm[1:2, :] > 0.5   # input column x+1 exists (tap dx = +1)

        def conv3x3(x, w_ref, b_ref, relu_in):
            # x: (Cin, HWp) f32 value; w_ref: (9, Cout, Cin) bf16; b_ref: (Cout,1) f32.
            cin = x.shape[0]
            cout = w_ref.shape[1]
            if relu_in:
                x = jnp.maximum(x, 0.0)
            acc = jnp.zeros((cout, HWp), jnp.float32)
            # K-chunked: stage at most c_stage input channels at a time so the
            # largest-Cin conv does not dictate the scratch size.
            for c0 in range(0, cin, c_stage):
                cw = min(c_stage, cin - c0)
                # TODO(synk): store the staged activation as bf16 to also halve
                # the vld bytes feeding the MXU (per-tap cast below is the
                # numerically identical, layout-safe variant).
                xpad_ref[0:cw, pad:pad + HWp] = x[c0:c0 + cw]
                if HWp > HW:
                    # Keep the 128-padding tail zero so bottom-row (+W) taps
                    # never read garbage from a previous activation.
                    xpad_ref[0:cw, pad + HW:pad + HWp] = jnp.zeros(
                        (cw, HWp - HW), jnp.float32)
                t = 0
                for dy in (-1, 0, 1):
                    for dx in (-1, 0, 1):
                        off = dy * W + dx
                        piece = xpad_ref[0:cw, pad + off:pad + off + HWp]
                        if dx == -1:
                            piece = jnp.where(mask_l, piece,
                                              jnp.zeros_like(piece))
                        elif dx == 1:
                            piece = jnp.where(mask_r, piece,
                                              jnp.zeros_like(piece))
                        # TODO(synk): when W % 128 == 0, precompute 3 masked
                        # dx-shifted copies so all 9 taps are 128-lane aligned
                        # (cuts XLU realignment ~3x on v6e/v7x).
                        wt = w_ref[t][:, c0:c0 + cw]            # (Cout, cw) bf16
                        acc = acc + jnp.dot(wt, piece.astype(jnp.bfloat16),
                                            preferred_element_type=jnp.float32)
                        t += 1
            # TODO(synk): for tiny channel counts (Cin, Cout <= ~16) a 9-tap
            # VPU multiply-accumulate would beat the underfilled MXU on v5e.
            return acc + b_ref[...]

        f = f_ref[0]      # (inplanes, HWp)
        pmu = pmu_ref[0]  # (outplanes, HWp), already upsampled

        s = conv3x3(f, w1_ref, b1_ref, relu_in=False)    # convFS1(f)
        sr = conv3x3(s, w2_ref, b2_ref, relu_in=True)    # convFS2(relu(s))
        sr = conv3x3(sr, w3_ref, b3_ref, relu_in=True)   # convFS3(relu(sr))
        s = s + sr
        m = s + pmu                                      # + upsampled pm
        mr = conv3x3(m, w4_ref, b4_ref, relu_in=True)    # convMM1(relu(m))
        mr = conv3x3(mr, w5_ref, b5_ref, relu_in=True)   # convMM2(relu(mr))
        m = m + mr

        o_ref[...] = m[None].astype(o_ref.dtype)

    return kernel


# ----------------------------------------------------------------------------
# Bilinear 2x upsample (NCHW), exact match of
# F.interpolate(scale_factor=2, mode='bilinear', align_corners=False).
# ----------------------------------------------------------------------------
def _upsample2x_bilinear_nchw(x):
    n, c, hs, ws = x.shape
    xm = jnp.concatenate([x[:, :, :1], x[:, :, :-1]], axis=2)
    xp = jnp.concatenate([x[:, :, 1:], x[:, :, -1:]], axis=2)
    even = 0.25 * xm + 0.75 * x
    odd = 0.75 * x + 0.25 * xp
    rows = jnp.stack([even, odd], axis=3).reshape(n, c, 2 * hs, ws)
    ym = jnp.concatenate([rows[:, :, :, :1], rows[:, :, :, :-1]], axis=3)
    yp = jnp.concatenate([rows[:, :, :, 1:], rows[:, :, :, -1:]], axis=3)
    ceven = 0.25 * ym + 0.75 * rows
    codd = 0.75 * rows + 0.25 * yp
    return jnp.stack([ceven, codd], axis=4).reshape(n, c, 2 * hs, 2 * ws)


# ----------------------------------------------------------------------------
# Wrapper: NCHW in / NCHW out (PyTorch convention).
# ----------------------------------------------------------------------------
def refine_forward(f_nchw, pm_nchw, params, scale_factor=2):
    assert scale_factor == 2  # TODO(synk): only the 2x bilinear stencil is implemented.
    N, Cin, H, W = f_nchw.shape
    Cout = params["w1"].shape[0]     # outplanes
    Cpl = params["w2"].shape[0]      # planes
    HW = H * W
    HWp = ((HW + 127) // 128) * 128        # lane-dense stores
    pad = ((W + 1 + 127) // 128) * 128     # zero lane border, >= W+1, 128-aligned
    assert pad >= W + 1, "lane border must cover one full row plus a column"
    assert HWp % 128 == 0 and pad % 128 == 0

    c_stage = min(max(Cin, Cout, Cpl), 256)   # K-chunk staging capacity

    def pad_hw(x):
        return x if HWp == HW else jnp.pad(x, ((0, 0), (0, 0), (0, HWp - HW)))

    f = pad_hw(f_nchw.reshape(N, Cin, HW).astype(jnp.float32))
    # TODO(synk): the 2x bilinear upsample stays in the XLA wrapper; doing the
    # lane interleave in-kernel would save one HBM round trip of pmu (biggest
    # relative win on v5e) but needs cross-lane shuffles in this flat layout.
    pmu = _upsample2x_bilinear_nchw(pm_nchw.astype(jnp.float32)).reshape(N, Cout, HW)
    pmu = pad_hw(pmu)

    # Weights as bf16 (9, Cout, Cin), tap-major (t = ky*3 + kx), so each tap's
    # matmul reads a clean (Cout, Cin) slab; biases stay f32 (Cout, 1).
    def prep_w(w):  # OIHW (Cout, Cin, 3, 3) -> (9, Cout, Cin) bf16
        co, ci = w.shape[0], w.shape[1]
        return jnp.transpose(w, (2, 3, 0, 1)).reshape(9, co, ci).astype(jnp.bfloat16)

    ws = [prep_w(params[f"w{i}"]) for i in range(1, 6)]
    bs = [params[f"b{i}"].reshape(-1, 1).astype(jnp.float32) for i in range(1, 6)]

    # Lane masks killing left/right row-wrap of the +/-1-lane shifted windows.
    w_idx = jnp.arange(HWp, dtype=jnp.int32) % W
    wmask = jnp.stack([(w_idx > 0), (w_idx < W - 1)]).astype(jnp.float32)  # (2, HWp)

    in_specs = [
        pl.BlockSpec((1, Cin, HWp), lambda n: (n, 0, 0)),
        pl.BlockSpec((1, Cout, HWp), lambda n: (n, 0, 0)),
        pl.BlockSpec((2, HWp), lambda n: (0, 0)),
    ]
    for wmat, bmat in zip(ws, bs):
        # TODO(synk): weights/biases are grid-invariant (constant index_map, so
        # never re-DMA'd); single-buffering them (pipeline_mode=pl.Buffered(1))
        # would reclaim their second VMEM buffer at large channel counts.
        in_specs.append(pl.BlockSpec(wmat.shape, lambda n: (0, 0, 0)))
        in_specs.append(pl.BlockSpec(bmat.shape, lambda n: (0, 0)))

    kernel = _make_refine_kernel(H, W, HW, HWp, pad, c_stage)

    # Explicit VMEM budget: double-buffered pipeline blocks + scratch + live
    # f32 intermediates, with headroom; capped at v7x's 64 MiB physical VMEM.
    cmax = max(Cin, Cout, Cpl)
    est = 0
    est += 2 * Cin * HWp * 4                      # f block (x2 pipeline bufs)
    est += 2 * Cout * HWp * 4                     # pmu block
    est += 2 * 2 * HWp * 4                        # masks
    est += 2 * Cout * HWp * 4                     # out block
    est += 2 * sum(int(w.size) * 2 + int(b.size) * 4 for w, b in zip(ws, bs))
    est += c_stage * (2 * pad + HWp) * 4          # xpad scratch
    est += 8 * cmax * HWp * 4                     # live intermediates (s, sr, m, mr, acc)
    vmem_limit = int(min(64 * 1024 * 1024, est + 32 * 1024 * 1024))

    # TODO(synk): for large H, add an H-tile grid axis (needs a 5-row halo for
    # the fused 5-conv cascade, or per-conv re-staging) so v7x's two
    # TensorCores stay busy and blocks fit its 64 MiB VMEM.
    out = pl.pallas_call(
        kernel,
        out_shape=jax.ShapeDtypeStruct((N, Cout, HWp), jnp.float32),
        grid_spec=pltpu.PrefetchScalarGridSpec(
            num_scalar_prefetch=0,
            grid=(N,),
            in_specs=in_specs,
            out_specs=pl.BlockSpec((1, Cout, HWp), lambda n: (n, 0, 0)),
            scratch_shapes=[
                pltpu.VMEM((c_stage, 2 * pad + HWp), jnp.float32),  # flat padded act
            ],
        ),
        compiler_params=pltpu.CompilerParams(
            dimension_semantics=("parallel",),
            vmem_limit_bytes=vmem_limit),
    )(f, pmu, wmask, ws[0], bs[0], ws[1], bs[1], ws[2], bs[2],
      ws[3], bs[3], ws[4], bs[4])

    if HWp != HW:
        out = out[:, :, :HW]
    return out.reshape(N, Cout, H, W)


# ----------------------------------------------------------------------------
# Pure-JAX references (for verification).  bf16_ops=True mirrors the kernel's
# numerics exactly (bf16 MXU operands, f32 accumulation / bias / residuals).
# ----------------------------------------------------------------------------
def _conv2d_nchw(x, w, b, bf16_ops):
    if bf16_ops:
        x = x.astype(jnp.bfloat16)
        w = w.astype(jnp.bfloat16)
    y = lax.conv_general_dilated(
        x, w, window_strides=(1, 1), padding="SAME",
        dimension_numbers=("NCHW", "OIHW", "NCHW"),
        preferred_element_type=jnp.float32)
    return y + b[None, :, None, None]


def refine_reference(f, pm, params, bf16_ops=False):
    conv = lambda x, i: _conv2d_nchw(x, params[f"w{i}"], params[f"b{i}"], bf16_ops)
    relu = lambda x: jnp.maximum(x, 0.0)
    s = conv(f, 1)
    sr = conv(relu(s), 2)
    sr = conv(relu(sr), 3)
    s = s + sr
    m = s + _upsample2x_bilinear_nchw(pm)
    mr = conv(relu(m), 4)
    mr = conv(relu(mr), 5)
    return m + mr


if __name__ == "__main__":
    key = jax.random.PRNGKey(0)
    N, inplanes, planes, outplanes = 2, 4, 8, 4
    H = W = 16
    scale = 2

    keys = jax.random.split(key, 12)
    conv_io = [(outplanes, inplanes),   # convFS1
               (planes, outplanes),     # convFS2
               (outplanes, planes),     # convFS3
               (planes, outplanes),     # convMM1
               (outplanes, planes)]     # convMM2
    params = {}
    for i, (co, ci) in enumerate(conv_io, start=1):
        kw, kb = keys[2 * (i - 1)], keys[2 * (i - 1) + 1]
        params[f"w{i}"] = (jax.random.normal(kw, (co, ci, 3, 3), jnp.float32)
                           * (1.0 / (3.0 * (ci ** 0.5))))
        params[f"b{i}"] = jax.random.normal(kb, (co,), jnp.float32) * 0.1

    f = jax.random.normal(keys[10], (N, inplanes, H, W), jnp.float32)
    pm = jax.random.normal(keys[11], (N, outplanes, H // scale, W // scale),
                           jnp.float32)

    out = jax.block_until_ready(refine_forward(f, pm, params))
    assert out.shape == (N, outplanes, H, W)

    # Primary check: reference with the same numerics as the kernel
    # (bf16 MXU operands, f32 accumulation) -> tight tolerance.
    ref_bf16 = refine_reference(f, pm, params, bf16_ops=True)
    if not jnp.allclose(out, ref_bf16, atol=1e-2, rtol=1e-2):
        err = float(jnp.max(jnp.abs(out - ref_bf16)))
        raise SystemExit(f"MISMATCH vs bf16-op reference: max abs err = {err}")

    # Secondary sanity check vs the pure-f32 reference; tolerance reflects the
    # bf16 MXU operands (accumulation, bias and residual adds stay f32).
    ref_f32 = refine_reference(f, pm, params, bf16_ops=False)
    if not jnp.allclose(out, ref_f32, atol=1e-1, rtol=1e-1):
        err = float(jnp.max(jnp.abs(out - ref_f32)))
        raise SystemExit(f"MISMATCH vs f32 reference: max abs err = {err}")

    print("KERNEL_OK")
</pallas_src>

<mosaic_0001>
module attributes {stable_mosaic.version = 11 : i64} {
  func.func @kernel(%arg0: i32, %arg1: memref<1x4x256xf32, #tpu.memory_space<vmem>>, %arg2: memref<1x4x256xf32, #tpu.memory_space<vmem>>, %arg3: memref<2x256xf32, #tpu.memory_space<vmem>>, %arg4: memref<9x4x4xbf16, #tpu.memory_space<vmem>>, %arg5: memref<4x1xf32, #tpu.memory_space<vmem>>, %arg6: memref<9x8x4xbf16, #tpu.memory_space<vmem>>, %arg7: memref<8x1xf32, #tpu.memory_space<vmem>>, %arg8: memref<9x4x8xbf16, #tpu.memory_space<vmem>>, %arg9: memref<4x1xf32, #tpu.memory_space<vmem>>, %arg10: memref<9x8x4xbf16, #tpu.memory_space<vmem>>, %arg11: memref<8x1xf32, #tpu.memory_space<vmem>>, %arg12: memref<9x4x8xbf16, #tpu.memory_space<vmem>>, %arg13: memref<4x1xf32, #tpu.memory_space<vmem>>, %arg14: memref<1x4x256xf32, #tpu.memory_space<vmem>>, %arg15: memref<8x512xf32, #tpu.memory_space<vmem>>) attributes {dimension_semantics = [#tpu.dimension_semantics<parallel>], iteration_bounds = array<i64: 2>, scalar_prefetch = 0 : i64, scratch_operands = 1 : i64, tpu.core_type = #tpu.core_type<tc>, window_params = [{transform_indices = @transform_0, window_bounds = array<i64: 1, 4, 256>}, {transform_indices = @transform_1, window_bounds = array<i64: 1, 4, 256>}, {pipeline_mode = #tpu.pipeline_mode<synchronous>, transform_indices = @transform_2, window_bounds = array<i64: 2, 256>}, {pipeline_mode = #tpu.pipeline_mode<synchronous>, transform_indices = @transform_3, window_bounds = array<i64: 9, 4, 4>}, {pipeline_mode = #tpu.pipeline_mode<synchronous>, transform_indices = @transform_4, window_bounds = array<i64: 4, 1>}, {pipeline_mode = #tpu.pipeline_mode<synchronous>, transform_indices = @transform_5, window_bounds = array<i64: 9, 8, 4>}, {pipeline_mode = #tpu.pipeline_mode<synchronous>, transform_indices = @transform_6, window_bounds = array<i64: 8, 1>}, {pipeline_mode = #tpu.pipeline_mode<synchronous>, transform_indices = @transform_7, window_bounds = array<i64: 9, 4, 8>}, {pipeline_mode = #tpu.pipeline_mode<synchronous>, transform_indices = @transform_8, window_bounds = array<i64: 4, 1>}, {pipeline_mode = #tpu.pipeline_mode<synchronous>, transform_indices = @transform_9, window_bounds = array<i64: 9, 8, 4>}, {pipeline_mode = #tpu.pipeline_mode<synchronous>, transform_indices = @transform_10, window_bounds = array<i64: 8, 1>}, {pipeline_mode = #tpu.pipeline_mode<synchronous>, transform_indices = @transform_11, window_bounds = array<i64: 9, 4, 8>}, {pipeline_mode = #tpu.pipeline_mode<synchronous>, transform_indices = @transform_12, window_bounds = array<i64: 4, 1>}, {transform_indices = @transform_13, window_bounds = array<i64: 1, 4, 256>}]} {
    %cst = arith.constant 0.000000e+00 : f32
    %0 = vector.broadcast %cst : f32 to vector<8x128xf32>
    %c0 = arith.constant 0 : index
    %c0_0 = arith.constant 0 : index
    %1 = vector.load %arg15[%c0, %c0_0] : memref<8x512xf32, #tpu.memory_space<vmem>>, vector<8x128xf32>
    tpu.vector_store %arg15[%c0, %c0_0], %0 {strides = array<i32>} : memref<8x512xf32, #tpu.memory_space<vmem>>, vector<8x128xf32>,
    %c0_1 = arith.constant 0 : index
    %c384 = arith.constant 384 : index
    %2 = vector.load %arg15[%c0_1, %c384] : memref<8x512xf32, #tpu.memory_space<vmem>>, vector<8x128xf32>
    tpu.vector_store %arg15[%c0_1, %c384], %0 {strides = array<i32>} : memref<8x512xf32, #tpu.memory_space<vmem>>, vector<8x128xf32>,
    %c0_2 = arith.constant 0 : index
    %c0_3 = arith.constant 0 : index
    %3 = vector.load %arg3[%c0_2, %c0_3] : memref<2x256xf32, #tpu.memory_space<vmem>>, vector<2x256xf32>
    %4 = vector.extract_strided_slice %3 {offsets = [0, 0], sizes = [1, 256], strides = [1, 1]} : vector<2x256xf32> to vector<1x256xf32>
    %cst_4 = arith.constant 5.000000e-01 : f32
    %5 = vector.broadcast %cst_4 : f32 to vector<1x256xf32>
    %6 = arith.cmpf ogt, %4, %5 : vector<1x256xf32>
    %7 = vector.extract_strided_slice %3 {offsets = [1, 0], sizes = [1, 256], strides = [1, 1]} : vector<2x256xf32> to vector<1x256xf32>
    %cst_5 = arith.constant 5.000000e-01 : f32
    %8 = vector.broadcast %cst_5 : f32 to vector<1x256xf32>
    %9 = arith.cmpf ogt, %7, %8 : vector<1x256xf32>
    %c0_6 = arith.constant 0 : index
    %c0_7 = arith.constant 0 : index
    %c0_8 = arith.constant 0 : index
    %10 = vector.load %arg1[%c0_6, %c0_7, %c0_8] : memref<1x4x256xf32, #tpu.memory_space<vmem>>, vector<1x4x256xf32>
    %11 = vector.shape_cast %10 : vector<1x4x256xf32> to vector<4x256xf32>
    %c0_9 = arith.constant 0 : index
    %c0_10 = arith.constant 0 : index
    %c0_11 = arith.constant 0 : index
    %12 = vector.load %arg2[%c0_9, %c0_10, %c0_11] : memref<1x4x256xf32, #tpu.memory_space<vmem>>, vector<1x4x256xf32>
    %13 = vector.shape_cast %12 : vector<1x4x256xf32> to vector<4x256xf32>
    %cst_12 = arith.constant 0.000000e+00 : f32
    %14 = vector.broadcast %cst_12 : f32 to vector<4x256xf32>
    %c0_13 = arith.constant 0 : index
    %c128 = arith.constant 128 : index
    %15 = vector.load %arg15[%c0_13, %c128] : memref<8x512xf32, #tpu.memory_space<vmem>>, vector<4x256xf32>
    tpu.vector_store %arg15[%c0_13, %c128], %11 {strides = array<i32>} : memref<8x512xf32, #tpu.memory_space<vmem>>, vector<4x256xf32>,
    %c0_14 = arith.constant 0 : index
    %c111 = arith.constant 111 : index
    %16 = vector.load %arg15[%c0_14, %c111] : memref<8x512xf32, #tpu.memory_space<vmem>>, vector<4x256xf32>
    %cst_15 = arith.constant 0.000000e+00 : f32
    %17 = vector.broadcast %cst_15 : f32 to vector<4x256xf32>
    %18 = vector.shape_cast %6 : vector<1x256xi1> to vector<1x256xi1>
    %19 = vector.broadcast %18 : vector<1x256xi1> to vector<4x256xi1>
    %20 = arith.select %19, %16, %17 : vector<4x256xi1>, vector<4x256xf32>
    %c0_16 = arith.constant 0 : index
    %c0_17 = arith.constant 0 : index
    %c0_18 = arith.constant 0 : index
    %21 = vector.load %arg4[%c0_16, %c0_17, %c0_18] : memref<9x4x4xbf16, #tpu.memory_space<vmem>>, vector<1x4x4xbf16>
    %22 = vector.shape_cast %21 : vector<1x4x4xbf16> to vector<4x4xbf16>
    %23 = arith.truncf %20 : vector<4x256xf32> to vector<4x256xbf16>
    %cst_19 = arith.constant dense<0.000000e+00> : vector<4x256xf32>
    %24 = tpu.matmul %22, %23, %cst_19 {dimension_numbers = #tpu.dot_dimension_numbers<[1], [0], [0], [1], [0, 0, 1, 1], [], []>} : vector<4x4xbf16>, vector<4x256xbf16>, vector<4x256xf32> -> vector<4x256xf32>
    %25 = arith.addf %14, %24 : vector<4x256xf32>
    %c0_20 = arith.constant 0 : index
    %c112 = arith.constant 112 : index
    %26 = vector.load %arg15[%c0_20, %c112] : memref<8x512xf32, #tpu.memory_space<vmem>>, vector<4x256xf32>
    %c1 = arith.constant 1 : index
    %c0_21 = arith.constant 0 : index
    %c0_22 = arith.constant 0 : index
    %27 = vector.load %arg4[%c1, %c0_21, %c0_22] : memref<9x4x4xbf16, #tpu.memory_space<vmem>>, vector<1x4x4xbf16>
    %28 = vector.shape_cast %27 : vector<1x4x4xbf16> to vector<4x4xbf16>
    %29 = arith.truncf %26 : vector<4x256xf32> to vector<4x256xbf16>
    %cst_23 = arith.constant dense<0.000000e+00> : vector<4x256xf32>
    %30 = tpu.matmul %28, %29, %cst_23 {dimension_numbers = #tpu.dot_dimension_numbers<[1], [0], [0], [1], [0, 0, 1, 1], [], []>} : vector<4x4xbf16>, vector<4x256xbf16>, vector<4x256xf32> -> vector<4x256xf32>
    %31 = arith.addf %25, %30 : vector<4x256xf32>
    %c0_24 = arith.constant 0 : index
    %c113 = arith.constant 113 : index
    %32 = vector.load %arg15[%c0_24, %c113] : memref<8x512xf32, #tpu.memory_space<vmem>>, vector<4x256xf32>
    %cst_25 = arith.constant 0.000000e+00 : f32
    %33 = vector.broadcast %cst_25 : f32 to vector<4x256xf32>
    %34 = vector.shape_cast %9 : vector<1x256xi1> to vector<1x256xi1>
    %35 = vector.broadcast %34 : vector<1x256xi1> to vector<4x256xi1>
    %36 = arith.select %35, %32, %33 : vector<4x256xi1>, vector<4x256xf32>
    %c2 = arith.constant 2 : index
    %c0_26 = arith.constant 0 : index
    %c0_27 = arith.constant 0 : index
    %37 = vector.load %arg4[%c2, %c0_26, %c0_27] : memref<9x4x4xbf16, #tpu.memory_space<vmem>>, vector<1x4x4xbf16>
    %38 = vector.shape_cast %37 : vector<1x4x4xbf16> to vector<4x4xbf16>
    %39 = arith.truncf %36 : vector<4x256xf32> to vector<4x256xbf16>
    %cst_28 = arith.constant dense<0.000000e+00> : vector<4x256xf32>
    %40 = tpu.matmul %38, %39, %cst_28 {dimension_numbers = #tpu.dot_dimension_numbers<[1], [0], [0], [1], [0, 0, 1, 1], [], []>} : vector<4x4xbf16>, vector<4x256xbf16>, vector<4x256xf32> -> vector<4x256xf32>
    %41 = arith.addf %31, %40 : vector<4x256xf32>
    %c0_29 = arith.constant 0 : index
    %c127 = arith.constant 127 : index
    %42 = vector.load %arg15[%c0_29, %c127] : memref<8x512xf32, #tpu.memory_space<vmem>>, vector<4x256xf32>
    %cst_30 = arith.constant 0.000000e+00 : f32
    %43 = vector.broadcast %cst_30 : f32 to vector<4x256xf32>
    %44 = vector.shape_cast %6 : vector<1x256xi1> to vector<1x256xi1>
    %45 = vector.broadcast %44 : vector<1x256xi1> to vector<4x256xi1>
    %46 = arith.select %45, %42, %43 : vector<4x256xi1>, vector<4x256xf32>
    %c3 = arith.constant 3 : index
    %c0_31 = arith.constant 0 : index
    %c0_32 = arith.constant 0 : index
    %47 = vector.load %arg4[%c3, %c0_31, %c0_32] : memref<9x4x4xbf16, #tpu.memory_space<vmem>>, vector<1x4x4xbf16>
    %48 = vector.shape_cast %47 : vector<1x4x4xbf16> to vector<4x4xbf16>
    %49 = arith.truncf %46 : vector<4x256xf32> to vector<4x256xbf16>
    %cst_33 = arith.constant dense<0.000000e+00> : vector<4x256xf32>
    %50 = tpu.matmul %48, %49, %cst_33 {dimension_numbers = #tpu.dot_dimension_numbers<[1], [0], [0], [1], [0, 0, 1, 1], [], []>} : vector<4x4xbf16>, vector<4x256xbf16>, vector<4x256xf32> -> vector<4x256xf32>
    %51 = arith.addf %41, %50 : vector<4x256xf32>
    %c0_34 = arith.constant 0 : index
    %c128_35 = arith.constant 128 : index
    %52 = vector.load %arg15[%c0_34, %c128_35] : memref<8x512xf32, #tpu.memory_space<vmem>>, vector<4x256xf32>
    %c4 = arith.constant 4 : index
    %c0_36 = arith.constant 0 : index
    %c0_37 = arith.constant 0 : index
    %53 = vector.load %arg4[%c4, %c0_36, %c0_37] : memref<9x4x4xbf16, #tpu.memory_space<vmem>>, vector<1x4x4xbf16>
    %54 = vector.shape_cast %53 : vector<1x4x4xbf16> to vector<4x4xbf16>
    %55 = arith.truncf %52 : vector<4x256xf32> to vector<4x256xbf16>
    %cst_38 = arith.constant dense<0.000000e+00> : vector<4x256xf32>
    %56 = tpu.matmul %54, %55, %cst_38 {dimension_numbers = #tpu.dot_dimension_numbers<[1], [0], [0], [1], [0, 0, 1, 1], [], []>} : vector<4x4xbf16>, vector<4x256xbf16>, vector<4x256xf32> -> vector<4x256xf32>
    %57 = arith.addf %51, %56 : vector<4x256xf32>
    %c0_39 = arith.constant 0 : index
    %c129 = arith.constant 129 : index
    %58 = vector.load %arg15[%c0_39, %c129] : memref<8x512xf32, #tpu.memory_space<vmem>>, vector<4x256xf32>
    %cst_40 = arith.constant 0.000000e+00 : f32
    %59 = vector.broadcast %cst_40 : f32 to vector<4x256xf32>
    %60 = vector.shape_cast %9 : vector<1x256xi1> to vector<1x256xi1>
    %61 = vector.broadcast %60 : vector<1x256xi1> to vector<4x256xi1>
    %62 = arith.select %61, %58, %59 : vector<4x256xi1>, vector<4x256xf32>
    %c5 = arith.constant 5 : index
    %c0_41 = arith.constant 0 : index
    %c0_42 = arith.constant 0 : index
    %63 = vector.load %arg4[%c5, %c0_41, %c0_42] : memref<9x4x4xbf16, #tpu.memory_space<vmem>>, vector<1x4x4xbf16>
    %64 = vector.shape_cast %63 : vector<1x4x4xbf16> to vector<4x4xbf16>
    %65 = arith.truncf %62 : vector<4x256xf32> to vector<4x256xbf16>
    %cst_43 = arith.constant dense<0.000000e+00> : vector<4x256xf32>
    %66 = tpu.matmul %64, %65, %cst_43 {dimension_numbers = #tpu.dot_dimension_numbers<[1], [0], [0], [1], [0, 0, 1, 1], [], []>} : vector<4x4xbf16>, vector<4x256xbf16>, vector<4x256xf32> -> vector<4x256xf32>
    %67 = arith.addf %57, %66 : vector<4x256xf32>
    %c0_44 = arith.constant 0 : index
    %c143 = arith.constant 143 : index
    %68 = vector.load %arg15[%c0_44, %c143] : memref<8x512xf32, #tpu.memory_space<vmem>>, vector<4x256xf32>
    %cst_45 = arith.constant 0.000000e+00 : f32
    %69 = vector.broadcast %cst_45 : f32 to vector<4x256xf32>
    %70 = vector.shape_cast %6 : vector<1x256xi1> to vector<1x256xi1>
    %71 = vector.broadcast %70 : vector<1x256xi1> to vector<4x256xi1>
    %72 = arith.select %71, %68, %69 : vector<4x256xi1>, vector<4x256xf32>
    %c6 = arith.constant 6 : index
    %c0_46 = arith.constant 0 : index
    %c0_47 = arith.constant 0 : index
    %73 = vector.load %arg4[%c6, %c0_46, %c0_47] : memref<9x4x4xbf16, #tpu.memory_space<vmem>>, vector<1x4x4xbf16>
    %74 = vector.shape_cast %73 : vector<1x4x4xbf16> to vector<4x4xbf16>
    %75 = arith.truncf %72 : vector<4x256xf32> to vector<4x256xbf16>
    %cst_48 = arith.constant dense<0.000000e+00> : vector<4x256xf32>
    %76 = tpu.matmul %74, %75, %cst_48 {dimension_numbers = #tpu.dot_dimension_numbers<[1], [0], [0], [1], [0, 0, 1, 1], [], []>} : vector<4x4xbf16>, vector<4x256xbf16>, vector<4x256xf32> -> vector<4x256xf32>
    %77 = arith.addf %67, %76 : vector<4x256xf32>
    %c0_49 = arith.constant 0 : index
    %c144 = arith.constant 144 : index
    %78 = vector.load %arg15[%c0_49, %c144] : memref<8x512xf32, #tpu.memory_space<vmem>>, vector<4x256xf32>
    %c7 = arith.constant 7 : index
    %c0_50 = arith.constant 0 : index
    %c0_51 = arith.constant 0 : index
    %79 = vector.load %arg4[%c7, %c0_50, %c0_51] : memref<9x4x4xbf16, #tpu.memory_space<vmem>>, vector<1x4x4xbf16>
    %80 = vector.shape_cast %79 : vector<1x4x4xbf16> to vector<4x4xbf16>
    %81 = arith.truncf %78 : vector<4x256xf32> to vector<4x256xbf16>
    %cst_52 = arith.constant dense<0.000000e+00> : vector<4x256xf32>
    %82 = tpu.matmul %80, %81, %cst_52 {dimension_numbers = #tpu.dot_dimension_numbers<[1], [0], [0], [1], [0, 0, 1, 1], [], []>} : vector<4x4xbf16>, vector<4x256xbf16>, vector<4x256xf32> -> vector<4x256xf32>
    %83 = arith.addf %77, %82 : vector<4x256xf32>
    %c0_53 = arith.constant 0 : index
    %c145 = arith.constant 145 : index
    %84 = vector.load %arg15[%c0_53, %c145] : memref<8x512xf32, #tpu.memory_space<vmem>>, vector<4x256xf32>
    %cst_54 = arith.constant 0.000000e+00 : f32
    %85 = vector.broadcast %cst_54 : f32 to vector<4x256xf32>
    %86 = vector.shape_cast %9 : vector<1x256xi1> to vector<1x256xi1>
    %87 = vector.broadcast %86 : vector<1x256xi1> to vector<4x256xi1>
    %88 = arith.select %87, %84, %85 : vector<4x256xi1>, vector<4x256xf32>
    %c8 = arith.constant 8 : index
    %c0_55 = arith.constant 0 : index
    %c0_56 = arith.constant 0 : index
    %89 = vector.load %arg4[%c8, %c0_55, %c0_56] : memref<9x4x4xbf16, #tpu.memory_space<vmem>>, vector<1x4x4xbf16>
    %90 = vector.shape_cast %89 : vector<1x4x4xbf16> to vector<4x4xbf16>
    %91 = arith.truncf %88 : vector<4x256xf32> to vector<4x256xbf16>
    %cst_57 = arith.constant dense<0.000000e+00> : vector<4x256xf32>
    %92 = tpu.matmul %90, %91, %cst_57 {dimension_numbers = #tpu.dot_dimension_numbers<[1], [0], [0], [1], [0, 0, 1, 1], [], []>} : vector<4x4xbf16>, vector<4x256xbf16>, vector<4x256xf32> -> vector<4x256xf32>
    %93 = arith.addf %83, %92 : vector<4x256xf32>
    %c0_58 = arith.constant 0 : index
    %c0_59 = arith.constant 0 : index
    %94 = vector.load %arg5[%c0_58, %c0_59] : memref<4x1xf32, #tpu.memory_space<vmem>>, vector<4x1xf32>
    %95 = vector.broadcast %94 : vector<4x1xf32> to vector<4x256xf32>
    %96 = arith.addf %93, %95 : vector<4x256xf32>
    %cst_60 = arith.constant 0.000000e+00 : f32
    %97 = vector.broadcast %cst_60 : f32 to vector<4x256xf32>
    %98 = arith.maximumf %96, %97 : vector<4x256xf32>
    %cst_61 = arith.constant 0.000000e+00 : f32
    %99 = vector.broadcast %cst_61 : f32 to vector<8x256xf32>
    %c0_62 = arith.constant 0 : index
    %c128_63 = arith.constant 128 : index
    %100 = vector.load %arg15[%c0_62, %c128_63] : memref<8x512xf32, #tpu.memory_space<vmem>>, vector<4x256xf32>
    tpu.vector_store %arg15[%c0_62, %c128_63], %98 {strides = array<i32>} : memref<8x512xf32, #tpu.memory_space<vmem>>, vector<4x256xf32>,
    %c0_64 = arith.constant 0 : index
    %c111_65 = arith.constant 111 : index
    %101 = vector.load %arg15[%c0_64, %c111_65] : memref<8x512xf32, #tpu.memory_space<vmem>>, vector<4x256xf32>
    %cst_66 = arith.constant 0.000000e+00 : f32
    %102 = vector.broadcast %cst_66 : f32 to vector<4x256xf32>
    %103 = vector.shape_cast %6 : vector<1x256xi1> to vector<1x256xi1>
    %104 = vector.broadcast %103 : vector<1x256xi1> to vector<4x256xi1>
    %105 = arith.select %104, %101, %102 : vector<4x256xi1>, vector<4x256xf32>
    %c0_67 = arith.constant 0 : index
    %c0_68 = arith.constant 0 : index
    %c0_69 = arith.constant 0 : index
    %106 = vector.load %arg6[%c0_67, %c0_68, %c0_69] : memref<9x8x4xbf16, #tpu.memory_space<vmem>>, vector<1x8x4xbf16>
    %107 = vector.shape_cast %106 : vector<1x8x4xbf16> to vector<8x4xbf16>
    %108 = arith.truncf %105 : vector<4x256xf32> to vector<4x256xbf16>
    %cst_70 = arith.constant dense<0.000000e+00> : vector<8x256xf32>
    %109 = tpu.matmul %107, %108, %cst_70 {dimension_numbers = #tpu.dot_dimension_numbers<[1], [0], [0], [1], [0, 0, 1, 1], [], []>} : vector<8x4xbf16>, vector<4x256xbf16>, vector<8x256xf32> -> vector<8x256xf32>
    %110 = arith.addf %99, %109 : vector<8x256xf32>
    %c0_71 = arith.constant 0 : index
    %c112_72 = arith.constant 112 : index
    %111 = vector.load %arg15[%c0_71, %c112_72] : memref<8x512xf32, #tpu.memory_space<vmem>>, vector<4x256xf32>
    %c1_73 = arith.constant 1 : index
    %c0_74 = arith.constant 0 : index
    %c0_75 = arith.constant 0 : index
    %112 = vector.load %arg6[%c1_73, %c0_74, %c0_75] : memref<9x8x4xbf16, #tpu.memory_space<vmem>>, vector<1x8x4xbf16>
    %113 = vector.shape_cast %112 : vector<1x8x4xbf16> to vector<8x4xbf16>
    %114 = arith.truncf %111 : vector<4x256xf32> to vector<4x256xbf16>
    %cst_76 = arith.constant dense<0.000000e+00> : vector<8x256xf32>
    %115 = tpu.matmul %113, %114, %cst_76 {dimension_numbers = #tpu.dot_dimension_numbers<[1], [0], [0], [1], [0, 0, 1, 1], [], []>} : vector<8x4xbf16>, vector<4x256xbf16>, vector<8x256xf32> -> vector<8x256xf32>
    %116 = arith.addf %110, %115 : vector<8x256xf32>
    %c0_77 = arith.constant 0 : index
    %c113_78 = arith.constant 113 : index
    %117 = vector.load %arg15[%c0_77, %c113_78] : memref<8x512xf32, #tpu.memory_space<vmem>>, vector<4x256xf32>
    %cst_79 = arith.constant 0.000000e+00 : f32
    %118 = vector.broadcast %cst_79 : f32 to vector<4x256xf32>
    %119 = vector.shape_cast %9 : vector<1x256xi1> to vector<1x256xi1>
    %120 = vector.broadcast %119 : vector<1x256xi1> to vector<4x256xi1>
    %121 = arith.select %120, %117, %118 : vector<4x256xi1>, vector<4x256xf32>
    %c2_80 = arith.constant 2 : index
    %c0_81 = arith.constant 0 : index
    %c0_82 = arith.constant 0 : index
    %122 = vector.load %arg6[%c2_80, %c0_81, %c0_82] : memref<9x8x4xbf16, #tpu.memory_space<vmem>>, vector<1x8x4xbf16>
    %123 = vector.shape_cast %122 : vector<1x8x4xbf16> to vector<8x4xbf16>
    %124 = arith.truncf %121 : vector<4x256xf32> to vector<4x256xbf16>
    %cst_83 = arith.constant dense<0.000000e+00> : vector<8x256xf32>
    %125 = tpu.matmul %123, %124, %cst_83 {dimension_numbers = #tpu.dot_dimension_numbers<[1], [0], [0], [1], [0, 0, 1, 1], [], []>} : vector<8x4xbf16>, vector<4x256xbf16>, vector<8x256xf32> -> vector<8x256xf32>
    %126 = arith.addf %116, %125 : vector<8x256xf32>
    %c0_84 = arith.constant 0 : index
    %c127_85 = arith.constant 127 : index
    %127 = vector.load %arg15[%c0_84, %c127_85] : memref<8x512xf32, #tpu.memory_space<vmem>>, vector<4x256xf32>
    %cst_86 = arith.constant 0.000000e+00 : f32
    %128 = vector.broadcast %cst_86 : f32 to vector<4x256xf32>
    %129 = vector.shape_cast %6 : vector<1x256xi1> to vector<1x256xi1>
    %130 = vector.broadcast %129 : vector<1x256xi1> to vector<4x256xi1>
    %131 = arith.select %130, %127, %128 : vector<4x256xi1>, vector<4x256xf32>
    %c3_87 = arith.constant 3 : index
    %c0_88 = arith.constant 0 : index
    %c0_89 = arith.constant 0 : index
    %132 = vector.load %arg6[%c3_87, %c0_88, %c0_89] : memref<9x8x4xbf16, #tpu.memory_space<vmem>>, vector<1x8x4xbf16>
    %133 = vector.shape_cast %132 : vector<1x8x4xbf16> to vector<8x4xbf16>
    %134 = arith.truncf %131 : vector<4x256xf32> to vector<4x256xbf16>
    %cst_90 = arith.constant dense<0.000000e+00> : vector<8x256xf32>
    %135 = tpu.matmul %133, %134, %cst_90 {dimension_numbers = #tpu.dot_dimension_numbers<[1], [0], [0], [1], [0, 0, 1, 1], [], []>} : vector<8x4xbf16>, vector<4x256xbf16>, vector<8x256xf32> -> vector<8x256xf32>
    %136 = arith.addf %126, %135 : vector<8x256xf32>
    %c0_91 = arith.constant 0 : index
    %c128_92 = arith.constant 128 : index
    %137 = vector.load %arg15[%c0_91, %c128_92] : memref<8x512xf32, #tpu.memory_space<vmem>>, vector<4x256xf32>
    %c4_93 = arith.constant 4 : index
    %c0_94 = arith.constant 0 : index
    %c0_95 = arith.constant 0 : index
    %138 = vector.load %arg6[%c4_93, %c0_94, %c0_95] : memref<9x8x4xbf16, #tpu.memory_space<vmem>>, vector<1x8x4xbf16>
    %139 = vector.shape_cast %138 : vector<1x8x4xbf16> to vector<8x4xbf16>
    %140 = arith.truncf %137 : vector<4x256xf32> to vector<4x256xbf16>
    %cst_96 = arith.constant dense<0.000000e+00> : vector<8x256xf32>
    %141 = tpu.matmul %139, %140, %cst_96 {dimension_numbers = #tpu.dot_dimension_numbers<[1], [0], [0], [1], [0, 0, 1, 1], [], []>} : vector<8x4xbf16>, vector<4x256xbf16>, vector<8x256xf32> -> vector<8x256xf32>
    %142 = arith.addf %136, %141 : vector<8x256xf32>
    %c0_97 = arith.constant 0 : index
    %c129_98 = arith.constant 129 : index
    %143 = vector.load %arg15[%c0_97, %c129_98] : memref<8x512xf32, #tpu.memory_space<vmem>>, vector<4x256xf32>
    %cst_99 = arith.constant 0.000000e+00 : f32
    %144 = vector.broadcast %cst_99 : f32 to vector<4x256xf32>
    %145 = vector.shape_cast %9 : vector<1x256xi1> to vector<1x256xi1>
    %146 = vector.broadcast %145 : vector<1x256xi1> to vector<4x256xi1>
    %147 = arith.select %146, %143, %144 : vector<4x256xi1>, vector<4x256xf32>
    %c5_100 = arith.constant 5 : index
    %c0_101 = arith.constant 0 : index
    %c0_102 = arith.constant 0 : index
    %148 = vector.load %arg6[%c5_100, %c0_101, %c0_102] : memref<9x8x4xbf16, #tpu.memory_space<vmem>>, vector<1x8x4xbf16>
    %149 = vector.shape_cast %148 : vector<1x8x4xbf16> to vector<8x4xbf16>
    %150 = arith.truncf %147 : vector<4x256xf32> to vector<4x256xbf16>
    %cst_103 = arith.constant dense<0.000000e+00> : vector<8x256xf32>
    %151 = tpu.matmul %149, %150, %cst_103 {dimension_numbers = #tpu.dot_dimension_numbers<[1], [0], [0], [1], [0, 0, 1, 1], [], []>} : vector<8x4xbf16>, vector<4x256xbf16>, vector<8x256xf32> -> vector<8x256xf32>
    %152 = arith.addf %142, %151 : vector<8x256xf32>
    %c0_104 = arith.constant 0 : index
    %c143_105 = arith.constant 143 : index
    %153 = vector.load %arg15[%c0_104, %c143_105] : memref<8x512xf32, #tpu.memory_space<vmem>>, vector<4x256xf32>
    %cst_106 = arith.constant 0.000000e+00 : f32
    %154 = vector.broadcast %cst_106 : f32 to vector<4x256xf32>
    %155 = vector.shape_cast %6 : vector<1x256xi1> to vector<1x256xi1>
    %156 = vector.broadcast %155 : vector<1x256xi1> to vector<4x256xi1>
    %157 = arith.select %156, %153, %154 : vector<4x256xi1>, vector<4x256xf32>
    %c6_107 = arith.constant 6 : index
    %c0_108 = arith.constant 0 : index
    %c0_109 = arith.constant 0 : index
    %158 = vector.load %arg6[%c6_107, %c0_108, %c0_109] : memref<9x8x4xbf16, #tpu.memory_space<vmem>>, vector<1x8x4xbf16>
    %159 = vector.shape_cast %158 : vector<1x8x4xbf16> to vector<8x4xbf16>
    %160 = arith.truncf %157 : vector<4x256xf32> to vector<4x256xbf16>
    %cst_110 = arith.constant dense<0.000000e+00> : vector<8x256xf32>
    %161 = tpu.matmul %159, %160, %cst_110 {dimension_numbers = #tpu.dot_dimension_numbers<[1], [0], [0], [1], [0, 0, 1, 1], [], []>} : vector<8x4xbf16>, vector<4x256xbf16>, vector<8x256xf32> -> vector<8x256xf32>
    %162 = arith.addf %152, %161 : vector<8x256xf32>
    %c0_111 = arith.constant 0 : index
    %c144_112 = arith.constant 144 : index
    %163 = vector.load %arg15[%c0_111, %c144_112] : memref<8x512xf32, #tpu.memory_space<vmem>>, vector<4x256xf32>
    %c7_113 = arith.constant 7 : index
    %c0_114 = arith.constant 0 : index
    %c0_115 = arith.constant 0 : index
    %164 = vector.load %arg6[%c7_113, %c0_114, %c0_115] : memref<9x8x4xbf16, #tpu.memory_space<vmem>>, vector<1x8x4xbf16>
    %165 = vector.shape_cast %164 : vector<1x8x4xbf16> to vector<8x4xbf16>
    %166 = arith.truncf %163 : vector<4x256xf32> to vector<4x256xbf16>
    %cst_116 = arith.constant dense<0.000000e+00> : vector<8x256xf32>
    %167 = tpu.matmul %165, %166, %cst_116 {dimension_numbers = #tpu.dot_dimension_numbers<[1], [0], [0], [1], [0, 0, 1, 1], [], []>} : vector<8x4xbf16>, vector<4x256xbf16>, vector<8x256xf32> -> vector<8x256xf32>
    %168 = arith.addf %162, %167 : vector<8x256xf32>
    %c0_117 = arith.constant 0 : index
    %c145_118 = arith.constant 145 : index
    %169 = vector.load %arg15[%c0_117, %c145_118] : memref<8x512xf32, #tpu.memory_space<vmem>>, vector<4x256xf32>
    %cst_119 = arith.constant 0.000000e+00 : f32
    %170 = vector.broadcast %cst_119 : f32 to vector<4x256xf32>
    %171 = vector.shape_cast %9 : vector<1x256xi1> to vector<1x256xi1>
    %172 = vector.broadcast %171 : vector<1x256xi1> to vector<4x256xi1>
    %173 = arith.select %172, %169, %170 : vector<4x256xi1>, vector<4x256xf32>
    %c8_120 = arith.constant 8 : index
    %c0_121 = arith.constant 0 : index
    %c0_122 = arith.constant 0 : index
    %174 = vector.load %arg6[%c8_120, %c0_121, %c0_122] : memref<9x8x4xbf16, #tpu.memory_space<vmem>>, vector<1x8x4xbf16>
    %175 = vector.shape_cast %174 : vector<1x8x4xbf16> to vector<8x4xbf16>
    %176 = arith.truncf %173 : vector<4x256xf32> to vector<4x256xbf16>
    %cst_123 = arith.constant dense<0.000000e+00> : vector<8x256xf32>
    %177 = tpu.matmul %175, %176, %cst_123 {dimension_numbers = #tpu.dot_dimension_numbers<[1], [0], [0], [1], [0, 0, 1, 1], [], []>} : vector<8x4xbf16>, vector<4x256xbf16>, vector<8x256xf32> -> vector<8x256xf32>
    %178 = arith.addf %168, %177 : vector<8x256xf32>
    %c0_124 = arith.constant 0 : index
    %c0_125 = arith.constant 0 : index
    %179 = vector.load %arg7[%c0_124, %c0_125] : memref<8x1xf32, #tpu.memory_space<vmem>>, vector<8x1xf32>
    %180 = vector.broadcast %179 : vector<8x1xf32> to vector<8x256xf32>
    %181 = arith.addf %178, %180 : vector<8x256xf32>
    %cst_126 = arith.constant 0.000000e+00 : f32
    %182 = vector.broadcast %cst_126 : f32 to vector<8x256xf32>
    %183 = arith.maximumf %181, %182 : vector<8x256xf32>
    %cst_127 = arith.constant 0.000000e+00 : f32
    %184 = vector.broadcast %cst_127 : f32 to vector<4x256xf32>
    %c0_128 = arith.constant 0 : index
    %c128_129 = arith.constant 128 : index
    %185 = vector.load %arg15[%c0_128, %c128_129] : memref<8x512xf32, #tpu.memory_space<vmem>>, vector<8x256xf32>
    tpu.vector_store %arg15[%c0_128, %c128_129], %183 {strides = array<i32>} : memref<8x512xf32, #tpu.memory_space<vmem>>, vector<8x256xf32>,
    %c0_130 = arith.constant 0 : index
    %c111_131 = arith.constant 111 : index
    %186 = vector.load %arg15[%c0_130, %c111_131] : memref<8x512xf32, #tpu.memory_space<vmem>>, vector<8x256xf32>
    %cst_132 = arith.constant 0.000000e+00 : f32
    %187 = vector.broadcast %cst_132 : f32 to vector<8x256xf32>
    %188 = vector.shape_cast %6 : vector<1x256xi1> to vector<1x256xi1>
    %189 = vector.broadcast %188 : vector<1x256xi1> to vector<8x256xi1>
    %190 = arith.select %189, %186, %187 : vector<8x256xi1>, vector<8x256xf32>
    %c0_133 = arith.constant 0 : index
    %c0_134 = arith.constant 0 : index
    %c0_135 = arith.constant 0 : index
    %191 = vector.load %arg8[%c0_133, %c0_134, %c0_135] : memref<9x4x8xbf16, #tpu.memory_space<vmem>>, vector<1x4x8xbf16>
    %192 = vector.shape_cast %191 : vector<1x4x8xbf16> to vector<4x8xbf16>
    %193 = arith.truncf %190 : vector<8x256xf32> to vector<8x256xbf16>
    %cst_136 = arith.constant dense<0.000000e+00> : vector<4x256xf32>
    %194 = tpu.matmul %192, %193, %cst_136 {dimension_numbers = #tpu.dot_dimension_numbers<[1], [0], [0], [1], [0, 0, 1, 1], [], []>} : vector<4x8xbf16>, vector<8x256xbf16>, vector<4x256xf32> -> vector<4x256xf32>
    %195 = arith.addf %184, %194 : vector<4x256xf32>
    %c0_137 = arith.constant 0 : index
    %c112_138 = arith.constant 112 : index
    %196 = vector.load %arg15[%c0_137, %c112_138] : memref<8x512xf32, #tpu.memory_space<vmem>>, vector<8x256xf32>
    %c1_139 = arith.constant 1 : index
    %c0_140 = arith.constant 0 : index
    %c0_141 = arith.constant 0 : index
    %197 = vector.load %arg8[%c1_139, %c0_140, %c0_141] : memref<9x4x8xbf16, #tpu.memory_space<vmem>>, vector<1x4x8xbf16>
    %198 = vector.shape_cast %197 : vector<1x4x8xbf16> to vector<4x8xbf16>
    %199 = arith.truncf %196 : vector<8x256xf32> to vector<8x256xbf16>
    %cst_142 = arith.constant dense<0.000000e+00> : vector<4x256xf32>
    %200 = tpu.matmul %198, %199, %cst_142 {dimension_numbers = #tpu.dot_dimension_numbers<[1], [0], [0], [1], [0, 0, 1, 1], [], []>} : vector<4x8xbf16>, vector<8x256xbf16>, vector<4x256xf32> -> vector<4x256xf32>
    %201 = arith.addf %195, %200 : vector<4x256xf32>
    %c0_143 = arith.constant 0 : index
    %c113_144 = arith.constant 113 : index
    %202 = vector.load %arg15[%c0_143, %c113_144] : memref<8x512xf32, #tpu.memory_space<vmem>>, vector<8x256xf32>
    %cst_145 = arith.constant 0.000000e+00 : f32
    %203 = vector.broadcast %cst_145 : f32 to vector<8x256xf32>
    %204 = vector.shape_cast %9 : vector<1x256xi1> to vector<1x256xi1>
    %205 = vector.broadcast %204 : vector<1x256xi1> to vector<8x256xi1>
    %206 = arith.select %205, %202, %203 : vector<8x256xi1>, vector<8x256xf32>
    %c2_146 = arith.constant 2 : index
    %c0_147 = arith.constant 0 : index
    %c0_148 = arith.constant 0 : index
    %207 = vector.load %arg8[%c2_146, %c0_147, %c0_148] : memref<9x4x8xbf16, #tpu.memory_space<vmem>>, vector<1x4x8xbf16>
    %208 = vector.shape_cast %207 : vector<1x4x8xbf16> to vector<4x8xbf16>
    %209 = arith.truncf %206 : vector<8x256xf32> to vector<8x256xbf16>
    %cst_149 = arith.constant dense<0.000000e+00> : vector<4x256xf32>
    %210 = tpu.matmul %208, %209, %cst_149 {dimension_numbers = #tpu.dot_dimension_numbers<[1], [0], [0], [1], [0, 0, 1, 1], [], []>} : vector<4x8xbf16>, vector<8x256xbf16>, vector<4x256xf32> -> vector<4x256xf32>
    %211 = arith.addf %201, %210 : vector<4x256xf32>
    %c0_150 = arith.constant 0 : index
    %c127_151 = arith.constant 127 : index
    %212 = vector.load %arg15[%c0_150, %c127_151] : memref<8x512xf32, #tpu.memory_space<vmem>>, vector<8x256xf32>
    %cst_152 = arith.constant 0.000000e+00 : f32
    %213 = vector.broadcast %cst_152 : f32 to vector<8x256xf32>
    %214 = vector.shape_cast %6 : vector<1x256xi1> to vector<1x256xi1>
    %215 = vector.broadcast %214 : vector<1x256xi1> to vector<8x256xi1>
    %216 = arith.select %215, %212, %213 : vector<8x256xi1>, vector<8x256xf32>
    %c3_153 = arith.constant 3 : index
    %c0_154 = arith.constant 0 : index
    %c0_155 = arith.constant 0 : index
    %217 = vector.load %arg8[%c3_153, %c0_154, %c0_155] : memref<9x4x8xbf16, #tpu.memory_space<vmem>>, vector<1x4x8xbf16>
    %218 = vector.shape_cast %217 : vector<1x4x8xbf16> to vector<4x8xbf16>
    %219 = arith.truncf %216 : vector<8x256xf32> to vector<8x256xbf16>
    %cst_156 = arith.constant dense<0.000000e+00> : vector<4x256xf32>
    %220 = tpu.matmul %218, %219, %cst_156 {dimension_numbers = #tpu.dot_dimension_numbers<[1], [0], [0], [1], [0, 0, 1, 1], [], []>} : vector<4x8xbf16>, vector<8x256xbf16>, vector<4x256xf32> -> vector<4x256xf32>
    %221 = arith.addf %211, %220 : vector<4x256xf32>
    %c0_157 = arith.constant 0 : index
    %c128_158 = arith.constant 128 : index
    %222 = vector.load %arg15[%c0_157, %c128_158] : memref<8x512xf32, #tpu.memory_space<vmem>>, vector<8x256xf32>
    %c4_159 = arith.constant 4 : index
    %c0_160 = arith.constant 0 : index
    %c0_161 = arith.constant 0 : index
    %223 = vector.load %arg8[%c4_159, %c0_160, %c0_161] : memref<9x4x8xbf16, #tpu.memory_space<vmem>>, vector<1x4x8xbf16>
    %224 = vector.shape_cast %223 : vector<1x4x8xbf16> to vector<4x8xbf16>
    %225 = arith.truncf %222 : vector<8x256xf32> to vector<8x256xbf16>
    %cst_162 = arith.constant dense<0.000000e+00> : vector<4x256xf32>
    %226 = tpu.matmul %224, %225, %cst_162 {dimension_numbers = #tpu.dot_dimension_numbers<[1], [0], [0], [1], [0, 0, 1, 1], [], []>} : vector<4x8xbf16>, vector<8x256xbf16>, vector<4x256xf32> -> vector<4x256xf32>
    %227 = arith.addf %221, %226 : vector<4x256xf32>
    %c0_163 = arith.constant 0 : index
    %c129_164 = arith.constant 129 : index
    %228 = vector.load %arg15[%c0_163, %c129_164] : memref<8x512xf32, #tpu.memory_space<vmem>>, vector<8x256xf32>
    %cst_165 = arith.constant 0.000000e+00 : f32
    %229 = vector.broadcast %cst_165 : f32 to vector<8x256xf32>
    %230 = vector.shape_cast %9 : vector<1x256xi1> to vector<1x256xi1>
    %231 = vector.broadcast %230 : vector<1x256xi1> to vector<8x256xi1>
    %232 = arith.select %231, %228, %229 : vector<8x256xi1>, vector<8x256xf32>
    %c5_166 = arith.constant 5 : index
    %c0_167 = arith.constant 0 : index
    %c0_168 = arith.constant 0 : index
    %233 = vector.load %arg8[%c5_166, %c0_167, %c0_168] : memref<9x4x8xbf16, #tpu.memory_space<vmem>>, vector<1x4x8xbf16>
    %234 = vector.shape_cast %233 : vector<1x4x8xbf16> to vector<4x8xbf16>
    %235 = arith.truncf %232 : vector<8x256xf32> to vector<8x256xbf16>
    %cst_169 = arith.constant dense<0.000000e+00> : vector<4x256xf32>
    %236 = tpu.matmul %234, %235, %cst_169 {dimension_numbers = #tpu.dot_dimension_numbers<[1], [0], [0], [1], [0, 0, 1, 1], [], []>} : vector<4x8xbf16>, vector<8x256xbf16>, vector<4x256xf32> -> vector<4x256xf32>
    %237 = arith.addf %227, %236 : vector<4x256xf32>
    %c0_170 = arith.constant 0 : index
    %c143_171 = arith.constant 143 : index
    %238 = vector.load %arg15[%c0_170, %c143_171] : memref<8x512xf32, #tpu.memory_space<vmem>>, vector<8x256xf32>
    %cst_172 = arith.constant 0.000000e+00 : f32
    %239 = vector.broadcast %cst_172 : f32 to vector<8x256xf32>
    %240 = vector.shape_cast %6 : vector<1x256xi1> to vector<1x256xi1>
    %241 = vector.broadcast %240 : vector<1x256xi1> to vector<8x256xi1>
    %242 = arith.select %241, %238, %239 : vector<8x256xi1>, vector<8x256xf32>
    %c6_173 = arith.constant 6 : index
    %c0_174 = arith.constant 0 : index
    %c0_175 = arith.constant 0 : index
    %243 = vector.load %arg8[%c6_173, %c0_174, %c0_175] : memref<9x4x8xbf16, #tpu.memory_space<vmem>>, vector<1x4x8xbf16>
    %244 = vector.shape_cast %243 : vector<1x4x8xbf16> to vector<4x8xbf16>
    %245 = arith.truncf %242 : vector<8x256xf32> to vector<8x256xbf16>
    %cst_176 = arith.constant dense<0.000000e+00> : vector<4x256xf32>
    %246 = tpu.matmul %244, %245, %cst_176 {dimension_numbers = #tpu.dot_dimension_numbers<[1], [0], [0], [1], [0, 0, 1, 1], [], []>} : vector<4x8xbf16>, vector<8x256xbf16>, vector<4x256xf32> -> vector<4x256xf32>
    %247 = arith.addf %237, %246 : vector<4x256xf32>
    %c0_177 = arith.constant 0 : index
    %c144_178 = arith.constant 144 : index
    %248 = vector.load %arg15[%c0_177, %c144_178] : memref<8x512xf32, #tpu.memory_space<vmem>>, vector<8x256xf32>
    %c7_179 = arith.constant 7 : index
    %c0_180 = arith.constant 0 : index
    %c0_181 = arith.constant 0 : index
    %249 = vector.load %arg8[%c7_179, %c0_180, %c0_181] : memref<9x4x8xbf16, #tpu.memory_space<vmem>>, vector<1x4x8xbf16>
    %250 = vector.shape_cast %249 : vector<1x4x8xbf16> to vector<4x8xbf16>
    %251 = arith.truncf %248 : vector<8x256xf32> to vector<8x256xbf16>
    %cst_182 = arith.constant dense<0.000000e+00> : vector<4x256xf32>
    %252 = tpu.matmul %250, %251, %cst_182 {dimension_numbers = #tpu.dot_dimension_numbers<[1], [0], [0], [1], [0, 0, 1, 1], [], []>} : vector<4x8xbf16>, vector<8x256xbf16>, vector<4x256xf32> -> vector<4x256xf32>
    %253 = arith.addf %247, %252 : vector<4x256xf32>
    %c0_183 = arith.constant 0 : index
    %c145_184 = arith.constant 145 : index
    %254 = vector.load %arg15[%c0_183, %c145_184] : memref<8x512xf32, #tpu.memory_space<vmem>>, vector<8x256xf32>
    %cst_185 = arith.constant 0.000000e+00 : f32
    %255 = vector.broadcast %cst_185 : f32 to vector<8x256xf32>
    %256 = vector.shape_cast %9 : vector<1x256xi1> to vector<1x256xi1>
    %257 = vector.broadcast %256 : vector<1x256xi1> to vector<8x256xi1>
    %258 = arith.select %257, %254, %255 : vector<8x256xi1>, vector<8x256xf32>
    %c8_186 = arith.constant 8 : index
    %c0_187 = arith.constant 0 : index
    %c0_188 = arith.constant 0 : index
    %259 = vector.load %arg8[%c8_186, %c0_187, %c0_188] : memref<9x4x8xbf16, #tpu.memory_space<vmem>>, vector<1x4x8xbf16>
    %260 = vector.shape_cast %259 : vector<1x4x8xbf16> to vector<4x8xbf16>
    %261 = arith.truncf %258 : vector<8x256xf32> to vector<8x256xbf16>
    %cst_189 = arith.constant dense<0.000000e+00> : vector<4x256xf32>
    %262 = tpu.matmul %260, %261, %cst_189 {dimension_numbers = #tpu.dot_dimension_numbers<[1], [0], [0], [1], [0, 0, 1, 1], [], []>} : vector<4x8xbf16>, vector<8x256xbf16>, vector<4x256xf32> -> vector<4x256xf32>
    %263 = arith.addf %253, %262 : vector<4x256xf32>
    %c0_190 = arith.constant 0 : index
    %c0_191 = arith.constant 0 : index
    %264 = vector.load %arg9[%c0_190, %c0_191] : memref<4x1xf32, #tpu.memory_space<vmem>>, vector<4x1xf32>
    %265 = vector.broadcast %264 : vector<4x1xf32> to vector<4x256xf32>
    %266 = arith.addf %263, %265 : vector<4x256xf32>
    %267 = arith.addf %96, %266 : vector<4x256xf32>
    %268 = arith.addf %267, %13 : vector<4x256xf32>
    %cst_192 = arith.constant 0.000000e+00 : f32
    %269 = vector.broadcast %cst_192 : f32 to vector<4x256xf32>
    %270 = arith.maximumf %268, %269 : vector<4x256xf32>
    %cst_193 = arith.constant 0.000000e+00 : f32
    %271 = vector.broadcast %cst_193 : f32 to vector<8x256xf32>
    %c0_194 = arith.constant 0 : index
    %c128_195 = arith.constant 128 : index
    %272 = vector.load %arg15[%c0_194, %c128_195] : memref<8x512xf32, #tpu.memory_space<vmem>>, vector<4x256xf32>
    tpu.vector_store %arg15[%c0_194, %c128_195], %270 {strides = array<i32>} : memref<8x512xf32, #tpu.memory_space<vmem>>, vector<4x256xf32>,
    %c0_196 = arith.constant 0 : index
    %c111_197 = arith.constant 111 : index
    %273 = vector.load %arg15[%c0_196, %c111_197] : memref<8x512xf32, #tpu.memory_space<vmem>>, vector<4x256xf32>
    %cst_198 = arith.constant 0.000000e+00 : f32
    %274 = vector.broadcast %cst_198 : f32 to vector<4x256xf32>
    %275 = vector.shape_cast %6 : vector<1x256xi1> to vector<1x256xi1>
    %276 = vector.broadcast %275 : vector<1x256xi1> to vector<4x256xi1>
    %277 = arith.select %276, %273, %274 : vector<4x256xi1>, vector<4x256xf32>
    %c0_199 = arith.constant 0 : index
    %c0_200 = arith.constant 0 : index
    %c0_201 = arith.constant 0 : index
    %278 = vector.load %arg10[%c0_199, %c0_200, %c0_201] : memref<9x8x4xbf16, #tpu.memory_space<vmem>>, vector<1x8x4xbf16>
    %279 = vector.shape_cast %278 : vector<1x8x4xbf16> to vector<8x4xbf16>
    %280 = arith.truncf %277 : vector<4x256xf32> to vector<4x256xbf16>
    %cst_202 = arith.constant dense<0.000000e+00> : vector<8x256xf32>
    %281 = tpu.matmul %279, %280, %cst_202 {dimension_numbers = #tpu.dot_dimension_numbers<[1], [0], [0], [1], [0, 0, 1, 1], [], []>} : vector<8x4xbf16>, vector<4x256xbf16>, vector<8x256xf32> -> vector<8x256xf32>
    %282 = arith.addf %271, %281 : vector<8x256xf32>
    %c0_203 = arith.constant 0 : index
    %c112_204 = arith.constant 112 : index
    %283 = vector.load %arg15[%c0_203, %c112_204] : memref<8x512xf32, #tpu.memory_space<vmem>>, vector<4x256xf32>
    %c1_205 = arith.constant 1 : index
    %c0_206 = arith.constant 0 : index
    %c0_207 = arith.constant 0 : index
    %284 = vector.load %arg10[%c1_205, %c0_206, %c0_207] : memref<9x8x4xbf16, #tpu.memory_space<vmem>>, vector<1x8x4xbf16>
    %285 = vector.shape_cast %284 : vector<1x8x4xbf16> to vector<8x4xbf16>
    %286 = arith.truncf %283 : vector<4x256xf32> to vector<4x256xbf16>
    %cst_208 = arith.constant dense<0.000000e+00> : vector<8x256xf32>
    %287 = tpu.matmul %285, %286, %cst_208 {dimension_numbers = #tpu.dot_dimension_numbers<[1], [0], [0], [1], [0, 0, 1, 1], [], []>} : vector<8x4xbf16>, vector<4x256xbf16>, vector<8x256xf32> -> vector<8x256xf32>
    %288 = arith.addf %282, %287 : vector<8x256xf32>
    %c0_209 = arith.constant 0 : index
    %c113_210 = arith.constant 113 : index
    %289 = vector.load %arg15[%c0_209, %c113_210] : memref<8x512xf32, #tpu.memory_space<vmem>>, vector<4x256xf32>
    %cst_211 = arith.constant 0.000000e+00 : f32
    %290 = vector.broadcast %cst_211 : f32 to vector<4x256xf32>
    %291 = vector.shape_cast %9 : vector<1x256xi1> to vector<1x256xi1>
    %292 = vector.broadcast %291 : vector<1x256xi1> to vector<4x256xi1>
    %293 = arith.select %292, %289, %290 : vector<4x256xi1>, vector<4x256xf32>
    %c2_212 = arith.constant 2 : index
    %c0_213 = arith.constant 0 : index
    %c0_214 = arith.constant 0 : index
    %294 = vector.load %arg10[%c2_212, %c0_213, %c0_214] : memref<9x8x4xbf16, #tpu.memory_space<vmem>>, vector<1x8x4xbf16>
    %295 = vector.shape_cast %294 : vector<1x8x4xbf16> to vector<8x4xbf16>
    %296 = arith.truncf %293 : vector<4x256xf32> to vector<4x256xbf16>
    %cst_215 = arith.constant dense<0.000000e+00> : vector<8x256xf32>
    %297 = tpu.matmul %295, %296, %cst_215 {dimension_numbers = #tpu.dot_dimension_numbers<[1], [0], [0], [1], [0, 0, 1, 1], [], []>} : vector<8x4xbf16>, vector<4x256xbf16>, vector<8x256xf32> -> vector<8x256xf32>
    %298 = arith.addf %288, %297 : vector<8x256xf32>
    %c0_216 = arith.constant 0 : index
    %c127_217 = arith.constant 127 : index
    %299 = vector.load %arg15[%c0_216, %c127_217] : memref<8x512xf32, #tpu.memory_space<vmem>>, vector<4x256xf32>
    %cst_218 = arith.constant 0.000000e+00 : f32
    %300 = vector.broadcast %cst_218 : f32 to vector<4x256xf32>
    %301 = vector.shape_cast %6 : vector<1x256xi1> to vector<1x256xi1>
    %302 = vector.broadcast %301 : vector<1x256xi1> to vector<4x256xi1>
    %303 = arith.select %302, %299, %300 : vector<4x256xi1>, vector<4x256xf32>
    %c3_219 = arith.constant 3 : index
    %c0_220 = arith.constant 0 : index
    %c0_221 = arith.constant 0 : index
    %304 = vector.load %arg10[%c3_219, %c0_220, %c0_221] : memref<9x8x4xbf16, #tpu.memory_space<vmem>>, vector<1x8x4xbf16>
    %305 = vector.shape_cast %304 : vector<1x8x4xbf16> to vector<8x4xbf16>
    %306 = arith.truncf %303 : vector<4x256xf32> to vector<4x256xbf16>
    %cst_222 = arith.constant dense<0.000000e+00> : vector<8x256xf32>
    %307 = tpu.matmul %305, %306, %cst_222 {dimension_numbers = #tpu.dot_dimension_numbers<[1], [0], [0], [1], [0, 0, 1, 1], [], []>} : vector<8x4xbf16>, vector<4x256xbf16>, vector<8x256xf32> -> vector<8x256xf32>
    %308 = arith.addf %298, %307 : vector<8x256xf32>
    %c0_223 = arith.constant 0 : index
    %c128_224 = arith.constant 128 : index
    %309 = vector.load %arg15[%c0_223, %c128_224] : memref<8x512xf32, #tpu.memory_space<vmem>>, vector<4x256xf32>
    %c4_225 = arith.constant 4 : index
    %c0_226 = arith.constant 0 : index
    %c0_227 = arith.constant 0 : index
    %310 = vector.load %arg10[%c4_225, %c0_226, %c0_227] : memref<9x8x4xbf16, #tpu.memory_space<vmem>>, vector<1x8x4xbf16>
    %311 = vector.shape_cast %310 : vector<1x8x4xbf16> to vector<8x4xbf16>
    %312 = arith.truncf %309 : vector<4x256xf32> to vector<4x256xbf16>
    %cst_228 = arith.constant dense<0.000000e+00> : vector<8x256xf32>
    %313 = tpu.matmul %311, %312, %cst_228 {dimension_numbers = #tpu.dot_dimension_numbers<[1], [0], [0], [1], [0, 0, 1, 1], [], []>} : vector<8x4xbf16>, vector<4x256xbf16>, vector<8x256xf32> -> vector<8x256xf32>
    %314 = arith.addf %308, %313 : vector<8x256xf32>
    %c0_229 = arith.constant 0 : index
    %c129_230 = arith.constant 129 : index
    %315 = vector.load %arg15[%c0_229, %c129_230] : memref<8x512xf32, #tpu.memory_space<vmem>>, vector<4x256xf32>
    %cst_231 = arith.constant 0.000000e+00 : f32
    %316 = vector.broadcast %cst_231 : f32 to vector<4x256xf32>
    %317 = vector.shape_cast %9 : vector<1x256xi1> to vector<1x256xi1>
    %318 = vector.broadcast %317 : vector<1x256xi1> to vector<4x256xi1>
    %319 = arith.select %318, %315, %316 : vector<4x256xi1>, vector<4x256xf32>
    %c5_232 = arith.constant 5 : index
    %c0_233 = arith.constant 0 : index
    %c0_234 = arith.constant 0 : index
    %320 = vector.load %arg10[%c5_232, %c0_233, %c0_234] : memref<9x8x4xbf16, #tpu.memory_space<vmem>>, vector<1x8x4xbf16>
    %321 = vector.shape_cast %320 : vector<1x8x4xbf16> to vector<8x4xbf16>
    %322 = arith.truncf %319 : vector<4x256xf32> to vector<4x256xbf16>
    %cst_235 = arith.constant dense<0.000000e+00> : vector<8x256xf32>
    %323 = tpu.matmul %321, %322, %cst_235 {dimension_numbers = #tpu.dot_dimension_numbers<[1], [0], [0], [1], [0, 0, 1, 1], [], []>} : vector<8x4xbf16>, vector<4x256xbf16>, vector<8x256xf32> -> vector<8x256xf32>
    %324 = arith.addf %314, %323 : vector<8x256xf32>
    %c0_236 = arith.constant 0 : index
    %c143_237 = arith.constant 143 : index
    %325 = vector.load %arg15[%c0_236, %c143_237] : memref<8x512xf32, #tpu.memory_space<vmem>>, vector<4x256xf32>
    %cst_238 = arith.constant 0.000000e+00 : f32
    %326 = vector.broadcast %cst_238 : f32 to vector<4x256xf32>
    %327 = vector.shape_cast %6 : vector<1x256xi1> to vector<1x256xi1>
    %328 = vector.broadcast %327 : vector<1x256xi1> to vector<4x256xi1>
    %329 = arith.select %328, %325, %326 : vector<4x256xi1>, vector<4x256xf32>
    %c6_239 = arith.constant 6 : index
    %c0_240 = arith.constant 0 : index
    %c0_241 = arith.constant 0 : index
    %330 = vector.load %arg10[%c6_239, %c0_240, %c0_241] : memref<9x8x4xbf16, #tpu.memory_space<vmem>>, vector<1x8x4xbf16>
    %331 = vector.shape_cast %330 : vector<1x8x4xbf16> to vector<8x4xbf16>
    %332 = arith.truncf %329 : vector<4x256xf32> to vector<4x256xbf16>
    %cst_242 = arith.constant dense<0.000000e+00> : vector<8x256xf32>
    %333 = tpu.matmul %331, %332, %cst_242 {dimension_numbers = #tpu.dot_dimension_numbers<[1], [0], [0], [1], [0, 0, 1, 1], [], []>} : vector<8x4xbf16>, vector<4x256xbf16>, vector<8x256xf32> -> vector<8x256xf32>
    %334 = arith.addf %324, %333 : vector<8x256xf32>
    %c0_243 = arith.constant 0 : index
    %c144_244 = arith.constant 144 : index
    %335 = vector.load %arg15[%c0_243, %c144_244] : memref<8x512xf32, #tpu.memory_space<vmem>>, vector<4x256xf32>
    %c7_245 = arith.constant 7 : index
    %c0_246 = arith.constant 0 : index
    %c0_247 = arith.constant 0 : index
    %336 = vector.load %arg10[%c7_245, %c0_246, %c0_247] : memref<9x8x4xbf16, #tpu.memory_space<vmem>>, vector<1x8x4xbf16>
    %337 = vector.shape_cast %336 : vector<1x8x4xbf16> to vector<8x4xbf16>
    %338 = arith.truncf %335 : vector<4x256xf32> to vector<4x256xbf16>
    %cst_248 = arith.constant dense<0.000000e+00> : vector<8x256xf32>
    %339 = tpu.matmul %337, %338, %cst_248 {dimension_numbers = #tpu.dot_dimension_numbers<[1], [0], [0], [1], [0, 0, 1, 1], [], []>} : vector<8x4xbf16>, vector<4x256xbf16>, vector<8x256xf32> -> vector<8x256xf32>
    %340 = arith.addf %334, %339 : vector<8x256xf32>
    %c0_249 = arith.constant 0 : index
    %c145_250 = arith.constant 145 : index
    %341 = vector.load %arg15[%c0_249, %c145_250] : memref<8x512xf32, #tpu.memory_space<vmem>>, vector<4x256xf32>
    %cst_251 = arith.constant 0.000000e+00 : f32
    %342 = vector.broadcast %cst_251 : f32 to vector<4x256xf32>
    %343 = vector.shape_cast %9 : vector<1x256xi1> to vector<1x256xi1>
    %344 = vector.broadcast %343 : vector<1x256xi1> to vector<4x256xi1>
    %345 = arith.select %344, %341, %342 : vector<4x256xi1>, vector<4x256xf32>
    %c8_252 = arith.constant 8 : index
    %c0_253 = arith.constant 0 : index
    %c0_254 = arith.constant 0 : index
    %346 = vector.load %arg10[%c8_252, %c0_253, %c0_254] : memref<9x8x4xbf16, #tpu.memory_space<vmem>>, vector<1x8x4xbf16>
    %347 = vector.shape_cast %346 : vector<1x8x4xbf16> to vector<8x4xbf16>
    %348 = arith.truncf %345 : vector<4x256xf32> to vector<4x256xbf16>
    %cst_255 = arith.constant dense<0.000000e+00> : vector<8x256xf32>
    %349 = tpu.matmul %347, %348, %cst_255 {dimension_numbers = #tpu.dot_dimension_numbers<[1], [0], [0], [1], [0, 0, 1, 1], [], []>} : vector<8x4xbf16>, vector<4x256xbf16>, vector<8x256xf32> -> vector<8x256xf32>
    %350 = arith.addf %340, %349 : vector<8x256xf32>
    %c0_256 = arith.constant 0 : index
    %c0_257 = arith.constant 0 : index
    %351 = vector.load %arg11[%c0_256, %c0_257] : memref<8x1xf32, #tpu.memory_space<vmem>>, vector<8x1xf32>
    %352 = vector.broadcast %351 : vector<8x1xf32> to vector<8x256xf32>
    %353 = arith.addf %350, %352 : vector<8x256xf32>
    %cst_258 = arith.constant 0.000000e+00 : f32
    %354 = vector.broadcast %cst_258 : f32 to vector<8x256xf32>
    %355 = arith.maximumf %353, %354 : vector<8x256xf32>
    %cst_259 = arith.constant 0.000000e+00 : f32
    %356 = vector.broadcast %cst_259 : f32 to vector<4x256xf32>
    %c0_260 = arith.constant 0 : index
    %c128_261 = arith.constant 128 : index
    %357 = vector.load %arg15[%c0_260, %c128_261] : memref<8x512xf32, #tpu.memory_space<vmem>>, vector<8x256xf32>
    tpu.vector_store %arg15[%c0_260, %c128_261], %355 {strides = array<i32>} : memref<8x512xf32, #tpu.memory_space<vmem>>, vector<8x256xf32>,
    %c0_262 = arith.constant 0 : index
    %c111_263 = arith.constant 111 : index
    %358 = vector.load %arg15[%c0_262, %c111_263] : memref<8x512xf32, #tpu.memory_space<vmem>>, vector<8x256xf32>
    %cst_264 = arith.constant 0.000000e+00 : f32
    %359 = vector.broadcast %cst_264 : f32 to vector<8x256xf32>
    %360 = vector.shape_cast %6 : vector<1x256xi1> to vector<1x256xi1>
    %361 = vector.broadcast %360 : vector<1x256xi1> to vector<8x256xi1>
    %362 = arith.select %361, %358, %359 : vector<8x256xi1>, vector<8x256xf32>
    %c0_265 = arith.constant 0 : index
    %c0_266 = arith.constant 0 : index
    %c0_267 = arith.constant 0 : index
    %363 = vector.load %arg12[%c0_265, %c0_266, %c0_267] : memref<9x4x8xbf16, #tpu.memory_space<vmem>>, vector<1x4x8xbf16>
    %364 = vector.shape_cast %363 : vector<1x4x8xbf16> to vector<4x8xbf16>
    %365 = arith.truncf %362 : vector<8x256xf32> to vector<8x256xbf16>
    %cst_268 = arith.constant dense<0.000000e+00> : vector<4x256xf32>
    %366 = tpu.matmul %364, %365, %cst_268 {dimension_numbers = #tpu.dot_dimension_numbers<[1], [0], [0], [1], [0, 0, 1, 1], [], []>} : vector<4x8xbf16>, vector<8x256xbf16>, vector<4x256xf32> -> vector<4x256xf32>
    %367 = arith.addf %356, %366 : vector<4x256xf32>
    %c0_269 = arith.constant 0 : index
    %c112_270 = arith.constant 112 : index
    %368 = vector.load %arg15[%c0_269, %c112_270] : memref<8x512xf32, #tpu.memory_space<vmem>>, vector<8x256xf32>
    %c1_271 = arith.constant 1 : index
    %c0_272 = arith.constant 0 : index
    %c0_273 = arith.constant 0 : index
    %369 = vector.load %arg12[%c1_271, %c0_272, %c0_273] : memref<9x4x8xbf16, #tpu.memory_space<vmem>>, vector<1x4x8xbf16>
    %370 = vector.shape_cast %369 : vector<1x4x8xbf16> to vector<4x8xbf16>
    %371 = arith.truncf %368 : vector<8x256xf32> to vector<8x256xbf16>
    %cst_274 = arith.constant dense<0.000000e+00> : vector<4x256xf32>
    %372 = tpu.matmul %370, %371, %cst_274 {dimension_numbers = #tpu.dot_dimension_numbers<[1], [0], [0], [1], [0, 0, 1, 1], [], []>} : vector<4x8xbf16>, vector<8x256xbf16>, vector<4x256xf32> -> vector<4x256xf32>
    %373 = arith.addf %367, %372 : vector<4x256xf32>
    %c0_275 = arith.constant 0 : index
    %c113_276 = arith.constant 113 : index
    %374 = vector.load %arg15[%c0_275, %c113_276] : memref<8x512xf32, #tpu.memory_space<vmem>>, vector<8x256xf32>
    %cst_277 = arith.constant 0.000000e+00 : f32
    %375 = vector.broadcast %cst_277 : f32 to vector<8x256xf32>
    %376 = vector.shape_cast %9 : vector<1x256xi1> to vector<1x256xi1>
    %377 = vector.broadcast %376 : vector<1x256xi1> to vector<8x256xi1>
    %378 = arith.select %377, %374, %375 : vector<8x256xi1>, vector<8x256xf32>
    %c2_278 = arith.constant 2 : index
    %c0_279 = arith.constant 0 : index
    %c0_280 = arith.constant 0 : index
    %379 = vector.load %arg12[%c2_278, %c0_279, %c0_280] : memref<9x4x8xbf16, #tpu.memory_space<vmem>>, vector<1x4x8xbf16>
    %380 = vector.shape_cast %379 : vector<1x4x8xbf16> to vector<4x8xbf16>
    %381 = arith.truncf %378 : vector<8x256xf32> to vector<8x256xbf16>
    %cst_281 = arith.constant dense<0.000000e+00> : vector<4x256xf32>
    %382 = tpu.matmul %380, %381, %cst_281 {dimension_numbers = #tpu.dot_dimension_numbers<[1], [0], [0], [1], [0, 0, 1, 1], [], []>} : vector<4x8xbf16>, vector<8x256xbf16>, vector<4x256xf32> -> vector<4x256xf32>
    %383 = arith.addf %373, %382 : vector<4x256xf32>
    %c0_282 = arith.constant 0 : index
    %c127_283 = arith.constant 127 : index
    %384 = vector.load %arg15[%c0_282, %c127_283] : memref<8x512xf32, #tpu.memory_space<vmem>>, vector<8x256xf32>
    %cst_284 = arith.constant 0.000000e+00 : f32
    %385 = vector.broadcast %cst_284 : f32 to vector<8x256xf32>
    %386 = vector.shape_cast %6 : vector<1x256xi1> to vector<1x256xi1>
    %387 = vector.broadcast %386 : vector<1x256xi1> to vector<8x256xi1>
    %388 = arith.select %387, %384, %385 : vector<8x256xi1>, vector<8x256xf32>
    %c3_285 = arith.constant 3 : index
    %c0_286 = arith.constant 0 : index
    %c0_287 = arith.constant 0 : index
    %389 = vector.load %arg12[%c3_285, %c0_286, %c0_287] : memref<9x4x8xbf16, #tpu.memory_space<vmem>>, vector<1x4x8xbf16>
    %390 = vector.shape_cast %389 : vector<1x4x8xbf16> to vector<4x8xbf16>
    %391 = arith.truncf %388 : vector<8x256xf32> to vector<8x256xbf16>
    %cst_288 = arith.constant dense<0.000000e+00> : vector<4x256xf32>
    %392 = tpu.matmul %390, %391, %cst_288 {dimension_numbers = #tpu.dot_dimension_numbers<[1], [0], [0], [1], [0, 0, 1, 1], [], []>} : vector<4x8xbf16>, vector<8x256xbf16>, vector<4x256xf32> -> vector<4x256xf32>
    %393 = arith.addf %383, %392 : vector<4x256xf32>
    %c0_289 = arith.constant 0 : index
    %c128_290 = arith.constant 128 : index
    %394 = vector.load %arg15[%c0_289, %c128_290] : memref<8x512xf32, #tpu.memory_space<vmem>>, vector<8x256xf32>
    %c4_291 = arith.constant 4 : index
    %c0_292 = arith.constant 0 : index
    %c0_293 = arith.constant 0 : index
    %395 = vector.load %arg12[%c4_291, %c0_292, %c0_293] : memref<9x4x8xbf16, #tpu.memory_space<vmem>>, vector<1x4x8xbf16>
    %396 = vector.shape_cast %395 : vector<1x4x8xbf16> to vector<4x8xbf16>
    %397 = arith.truncf %394 : vector<8x256xf32> to vector<8x256xbf16>
    %cst_294 = arith.constant dense<0.000000e+00> : vector<4x256xf32>
    %398 = tpu.matmul %396, %397, %cst_294 {dimension_numbers = #tpu.dot_dimension_numbers<[1], [0], [0], [1], [0, 0, 1, 1], [], []>} : vector<4x8xbf16>, vector<8x256xbf16>, vector<4x256xf32> -> vector<4x256xf32>
    %399 = arith.addf %393, %398 : vector<4x256xf32>
    %c0_295 = arith.constant 0 : index
    %c129_296 = arith.constant 129 : index
    %400 = vector.load %arg15[%c0_295, %c129_296] : memref<8x512xf32, #tpu.memory_space<vmem>>, vector<8x256xf32>
    %cst_297 = arith.constant 0.000000e+00 : f32
    %401 = vector.broadcast %cst_297 : f32 to vector<8x256xf32>
    %402 = vector.shape_cast %9 : vector<1x256xi1> to vector<1x256xi1>
    %403 = vector.broadcast %402 : vector<1x256xi1> to vector<8x256xi1>
    %404 = arith.select %403, %400, %401 : vector<8x256xi1>, vector<8x256xf32>
    %c5_298 = arith.constant 5 : index
    %c0_299 = arith.constant 0 : index
    %c0_300 = arith.constant 0 : index
    %405 = vector.load %arg12[%c5_298, %c0_299, %c0_300] : memref<9x4x8xbf16, #tpu.memory_space<vmem>>, vector<1x4x8xbf16>
    %406 = vector.shape_cast %405 : vector<1x4x8xbf16> to vector<4x8xbf16>
    %407 = arith.truncf %404 : vector<8x256xf32> to vector<8x256xbf16>
    %cst_301 = arith.constant dense<0.000000e+00> : vector<4x256xf32>
    %408 = tpu.matmul %406, %407, %cst_301 {dimension_numbers = #tpu.dot_dimension_numbers<[1], [0], [0], [1], [0, 0, 1, 1], [], []>} : vector<4x8xbf16>, vector<8x256xbf16>, vector<4x256xf32> -> vector<4x256xf32>
    %409 = arith.addf %399, %408 : vector<4x256xf32>
    %c0_302 = arith.constant 0 : index
    %c143_303 = arith.constant 143 : index
    %410 = vector.load %arg15[%c0_302, %c143_303] : memref<8x512xf32, #tpu.memory_space<vmem>>, vector<8x256xf32>
    %cst_304 = arith.constant 0.000000e+00 : f32
    %411 = vector.broadcast %cst_304 : f32 to vector<8x256xf32>
    %412 = vector.shape_cast %6 : vector<1x256xi1> to vector<1x256xi1>
    %413 = vector.broadcast %412 : vector<1x256xi1> to vector<8x256xi1>
    %414 = arith.select %413, %410, %411 : vector<8x256xi1>, vector<8x256xf32>
    %c6_305 = arith.constant 6 : index
    %c0_306 = arith.constant 0 : index
    %c0_307 = arith.constant 0 : index
    %415 = vector.load %arg12[%c6_305, %c0_306, %c0_307] : memref<9x4x8xbf16, #tpu.memory_space<vmem>>, vector<1x4x8xbf16>
    %416 = vector.shape_cast %415 : vector<1x4x8xbf16> to vector<4x8xbf16>
    %417 = arith.truncf %414 : vector<8x256xf32> to vector<8x256xbf16>
    %cst_308 = arith.constant dense<0.000000e+00> : vector<4x256xf32>
    %418 = tpu.matmul %416, %417, %cst_308 {dimension_numbers = #tpu.dot_dimension_numbers<[1], [0], [0], [1], [0, 0, 1, 1], [], []>} : vector<4x8xbf16>, vector<8x256xbf16>, vector<4x256xf32> -> vector<4x256xf32>
    %419 = arith.addf %409, %418 : vector<4x256xf32>
    %c0_309 = arith.constant 0 : index
    %c144_310 = arith.constant 144 : index
    %420 = vector.load %arg15[%c0_309, %c144_310] : memref<8x512xf32, #tpu.memory_space<vmem>>, vector<8x256xf32>
    %c7_311 = arith.constant 7 : index
    %c0_312 = arith.constant 0 : index
    %c0_313 = arith.constant 0 : index
    %421 = vector.load %arg12[%c7_311, %c0_312, %c0_313] : memref<9x4x8xbf16, #tpu.memory_space<vmem>>, vector<1x4x8xbf16>
    %422 = vector.shape_cast %421 : vector<1x4x8xbf16> to vector<4x8xbf16>
    %423 = arith.truncf %420 : vector<8x256xf32> to vector<8x256xbf16>
    %cst_314 = arith.constant dense<0.000000e+00> : vector<4x256xf32>
    %424 = tpu.matmul %422, %423, %cst_314 {dimension_numbers = #tpu.dot_dimension_numbers<[1], [0], [0], [1], [0, 0, 1, 1], [], []>} : vector<4x8xbf16>, vector<8x256xbf16>, vector<4x256xf32> -> vector<4x256xf32>
    %425 = arith.addf %419, %424 : vector<4x256xf32>
    %c0_315 = arith.constant 0 : index
    %c145_316 = arith.constant 145 : index
    %426 = vector.load %arg15[%c0_315, %c145_316] : memref<8x512xf32, #tpu.memory_space<vmem>>, vector<8x256xf32>
    %cst_317 = arith.constant 0.000000e+00 : f32
    %427 = vector.broadcast %cst_317 : f32 to vector<8x256xf32>
    %428 = vector.shape_cast %9 : vector<1x256xi1> to vector<1x256xi1>
    %429 = vector.broadcast %428 : vector<1x256xi1> to vector<8x256xi1>
    %430 = arith.select %429, %426, %427 : vector<8x256xi1>, vector<8x256xf32>
    %c8_318 = arith.constant 8 : index
    %c0_319 = arith.constant 0 : index
    %c0_320 = arith.constant 0 : index
    %431 = vector.load %arg12[%c8_318, %c0_319, %c0_320] : memref<9x4x8xbf16, #tpu.memory_space<vmem>>, vector<1x4x8xbf16>
    %432 = vector.shape_cast %431 : vector<1x4x8xbf16> to vector<4x8xbf16>
    %433 = arith.truncf %430 : vector<8x256xf32> to vector<8x256xbf16>
    %cst_321 = arith.constant dense<0.000000e+00> : vector<4x256xf32>
    %434 = tpu.matmul %432, %433, %cst_321 {dimension_numbers = #tpu.dot_dimension_numbers<[1], [0], [0], [1], [0, 0, 1, 1], [], []>} : vector<4x8xbf16>, vector<8x256xbf16>, vector<4x256xf32> -> vector<4x256xf32>
    %435 = arith.addf %425, %434 : vector<4x256xf32>
    %c0_322 = arith.constant 0 : index
    %c0_323 = arith.constant 0 : index
    %436 = vector.load %arg13[%c0_322, %c0_323] : memref<4x1xf32, #tpu.memory_space<vmem>>, vector<4x1xf32>
    %437 = vector.broadcast %436 : vector<4x1xf32> to vector<4x256xf32>
    %438 = arith.addf %435, %437 : vector<4x256xf32>
    %439 = arith.addf %268, %438 : vector<4x256xf32>
    %440 = vector.shape_cast %439 : vector<4x256xf32> to vector<1x4x256xf32>
    %c0_324 = arith.constant 0 : index
    %c0_325 = arith.constant 0 : index
    %c0_326 = arith.constant 0 : index
    %441 = vector.load %arg14[%c0_324, %c0_325, %c0_326] : memref<1x4x256xf32, #tpu.memory_space<vmem>>, vector<1x4x256xf32>
    tpu.vector_store %arg14[%c0_324, %c0_325, %c0_326], %440 {strides = array<i32>} : memref<1x4x256xf32, #tpu.memory_space<vmem>>, vector<1x4x256xf32>,
    return
  }
  func.func @transform_0(%arg0: i32) -> (i32, i32, i32) {
    %c0_i32 = arith.constant 0 : i32
    %c0_i32_0 = arith.constant 0 : i32
    %c0_i32_1 = arith.constant 0 : i32
    return %arg0, %c0_i32, %c0_i32_0 : i32, i32, i32
  }
  func.func @transform_1(%arg0: i32) -> (i32, i32, i32) {
    %c0_i32 = arith.constant 0 : i32
    %c0_i32_0 = arith.constant 0 : i32
    %c0_i32_1 = arith.constant 0 : i32
    return %arg0, %c0_i32, %c0_i32_0 : i32, i32, i32
  }
  func.func @transform_2(%arg0: i32) -> (i32, i32) {
    %c0_i32 = arith.constant 0 : i32
    %c0_i32_0 = arith.constant 0 : i32
    %c0_i32_1 = arith.constant 0 : i32
    return %c0_i32, %c0_i32_0 : i32, i32
  }
  func.func @transform_3(%arg0: i32) -> (i32, i32, i32) {
    %c0_i32 = arith.constant 0 : i32
    %c0_i32_0 = arith.constant 0 : i32
    %c0_i32_1 = arith.constant 0 : i32
    %c0_i32_2 = arith.constant 0 : i32
    return %c0_i32, %c0_i32_0, %c0_i32_1 : i32, i32, i32
  }
  func.func @transform_4(%arg0: i32) -> (i32, i32) {
    %c0_i32 = arith.constant 0 : i32
    %c0_i32_0 = arith.constant 0 : i32
    %c0_i32_1 = arith.constant 0 : i32
    return %c0_i32, %c0_i32_0 : i32, i32
  }
  func.func @transform_5(%arg0: i32) -> (i32, i32, i32) {
    %c0_i32 = arith.constant 0 : i32
    %c0_i32_0 = arith.constant 0 : i32
    %c0_i32_1 = arith.constant 0 : i32
    %c0_i32_2 = arith.constant 0 : i32
    return %c0_i32, %c0_i32_0, %c0_i32_1 : i32, i32, i32
  }
  func.func @transform_6(%arg0: i32) -> (i32, i32) {
    %c0_i32 = arith.constant 0 : i32
    %c0_i32_0 = arith.constant 0 : i32
    %c0_i32_1 = arith.constant 0 : i32
    return %c0_i32, %c0_i32_0 : i32, i32
  }
  func.func @transform_7(%arg0: i32) -> (i32, i32, i32) {
    %c0_i32 = arith.constant 0 : i32
    %c0_i32_0 = arith.constant 0 : i32
    %c0_i32_1 = arith.constant 0 : i32
    %c0_i32_2 = arith.constant 0 : i32
    return %c0_i32, %c0_i32_0, %c0_i32_1 : i32, i32, i32
  }
  func.func @transform_8(%arg0: i32) -> (i32, i32) {
    %c0_i32 = arith.constant 0 : i32
    %c0_i32_0 = arith.constant 0 : i32
    %c0_i32_1 = arith.constant 0 : i32
    return %c0_i32, %c0_i32_0 : i32, i32
  }
  func.func @transform_9(%arg0: i32) -> (i32, i32, i32) {
    %c0_i32 = arith.constant 0 : i32
    %c0_i32_0 = arith.constant 0 : i32
    %c0_i32_1 = arith.constant 0 : i32
    %c0_i32_2 = arith.constant 0 : i32
    return %c0_i32, %c0_i32_0, %c0_i32_1 : i32, i32, i32
  }
  func.func @transform_10(%arg0: i32) -> (i32, i32) {
    %c0_i32 = arith.constant 0 : i32
    %c0_i32_0 = arith.constant 0 : i32
    %c0_i32_1 = arith.constant 0 : i32
    return %c0_i32, %c0_i32_0 : i32, i32
  }
  func.func @transform_11(%arg0: i32) -> (i32, i32, i32) {
    %c0_i32 = arith.constant 0 : i32
    %c0_i32_0 = arith.constant 0 : i32
    %c0_i32_1 = arith.constant 0 : i32
    %c0_i32_2 = arith.constant 0 : i32
    return %c0_i32, %c0_i32_0, %c0_i32_1 : i32, i32, i32
  }
  func.func @transform_12(%arg0: i32) -> (i32, i32) {
    %c0_i32 = arith.constant 0 : i32
    %c0_i32_0 = arith.constant 0 : i32
    %c0_i32_1 = arith.constant 0 : i32
    return %c0_i32, %c0_i32_0 : i32, i32
  }
  func.func @transform_13(%arg0: i32) -> (i32, i32, i32) {
    %c0_i32 = arith.constant 0 : i32
    %c0_i32_0 = arith.constant 0 : i32
    %c0_i32_1 = arith.constant 0 : i32
    return %arg0, %c0_i32, %c0_i32_0 : i32, i32, i32
  }
}

</mosaic_0001>

<bundles_post_ra>
// kernel: tpu_custom_call.1
= control target key start
LH: loop header
LB: loop body
LE: loop exit
PB: predicated region body
PF: predicated region fallthrough
CT: control target
= control target key end

     0   :  { %s5019_s0 = inlined_call_operand.vmem [shape: f32[2,4,256], index: 0, kind: input, shape index: {}]   ;;  %s5020_s1 = inlined_call_operand.vmem [shape: f32[2,4,256], index: 1, kind: input, shape index: {}]   ;;  %s5021_s2 = inlined_call_operand.vmem [shape: f32[2,256], index: 2, kind: input, shape index: {}]   ;;  %s5022_s3 = inlined_call_operand.vmem [shape: bf16[9,4,4], index: 3, kind: input, shape index: {}]   ;;  %s5023_s4 = inlined_call_operand.vmem [shape: f32[4,1], index: 4, kind: input, shape index: {}]   ;;  %s5024_s5 = inlined_call_operand.vmem [shape: bf16[9,8,4], index: 5, kind: input, shape index: {}]   ;;  %s5025_s6 = inlined_call_operand.vmem [shape: f32[8,1], index: 6, kind: input, shape index: {}]   ;;  %s5026_s7 = inlined_call_operand.vmem [shape: bf16[9,4,8], index: 7, kind: input, shape index: {}]   ;;  %s5027_s8 = inlined_call_operand.vmem [shape: f32[4,1], index: 8, kind: input, shape index: {}]   ;;  %s5028_s9 = inlined_call_operand.vmem [shape: bf16[9,8,4], index: 9, kind: input, shape index: {}]   ;;  %s5029_s10 = inlined_call_operand.vmem [shape: f32[8,1], index: 10, kind: input, shape index: {}]   ;;  %s5030_s11 = inlined_call_operand.vmem [shape: bf16[9,4,8], index: 11, kind: input, shape index: {}]   ;;  %s5031_s12 = inlined_call_operand.vmem [shape: f32[4,1], index: 12, kind: input, shape index: {}]   ;;  %s5032_s13 = inlined_call_operand.hbm [shape: f32[2,4,256], index: 13, kind: output, shape index: {}]  }
   0x1   :  { %5050 = sst [smem:[#allocation6_spill]] %s5019_s0 }
   0x2   :  { %5051 = sst [smem:[#allocation7_spill]] %s5021_s2 }
   0x3   :  { %5052 = sst [smem:[#allocation8_spill]] %s5022_s3 }
   0x4   :  { %5053 = sst [smem:[#allocation9_spill]] %s5023_s4 }
   0x5   :  { %5054 = sst [smem:[#allocation10_spill]] %s5024_s5 }
   0x6   :  { %18 = vsyncpa [#allocation4], 0 }
   0x7   :  { %20 = vsyncpa [#allocation4 + $0x1], 0  ;;  %s4196_s25 = smov 0   ;;  %s4198_s26 = smov 0  }
   0x8   :  { %s4200_s27 = smov 0   ;;  %s4202_s28 = smov 0  }
   0x9 LB: > { %s4217_s29 = sadd.s32 4294967295, %s4112_s28   ;;  %s3701_s30 = sadd.s32 4294967294, %s4112_s28   ;;  %s4112_s28 = sphi %s4202_s28, %s5078_s28   ;;  %s4108_s27 = sphi %s4200_s27, %s5077_s27   ;;  %s4104_s26 = sphi %s4198_s26, %s5076_s26   ;;  %s4100_s25 = sphi %s4196_s25, %s5075_s25  }
   0xa   : > { %s4221_s14 = sadd.s32 1, %s4112_s28   ;;  %s316_s15 = sadd.s32 1, %s4108_s27 }
   0xb   : > { %s313_s16 = ssub.s32 %s4112_s28, %s4221_s14  ;;  %p326_p0 = scmp.ne.s32.totalorder %s4108_s27, %s4104_s26 }
   0xc   : > { %p314_p1 = scmp.eq.s32.totalorder %s313_s16, 0  ;;  %p327_p2 = scmp.eq.s32.totalorder %s4217_s29, 1 }
   0xd   : > { %p332_p3 = scmp.ne.s32.totalorder %s4104_s26, %s4100_s25  ;;  %p333_p4 = scmp.eq.s32.totalorder %s3701_s30, 1 }
   0xe   : > { %s4232_s17 = scalar_select %p314_p1, %s4108_s27, %s316_s15  }
   0xf   : > { %p4234_p5 = por %p327_p2, %p326_p0  ;;  %p4238_p6 = por %p333_p4, %p332_p3 }
  0x10   : > { %p3704_p7 = scmp.ge.s32.totalorder %s4112_s28, 1  ;;  %p400_p8 = scmp.lt.s32.totalorder %s4112_s28, 3 }
  0x12   : > { %p401_p9 = pnand %p3704_p7, %p400_p8 }
  0x13   : > { %p449_p10 = scmp.lt.s32.totalorder (!%p401_p9), %s4217_s29, 1  ;;  %s5057_s0 = sld [smem:[#allocation6_spill]] (!%p401_p9) }
  0x14   : > { %404 = sbr.rel (%p401_p9) target bundleno = 1867 (0x74b), region = 72  ;;  %s5044_s30 = smov (!%p401_p9), 16  }
  0x15   : > { %s5042_s15 = smov (!%p401_p9), 17   ;;  %s5034_s16 = smov (!%p401_p9), 15  }
  0x16   : > { %s5036_s22 = smov (!%p401_p9), 1   ;;  %s5038_s23 = smov (!%p401_p9), 127  }
  0x17   : > { %s5058_s4 = sld [smem:[#allocation9_spill]] (!%p401_p9) }
  0x18   : > { %s5059_s2 = sld [smem:[#allocation7_spill]] (!%p401_p9) }
  0x19   : > { %v4114_v0 = vmov 0.0   ;;  %s4248_s20 = scalar_select %p449_p10, %s4217_s29, 1  ;;  %v4115_v3 = vmov 0   ;;  %v475_v19 = vlaneseq  ;;  %vm526_vm1 = vcmask 130048  }
  0x1a   : > { %460 = vst [vmem:[#allocation2 + $0x8] sm:$0xff] %v4114_v0  ;;  %461 = vst [vmem:[#allocation2] sm:$0xff] %v4114_v0  ;;  %572 = vmatprep.mubr.bf16.mxu0 %v4115_v3  ;;  %622 = vmatprep.mubr.bf16.mxu1 %v4115_v3  ;;  %vm533_vm2 = vcmask 1041408   ;;  %s5060_s3 = sld [smem:[#allocation8_spill]]  ;;  %vm529_vm3 = vcmask 31744   ;;  %vm502_vm4 = vcmask 138240  }
  0x1b   : > { %s5033_s21 = sshll.u32 %s4248_s20, 3  ;;  %3927 = vset.pattern.permute.xlu0 %v4115_v3  ;;  %3988 = vset.pattern.permute.xlu1 %v4115_v3  ;;  %v476_v21 = vshrl.u32 %v475_v19, 7  ;;  %vm655_vm7 = vcmask 121856   ;;  %vm724_vm10 = vcmask 7168   ;;  %vm853_vm11 = vcmask 1039360   ;;  %s5070_s5 = sld [smem:[#allocation10_spill]] }
  0x1c   : > { %s453_s24 = scalar_lea.vmem %s5057_s0, %s5033_s21  ;;  %s5048_s21 = smov 111   ;;  %vm922_vm12 = vcmask 924672   ;;  %vm1060_vm13 = vcmask 908288   ;;  %vm999_vm14 = vcmask 916480   ;;  %vm1793_vm15 = vcmask 1043456  }
  0x1d   : > { %v464_v1 = vld [vmem:[%s453_s24] sm:$0xff]  ;;  %s5040_s24 = smov 113   ;;  %v477_v23 = vsub.s32 0, %v476_v21  ;;  %v481_v24 = vsub.s32 2, %v476_v21  ;;  %v633_v26 = vsub.s32 1, %v476_v21  ;;  %v637_v27 = vsub.s32 3, %v476_v21 }
  0x1e   : > { %469 = vst [vmem:[#allocation2 + $0x10] sm:$0xf] %v464_v1  ;;  %v467_v2 = vcombine.high %v464_v1, %v464_v1  ;;  %v1123_v18 = vld [vmem:[%s5058_s4] sm:$0xf]  ;;  %s5072_s0 = smov 111  }
  0x1f   : > { %v462_v20 = vld [vmem:[%s5059_s2] sm:$0xf]  ;;  %s5073_s2 = smov 112  }
  0x20   : > { %470 = vst [vmem:[#allocation2 + $0x18] sm:$0xf] %v467_v2  ;;  %vm463_vm0 = vcmp.gt.f32.partialorder %v462_v20, 0.5  ;;  %v3710_v40 = vld [vmem:[%s5060_s3 + $0x2] sm:$0x3] }
  0x21   : > { %v471_v4 = vld [vmem:[#allocation2 + $0x8] sm:$0xf]  ;;  %v843_v13 = vld [vmem:[#allocation2] sm:$0xf]  ;;  %v474_v25 = vsel %vm463_vm0, 1, %v4115_v3  ;;  %vm1789_vm0 = vcmask 64512  }
  0x22   : > { %v514_v5 = vpack.c.bf16 %v471_v4, %v471_v4  ;;  %v989_v17 = vpack.c.bf16 %v843_v13, %v843_v13  ;;  %v482_v28 = vrot.slane %v474_v25, %v481_v24  ;;  %v478_v29 = vrot.slane %v474_v25, %v477_v23  ;;  %v509_v1 = vld [vmem:[%s5060_s3] sm:$0x3] }
  0x23   : > { %v638_v33 = vrot.slane %v474_v25, %v637_v27  ;;  %v634_v34 = vrot.slane %v474_v25, %v633_v26 }
  0x24   : > { %520 = vrot.lane.b32.xlu0 %v514_v5, %s5044_s30  ;;  %v490_v36 = vrot.slane %v482_v28, %v477_v23  ;;  %v4293_v37 = vrot.slane %v478_v29, %v477_v23 }
  0x25   : > { %v472_v6 = vld [vmem:[#allocation2 + $0x10] sm:$0xf]  ;;  %v646_v42 = vrot.slane %v638_v33, %v633_v26  ;;  %v4300_v43 = vrot.slane %v634_v34, %v633_v26 }
  0x26   : > { %v4261_v7 = vpack.c.bf16 %v472_v6, %v472_v6  ;;  %v3897_v10 = vpack.i.bf16 %v472_v6, %v471_v4  ;;  %v841_v11 = vld [vmem:[#allocation2 + $0x10] sm:$0xf]  ;;  %vm4302_vm5 = vcmp.eq.s32.totalorder %v490_v36, 1  ;;  %vm491_vm6 = vcmp.eq.s32.totalorder %v4293_v37, 1 }
  0x27   : > { %v473_v8 = vld [vmem:[#allocation2 + $0x18] sm:$0xf]  ;;  %v987_v16 = vpack.c.bf16 %v841_v11, %v841_v11  ;;  %vm4311_vm8 = vcmp.eq.s32.totalorder %v646_v42, 1  ;;  %vm647_vm9 = vcmp.eq.s32.totalorder %v4300_v43, 1 }
  0x28   : > { %522 = vrot.lane.b32.xlu0 %v4261_v7, %s5044_s30  ;;  %v4265_v9 = vpack.c.bf16 %v473_v8, %v473_v8  ;;  %v842_v12 = vld [vmem:[#allocation2 + $0x18] sm:$0xf] }
  0x29   : > { %v3912_v14 = vpack.i.bf16 %v842_v12, %v841_v11  ;;  %v988_v15 = vpack.c.bf16 %v842_v12, %v842_v12 }
  0x2a   : > { %524 = vrot.lane.b32.xlu1 %v4265_v9, %s5044_s30 }
  0x2c   : > { %500 = vrot.lane.b32.xlu0 %v473_v8, %s5042_s15 }
  0x2e   : > { %3898 = vrot.lane.b32.xlu1 %v3897_v10, %s5042_s15  ;;  %s5067_s15 = smov 1  }
  0x30   : > { %653 = vrot.lane.b32.xlu0 %v473_v8, %s5034_s16 }
  0x32   : > { %3903 = vrot.lane.b32.xlu1 %v3897_v10, %s5034_s16  ;;  %s5046_s16 = smov 112  }
  0x34   : > { %722 = vrot.lane.b32.xlu0 %v473_v8, %s5036_s22 }
  0x36   : > { %3908 = vrot.lane.b32.xlu1 %v3897_v10, %s5036_s22  ;;  %s5068_s22 = smov 127  }
  0x38   : > { %851 = vrot.lane.b32.xlu0 %v843_v13, %s5038_s23 }
  0x3a   : > { %3913 = vrot.lane.b32.xlu1 %v3912_v14, %s5038_s23  ;;  %s5065_s23 = smov 17  }
  0x3c   : > { %920 = vrot.lane.b32.xlu0 %v843_v13, %s5040_s24 }
  0x3e   : > { %3918 = vrot.lane.b32.xlu1 %v3912_v14, %s5040_s24  ;;  %s5066_s24 = smov 15  }
  0x40   : > { %1058 = vrot.lane.b32.xlu0 %v843_v13, %s5048_s21 }
  0x42   : > { %3923 = vrot.lane.b32.xlu1 %v3912_v14, %s5048_s21 }
  0x44   : > { %995 = vrot.lane.b32.xlu0 %v988_v15, %s5046_s16 }
  0x46   : > { %993 = vrot.lane.b32.xlu1 %v987_v16, %s5046_s16  ;;  %v3715_v16 = vld [vmem:[%s5060_s3 + $0x4] sm:$0x3] }
  0x48   : > { %1126 = vperm.xlu0 %3927, %v1123_v18   ;;  %v793_v18 = vsel %vm533_vm2, %v4261_v7, 0 }
  0x4a   : > { %997 = vrot.lane.b32.xlu1 %v989_v17, %s5046_s16 }
  0x96   : > { %v521_v22 = vpop.permute.xlu0 %520 }
  0x9a   : > { %v523_v30 = vpop.permute.xlu0 %522 }
  0x9b   : > { %v527_v31 = vsel %vm526_vm1, %v521_v22, %v523_v30 }
  0x9c   : > { %v525_v32 = vpop.permute.xlu1 %524  ;;  %v535_v38 = vsel %vm533_vm2, %v527_v31, 0 }
  0x9d   : > { %v528_v35 = vsel %vm526_vm1, %v523_v30, %v525_v32 }
  0x9e   : > { %3711 = vmatprep.subr.msk.bf16.mxu0 %vm533_vm2, %v528_v35  ;;  %v501_v39 = vpop.permute.xlu0 %500 }
  0x9f   : > { %555 = vmatpush1.bf16.msra.mxu0 %v535_v38 }
  0xa0   : > { %v3899_v41 = vpop.permute.xlu1 %3898 }
  0xa1   : > { %v3901_v44 = vunpack.i.h.bf16 %v3899_v41  ;;  %v3900_v45 = vunpack.i.l.bf16 %v3899_v41 }
  0xa2   : > { %3712 = vmatmul.mubr.msk.bf16.vlgmr.msra.gmra.mxu0 %vm529_vm3, %v3710_v40  ;;  %v654_v47 = vpop.permute.xlu0 %653  ;;  %v3721_v40 = vld [vmem:[%s5060_s3 + $0x8] sm:$0x3] }
  0xa3   : > { %v504_v48 = vsel %vm502_vm4, %v3901_v44, %v501_v39  ;;  %v503_v49 = vsel %vm502_vm4, %v3900_v45, %v3901_v44  ;;  %707 = vmatprep.mubr.bf16.mxu0 %v4115_v3 }
  0xa4   : > { %v3904_v50 = vpop.permute.xlu1 %3903  ;;  %v508_v52 = vsel %vm4302_vm5, %v504_v48, 0.0  ;;  %v507_v53 = vsel %vm491_vm6, %v503_v49, 0.0 }
  0xa5   : > { %v3906_v54 = vunpack.i.h.bf16 %v3904_v50  ;;  %v3905_v55 = vunpack.i.l.bf16 %v3904_v50  ;;  %v511_v56 = vpack.c.bf16 %v508_v52, %v508_v52  ;;  %v510_v57 = vpack.c.bf16 %v507_v53, %v507_v53 }
  0xa6   : > { %v723_v58 = vpop.permute.xlu0 %722 }
  0xa7   : > { %v656_v59 = vsel %vm655_vm7, %v3905_v55, %v3906_v54  ;;  %v657_v60 = vsel %vm655_vm7, %v3906_v54, %v654_v47  ;;  %3713 = vmatprep.subr.msk.bf16.mxu1 %vm533_vm2, %v511_v56  ;;  %v585_v61 = vsel %vm533_vm2, %v510_v57, 0  ;;  %v3724_v55 = vld [vmem:[%s5060_s3 + $0xa] sm:$0x3] }
  0xa8   : > { %v661_v62 = vsel %vm4311_vm8, %v657_v60, 0.0  ;;  %v3909_v63 = vpop.permute.xlu1 %3908  ;;  %605 = vmatpush1.bf16.msra.mxu1 %v585_v61  ;;  %v660_v2 = vsel %vm647_vm9, %v656_v59, 0.0 }
  0xa9   : > { %v665_v4 = vpack.c.bf16 %v661_v62, %v661_v62  ;;  %v3911_v5 = vunpack.i.h.bf16 %v3909_v63  ;;  %v3910_v6 = vunpack.i.l.bf16 %v3909_v63  ;;  %v664_v8 = vpack.c.bf16 %v660_v2, %v660_v2  ;;  %v3727_v62 = vld [vmem:[%s5060_s3 + $0xc] sm:$0x3]  ;;  %v3730_v2 = vld [vmem:[%s5060_s3 + $0xe] sm:$0x3] }
  0xaa   : > { %v852_v10 = vpop.permute.xlu0 %851 }
  0xab   : > { %v725_v11 = vsel %vm724_vm10, %v3910_v6, %v3911_v5  ;;  %v726_v12 = vsel %vm724_vm10, %v3911_v5, %v723_v58  ;;  %3714 = vmatmul.mubr.msk.bf16.vlgmr.msra.gmra.mxu1 %vm529_vm3, %v509_v1  ;;  %3716 = vmatprep.subr.msk.bf16.mxu0 %vm533_vm2, %v665_v4  ;;  %v670_v13 = vsel %vm533_vm2, %v664_v8, 0  ;;  %v3733_v4 = vld [vmem:[%s5060_s3 + $0x10] sm:$0x3]  ;;  %v4410_v5 = vld [vmem:[#allocation2 + $0x8] sm:$0xf] }
  0xac   : > { %v730_v14 = vsel %vm4302_vm5, %v726_v12, 0.0  ;;  %v3914_v15 = vpop.permute.xlu1 %3913  ;;  %690 = vmatpush1.bf16.msra.mxu0 %v670_v13  ;;  %v729_v17 = vsel %vm491_vm6, %v725_v11, 0.0  ;;  %776 = vmatprep.mubr.bf16.mxu1 %v4115_v3  ;;  %v1158_v6 = vpack.c.bf16 %v4410_v5, %v4410_v5 }
  0xad   : > { %v734_v19 = vpack.c.bf16 %v730_v14, %v730_v14  ;;  %v3916_v20 = vunpack.i.h.bf16 %v3914_v15  ;;  %v3915_v21 = vunpack.i.l.bf16 %v3914_v15  ;;  %v733_v22 = vpack.c.bf16 %v729_v17, %v729_v17  ;;  %3722 = vmatprep.subr.msk.bf16.mxu0 %vm533_vm2, %v4265_v9  ;;  %v3718_v9 = vld [vmem:[%s5060_s3 + $0x6] sm:$0x3]  ;;  %s5071_s3 = smov 16  }
  0xae   : > { %v921_v23 = vpop.permute.xlu0 %920  ;;  %1164 = vrot.lane.b32.xlu1 %v1158_v6, %s5044_s30 }
  0xaf   : > { %v854_v24 = vsel %vm853_vm11, %v3915_v21, %v3916_v20  ;;  %v855_v25 = vsel %vm853_vm11, %v3916_v20, %v852_v10  ;;  %3717 = vmatmul.mubr.msk.bf16.vlgmr.msra.gmra.mxu0 %vm529_vm3, %v3715_v16  ;;  %3719 = vmatprep.subr.msk.bf16.mxu1 %vm533_vm2, %v734_v19  ;;  %v739_v26 = vsel %vm533_vm2, %v733_v22, 0 }
  0xb0   : > { %v859_v7 = vsel %vm4311_vm8, %v855_v25, 0.0  ;;  %v3919_v27 = vpop.permute.xlu1 %3918  ;;  %759 = vmatpush1.bf16.msra.mxu1 %v739_v26  ;;  %813 = vmatpush1.bf16.msra.mxu0 %v793_v18  ;;  %v858_v28 = vsel %vm647_vm9, %v854_v24, 0.0 }
  0xb1   : > { %v863_v29 = vpack.c.bf16 %v859_v7, %v859_v7  ;;  %v3921_v30 = vunpack.i.h.bf16 %v3919_v27  ;;  %v3920_v31 = vunpack.i.l.bf16 %v3919_v27  ;;  %830 = vmatprep.mubr.bf16.mxu0 %v4115_v3  ;;  %v862_v32 = vpack.c.bf16 %v858_v28, %v858_v28 }
  0xb2   : > { %v1059_v33 = vpop.permute.xlu0 %1058 }
  0xb3   : > { %v923_v34 = vsel %vm922_vm12, %v3920_v31, %v3921_v30  ;;  %v924_v35 = vsel %vm922_vm12, %v3921_v30, %v921_v23  ;;  %3720 = vmatmul.mubr.msk.bf16.vlgmr.msra.gmra.mxu1 %vm529_vm3, %v3718_v9  ;;  %3725 = vmatprep.subr.msk.bf16.mxu1 %vm533_vm2, %v863_v29  ;;  %v868_v36 = vsel %vm533_vm2, %v862_v32, 0 }
  0xb4   : > { %v928_v38 = vsel %vm4302_vm5, %v924_v35, 0.0  ;;  %v3924_v39 = vpop.permute.xlu1 %3923  ;;  %888 = vmatpush1.bf16.msra.mxu1 %v868_v36  ;;  %905 = vmatprep.mubr.bf16.mxu1 %v4115_v3  ;;  %v927_v41 = vsel %vm491_vm6, %v923_v34, 0.0 }
  0xb5   : > { %v932_v42 = vpack.c.bf16 %v928_v38, %v928_v38  ;;  %v3926_v44 = vunpack.i.h.bf16 %v3924_v39  ;;  %v3925_v45 = vunpack.i.l.bf16 %v3924_v39  ;;  %v931_v47 = vpack.c.bf16 %v927_v41, %v927_v41 }
  0xb6   : > { %v996_v48 = vpop.permute.xlu0 %995 }
  0xb7   : > { %v1061_v49 = vsel %vm1060_vm13, %v3925_v45, %v3926_v44  ;;  %v1062_v50 = vsel %vm1060_vm13, %v3926_v44, %v1059_v33  ;;  %3723 = vmatmul.mubr.msk.bf16.vlgmr.msra.gmra.mxu0 %vm529_vm3, %v3721_v40  ;;  %3728 = vmatprep.subr.msk.bf16.mxu0 %vm533_vm2, %v932_v42  ;;  %v937_v52 = vsel %vm533_vm2, %v931_v47, 0 }
  0xb8   : > { %v1066_v53 = vsel %vm4311_vm8, %v1062_v50, 0.0  ;;  %v994_v54 = vpop.permute.xlu1 %993  ;;  %957 = vmatpush1.bf16.msra.mxu0 %v937_v52  ;;  %974 = vmatprep.mubr.bf16.mxu0 %v4115_v3  ;;  %v1065_v56 = vsel %vm647_vm9, %v1061_v49, 0.0 }
  0xb9   : > { %v1070_v57 = vpack.c.bf16 %v1066_v53, %v1066_v53  ;;  %v1000_v58 = vsel %vm999_vm14, %v994_v54, %v996_v48  ;;  %v1069_v59 = vpack.c.bf16 %v1065_v56, %v1065_v56 }
  0xba   : > { %v1006_v60 = vsel %vm533_vm2, %v1000_v58, 0 }
  0xbb   : > { %3726 = vmatmul.mubr.msk.bf16.vlgmr.msra.gmra.mxu1 %vm529_vm3, %v3724_v55  ;;  %3734 = vmatprep.subr.msk.bf16.mxu0 %vm533_vm2, %v1070_v57  ;;  %v1075_v1 = vsel %vm533_vm2, %v1069_v59, 0 }
  0xbc   : > { %v998_v61 = vpop.permute.xlu1 %997  ;;  %1043 = vmatprep.mubr.bf16.mxu1 %v4115_v3 }
  0xbd   : > { %v1001_v63 = vsel %vm999_vm14, %v996_v48, %v998_v61 }
  0xbe   : > { %3731 = vmatprep.subr.msk.bf16.mxu1 %vm533_vm2, %v1001_v63 }
  0xbf   : > { %3729 = vmatmul.mubr.msk.bf16.vlgmr.msra.gmra.mxu0 %vm529_vm3, %v3727_v62  ;;  %1026 = vmatpush1.bf16.msra.mxu1 %v1006_v60 }
  0xc0   : > { %1095 = vmatpush1.bf16.msra.mxu0 %v1075_v1  ;;  %1112 = vmatprep.mubr.bf16.mxu0 %v4115_v3 }
  0xc3   : > { %3732 = vmatmul.mubr.msk.bf16.vlgmr.msra.gmra.mxu1 %vm529_vm3, %v3730_v2  ;;  %v1127_v54 = vpop.permute.xlu0 %1126 }
  0xc4   : > { %1213 = vmatprep.mubr.bf16.mxu1 %v4115_v3 }
  0xc7   : > { %3735 = vmatmul.mubr.msk.bf16.vlgmr.msra.gmra.mxu0 %vm529_vm3, %v3733_v4 }
  0xc8   : > { %1263 = vmatprep.mubr.bf16.mxu0 %v4115_v3 }
 0x162   : > { %v574_v8 = vpop.f32.mrf.mxu0 }
 0x164   : > { %v576_v10 = vpop.f32.mrf.mxu0 }
 0x166   : > { %v578_v11 = vpop.f32.mrf.mxu0 }
 0x168   : > { %v579_v12 = vpop.f32.mrf.mxu0 }
 0x16b   : > { %v624_v13 = vpop.f32.mrf.mxu1 }
 0x16c   : > { %v625_v7 = vadd.f32 %v624_v13, %v574_v8 }
 0x16d   : > { %v626_v14 = vpop.f32.mrf.mxu1 }
 0x16e   : > { %v627_v28 = vadd.f32 %v626_v14, %v576_v10 }
 0x16f   : > { %v628_v15 = vpop.f32.mrf.mxu1  ;;  %v709_v16 = vpop.f32.mrf.mxu0 }
 0x170   : > { %v716_v29 = vadd.f32 %v709_v16, %v625_v7 }
 0x171   : > { %v629_v17 = vpop.f32.mrf.mxu1  ;;  %v711_v18 = vpop.f32.mrf.mxu0 }
 0x172   : > { %v717_v32 = vadd.f32 %v711_v18, %v627_v28  ;;  %v1464_v17 = vld [vmem:[#allocation2] sm:$0xf]  ;;  %v3736_v28 = vld [vmem:[%s5070_s5 + $0x4] sm:$0xf] }
 0x173   : > { %v713_v19 = vpop.f32.mrf.mxu0  ;;  %v778_v20 = vpop.f32.mrf.mxu1 }
 0x174   : > { %v785_v33 = vadd.f32 %v778_v20, %v716_v29  ;;  %v1608_v19 = vpack.c.bf16 %v1464_v17, %v1464_v17  ;;  %v1740_v20 = vld [vmem:[%s5025_s6] sm:$0xff] }
 0x175   : > { %v714_v21 = vpop.f32.mrf.mxu0  ;;  %v780_v22 = vpop.f32.mrf.mxu1 }
 0x176   : > { %v786_v36 = vadd.f32 %v780_v22, %v717_v32  ;;  %v1165_v21 = vpop.permute.xlu1 %1164 }
 0x177   : > { %v782_v23 = vpop.f32.mrf.mxu1  ;;  %v832_v24 = vpop.f32.mrf.mxu0 }
 0x178   : > { %v839_v38 = vadd.f32 %v832_v24, %v785_v33 }
 0x179   : > { %v783_v25 = vpop.f32.mrf.mxu1  ;;  %v834_v26 = vpop.f32.mrf.mxu0 }
 0x17a   : > { %v840_v41 = vadd.f32 %v834_v26, %v786_v36 }
 0x17b   : > { %v836_v27 = vpop.f32.mrf.mxu0  ;;  %v907_v9 = vpop.f32.mrf.mxu1 }
 0x17c   : > { %v914_v42 = vadd.f32 %v907_v9, %v839_v38 }
 0x17d   : > { %v837_v30 = vpop.f32.mrf.mxu0  ;;  %v909_v31 = vpop.f32.mrf.mxu1 }
 0x17e   : > { %v915_v47 = vadd.f32 %v909_v31, %v840_v41 }
 0x17f   : > { %v911_v34 = vpop.f32.mrf.mxu1  ;;  %v976_v35 = vpop.f32.mrf.mxu0 }
 0x180   : > { %v983_v48 = vadd.f32 %v976_v35, %v914_v42 }
 0x181   : > { %v912_v39 = vpop.f32.mrf.mxu1  ;;  %v978_v40 = vpop.f32.mrf.mxu0 }
 0x182   : > { %v984_v52 = vadd.f32 %v978_v40, %v915_v47 }
 0x183   : > { %v980_v44 = vpop.f32.mrf.mxu0  ;;  %v1045_v45 = vpop.f32.mrf.mxu1 }
 0x184   : > { %v1052_v53 = vadd.f32 %v1045_v45, %v983_v48  ;;  %v1153_v48 = vld [vmem:[%s5070_s5] sm:$0xf] }
 0x185   : > { %v981_v49 = vpop.f32.mrf.mxu0  ;;  %v1047_v50 = vpop.f32.mrf.mxu1 }
 0x186   : > { %v1053_v57 = vadd.f32 %v1047_v50, %v984_v52 }
 0x187   : > { %v1049_v55 = vpop.f32.mrf.mxu1  ;;  %v1114_v56 = vpop.f32.mrf.mxu0 }
 0x188   : > { %v1121_v58 = vadd.f32 %v1114_v56, %v1052_v53 }
 0x189   : > { %v1050_v59 = vpop.f32.mrf.mxu1  ;;  %v1116_v60 = vpop.f32.mrf.mxu0 }
 0x18a   : > { %v4415_v61 = vadd.f32 %v1127_v54, %v1121_v58  ;;  %v1122_v62 = vadd.f32 %v1116_v60, %v1053_v57 }
 0x18b   : > { %v1118_v63 = vpop.f32.mrf.mxu0 }
 0x18c   : > { %v1131_v1 = vmax.f32 %v4415_v61, 0.0  ;;  %v4418_v2 = vadd.f32 %v1127_v54, %v1122_v62  ;;  %v3741_v62 = vld [vmem:[%s5070_s5 + $0x8] sm:$0xf] }
 0x18d   : > { %v1119_v4 = vpop.f32.mrf.mxu0 }
 0x18e   : > { %1133 = vst [vmem:[#allocation2 + $0x10] sm:$0xf] %v1131_v1  ;;  %v1132_v6 = vmax.f32 %v4418_v2, 0.0 }
 0x190   : > { %1134 = vst [vmem:[#allocation2 + $0x18] sm:$0xf] %v1132_v6 }
 0x195   : > { %v1136_v8 = vld [vmem:[#allocation2 + $0x10] sm:$0xf] }
 0x196   : > { %v4421_v10 = vpack.c.bf16 %v1136_v8, %v1136_v8  ;;  %v3928_v13 = vpack.i.bf16 %v1136_v8, %v4410_v5  ;;  %v1462_v15 = vld [vmem:[#allocation2 + $0x10] sm:$0xf] }
 0x197   : > { %v1137_v11 = vld [vmem:[#allocation2 + $0x18] sm:$0xf]  ;;  %v1606_v5 = vpack.c.bf16 %v1462_v15, %v1462_v15 }
 0x198   : > { %1166 = vrot.lane.b32.xlu1 %v4421_v10, %s5044_s30  ;;  %v4425_v12 = vpack.c.bf16 %v1137_v11, %v1137_v11  ;;  %v1463_v14 = vld [vmem:[#allocation2 + $0x18] sm:$0xf] }
 0x199   : > { %v3943_v16 = vpack.i.bf16 %v1463_v14, %v1462_v15  ;;  %v1607_v18 = vpack.c.bf16 %v1463_v14, %v1463_v14 }
 0x19a   : > { %1168 = vrot.lane.b32.xlu0 %v4425_v12, %s5044_s30  ;;  %s5069_s30 = smov 113  }
 0x19c   : > { %3929 = vrot.lane.b32.xlu1 %v3928_v13, %s5065_s23 }
 0x19e   : > { %1145 = vrot.lane.b32.xlu0 %v1137_v11, %s5065_s23 }
 0x1a0   : > { %3934 = vrot.lane.b32.xlu1 %v3928_v13, %s5066_s24 }
 0x1a2   : > { %1276 = vrot.lane.b32.xlu0 %v1137_v11, %s5066_s24 }
 0x1a4   : > { %3939 = vrot.lane.b32.xlu1 %v3928_v13, %s5067_s15 }
 0x1a6   : > { %1344 = vrot.lane.b32.xlu0 %v1137_v11, %s5067_s15 }
 0x1a8   : > { %3944 = vrot.lane.b32.xlu1 %v3943_v16, %s5068_s22 }
 0x1aa   : > { %1472 = vrot.lane.b32.xlu0 %v1464_v17, %s5068_s22 }
 0x1ac   : > { %3949 = vrot.lane.b32.xlu1 %v3943_v16, %s5069_s30 }
 0x1ae   : > { %1540 = vrot.lane.b32.xlu0 %v1464_v17, %s5069_s30 }
 0x1b0   : > { %3954 = vrot.lane.b32.xlu1 %v3943_v16, %s5048_s21  ;;  %v1414_v16 = vsel %vm533_vm2, %v4421_v10, 0 }
 0x1b2   : > { %1676 = vrot.lane.b32.xlu0 %v1464_v17, %s5048_s21  ;;  %s5074_s21 = sshll.u32 %s4248_s20, 3 }
 0x1b4   : > { %1612 = vrot.lane.b32.xlu1 %v1606_v5, %s5046_s16 }
 0x1b6   : > { %1614 = vrot.lane.b32.xlu0 %v1607_v18, %s5046_s16 }
 0x1b8   : > { %1616 = vrot.lane.b32.xlu1 %v1608_v19, %s5046_s16 }
 0x1ba   : > { %1743 = vperm.xlu0 %3927, %v1740_v20  }
 0x20a   : > { %v1167_v22 = vpop.permute.xlu1 %1166 }
 0x20b   : > { %v1170_v23 = vsel %vm526_vm1, %v1165_v21, %v1167_v22 }
 0x20c   : > { %v1169_v24 = vpop.permute.xlu0 %1168  ;;  %v1176_v26 = vsel %vm533_vm2, %v1170_v23, 0 }
 0x20d   : > { %v1171_v25 = vsel %vm526_vm1, %v1167_v22, %v1169_v24 }
 0x20e   : > { %3737 = vmatprep.subr.msk.bf16.mxu1 %vm533_vm2, %v1171_v25  ;;  %v3930_v7 = vpop.permute.xlu1 %3929 }
 0x20f   : > { %v3932_v27 = vunpack.i.h.bf16 %v3930_v7  ;;  %v3931_v9 = vunpack.i.l.bf16 %v3930_v7  ;;  %1196 = vmatpush1.bf16.msra.mxu1 %v1176_v26 }
 0x210   : > { %v1146_v29 = vpop.permute.xlu0 %1145 }
 0x211   : > { %v1147_v30 = vsel %vm502_vm4, %v3931_v9, %v3932_v27  ;;  %v1148_v31 = vsel %vm502_vm4, %v3932_v27, %v1146_v29  ;;  %v3747_v27 = vld [vmem:[%s5070_s5 + $0x10] sm:$0xf] }
 0x212   : > { %v1152_v32 = vsel %vm4302_vm5, %v1148_v31, 0.0  ;;  %3738 = vmatmul.mubr.msk.bf16.vlgmr.msra.gmra.mxu1 %vm529_vm3, %v3736_v28  ;;  %v3935_v33 = vpop.permute.xlu1 %3934  ;;  %v1151_v34 = vsel %vm491_vm6, %v1147_v30, 0.0 }
 0x213   : > { %v1155_v35 = vpack.c.bf16 %v1152_v32, %v1152_v32  ;;  %v3937_v36 = vunpack.i.h.bf16 %v3935_v33  ;;  %v3936_v38 = vunpack.i.l.bf16 %v3935_v33  ;;  %v1154_v39 = vpack.c.bf16 %v1151_v34, %v1151_v34  ;;  %1329 = vmatprep.mubr.bf16.mxu1 %v4115_v3 }
 0x214   : > { %v1277_v40 = vpop.permute.xlu0 %1276 }
 0x215   : > { %v1278_v41 = vsel %vm655_vm7, %v3936_v38, %v3937_v36  ;;  %v1279_v42 = vsel %vm655_vm7, %v3937_v36, %v1277_v40  ;;  %3739 = vmatprep.subr.msk.bf16.mxu0 %vm533_vm2, %v1155_v35  ;;  %v1226_v44 = vsel %vm533_vm2, %v1154_v39, 0  ;;  %v3750_v39 = vld [vmem:[%s5070_s5 + $0x14] sm:$0xf] }
 0x216   : > { %v1283_v45 = vsel %vm4311_vm8, %v1279_v42, 0.0  ;;  %v3940_v47 = vpop.permute.xlu1 %3939  ;;  %1246 = vmatpush1.bf16.msra.mxu0 %v1226_v44  ;;  %v1282_v49 = vsel %vm647_vm9, %v1278_v41, 0.0 }
 0x217   : > { %v1287_v50 = vpack.c.bf16 %v1283_v45, %v1283_v45  ;;  %v3942_v52 = vunpack.i.h.bf16 %v3940_v47  ;;  %v3941_v53 = vunpack.i.l.bf16 %v3940_v47  ;;  %v1286_v54 = vpack.c.bf16 %v1282_v49, %v1282_v49 }
 0x218   : > { %v1345_v55 = vpop.permute.xlu0 %1344 }
 0x219   : > { %v1346_v56 = vsel %vm724_vm10, %v3941_v53, %v3942_v52  ;;  %v1347_v57 = vsel %vm724_vm10, %v3942_v52, %v1345_v55  ;;  %3740 = vmatmul.mubr.msk.bf16.vlgmr.msra.gmra.mxu0 %vm529_vm3, %v1153_v48  ;;  %3742 = vmatprep.subr.msk.bf16.mxu1 %vm533_vm2, %v1287_v50  ;;  %v1292_v58 = vsel %vm533_vm2, %v1286_v54, 0  ;;  %v3753_v48 = vld [vmem:[%s5070_s5 + $0x18] sm:$0xf]  ;;  %v3756_v53 = vld [vmem:[%s5070_s5 + $0x1c] sm:$0xf]  ;;  %v4124_v55 = vmov 0.0|0.0  }
 0x21a   : > { %v1351_v59 = vsel %vm4302_vm5, %v1347_v57, 0.0  ;;  %v3945_v60 = vpop.permute.xlu1 %3944  ;;  %1312 = vmatpush1.bf16.msra.mxu1 %v1292_v58  ;;  %v1350_v63 = vsel %vm491_vm6, %v1346_v56, 0.0  ;;  %1397 = vmatprep.mubr.bf16.mxu0 %v4115_v3  ;;  %v3759_v54 = vld [vmem:[%s5070_s5 + $0x20] sm:$0xf] }
 0x21b   : > { %v1355_v1 = vpack.c.bf16 %v1351_v59, %v1351_v59  ;;  %v3947_v4 = vunpack.i.h.bf16 %v3945_v60  ;;  %v3946_v6 = vunpack.i.l.bf16 %v3945_v60  ;;  %3748 = vmatprep.subr.msk.bf16.mxu1 %vm533_vm2, %v4425_v12  ;;  %v1354_v8 = vpack.c.bf16 %v1350_v63, %v1350_v63  ;;  %v3744_v12 = vld [vmem:[%s5070_s5 + $0xc] sm:$0xf]  ;;  %1781 = vrot.lane.b32.xlu1 %v4124_v55, %s5071_s3  ;;  %s458_s5 = scalar_lea.vmem %s5020_s1, %s5074_s21  ;;  %s3847_s21 = sshll.u32 %s4217_s29, 7 }
 0x21c   : > { %v1473_v11 = vpop.permute.xlu0 %1472  ;;  %s4125_s29 = smov [#allocation3]  }
 0x21d   : > { %v1474_v13 = vsel %vm853_vm11, %v3946_v6, %v3947_v4  ;;  %v1475_v14 = vsel %vm853_vm11, %v3947_v4, %v1473_v11  ;;  %3743 = vmatmul.mubr.msk.bf16.vlgmr.msra.gmra.mxu1 %vm529_vm3, %v3741_v62  ;;  %3745 = vmatprep.subr.msk.bf16.mxu0 %vm533_vm2, %v1355_v1  ;;  %v1360_v15 = vsel %vm533_vm2, %v1354_v8, 0 }
 0x21e   : > { %v1479_v17 = vsel %vm4311_vm8, %v1475_v14, 0.0  ;;  %v3950_v5 = vpop.permute.xlu1 %3949  ;;  %1380 = vmatpush1.bf16.msra.mxu0 %v1360_v15  ;;  %1434 = vmatpush1.bf16.msra.mxu1 %v1414_v16  ;;  %v1478_v18 = vsel %vm647_vm9, %v1474_v13, 0.0 }
 0x21f   : > { %v1483_v19 = vpack.c.bf16 %v1479_v17, %v1479_v17  ;;  %v3952_v20 = vunpack.i.h.bf16 %v3950_v5  ;;  %v3951_v21 = vunpack.i.l.bf16 %v3950_v5  ;;  %v1482_v22 = vpack.c.bf16 %v1478_v18, %v1478_v18  ;;  %1451 = vmatprep.mubr.bf16.mxu1 %v4115_v3 }
 0x220   : > { %v1541_v10 = vpop.permute.xlu0 %1540 }
 0x221   : > { %v1542_v23 = vsel %vm922_vm12, %v3951_v21, %v3952_v20  ;;  %v1543_v24 = vsel %vm922_vm12, %v3952_v20, %v1541_v10  ;;  %3746 = vmatmul.mubr.msk.bf16.vlgmr.msra.gmra.mxu0 %vm529_vm3, %v3744_v12  ;;  %3751 = vmatprep.subr.msk.bf16.mxu0 %vm533_vm2, %v1483_v19  ;;  %v1488_v25 = vsel %vm533_vm2, %v1482_v22, 0 }
 0x222   : > { %v1547_v26 = vsel %vm4302_vm5, %v1543_v24, 0.0  ;;  %v3955_v7 = vpop.permute.xlu1 %3954  ;;  %1508 = vmatpush1.bf16.msra.mxu0 %v1488_v25  ;;  %v1546_v9 = vsel %vm491_vm6, %v1542_v23, 0.0  ;;  %1525 = vmatprep.mubr.bf16.mxu0 %v4115_v3 }
 0x223   : > { %v1551_v28 = vpack.c.bf16 %v1547_v26, %v1547_v26  ;;  %v3957_v29 = vunpack.i.h.bf16 %v3955_v7  ;;  %v3956_v30 = vunpack.i.l.bf16 %v3955_v7  ;;  %v1550_v31 = vpack.c.bf16 %v1546_v9, %v1546_v9 }
 0x224   : > { %v1677_v32 = vpop.permute.xlu0 %1676 }
 0x225   : > { %v1678_v33 = vsel %vm1060_vm13, %v3956_v30, %v3957_v29  ;;  %v1679_v34 = vsel %vm1060_vm13, %v3957_v29, %v1677_v32  ;;  %3749 = vmatmul.mubr.msk.bf16.vlgmr.msra.gmra.mxu1 %vm529_vm3, %v3747_v27  ;;  %3754 = vmatprep.subr.msk.bf16.mxu1 %vm533_vm2, %v1551_v28  ;;  %v1556_v35 = vsel %vm533_vm2, %v1550_v31, 0 }
 0x226   : > { %v1683_v36 = vsel %vm4311_vm8, %v1679_v34, 0.0  ;;  %v1613_v38 = vpop.permute.xlu1 %1612  ;;  %1576 = vmatpush1.bf16.msra.mxu1 %v1556_v35  ;;  %1593 = vmatprep.mubr.bf16.mxu1 %v4115_v3  ;;  %v1682_v40 = vsel %vm647_vm9, %v1678_v33, 0.0 }
 0x227   : > { %v1687_v41 = vpack.c.bf16 %v1683_v36, %v1683_v36  ;;  %v1686_v45 = vpack.c.bf16 %v1682_v40, %v1682_v40 }
 0x228   : > { %v1615_v42 = vpop.permute.xlu0 %1614 }
 0x229   : > { %v1618_v44 = vsel %vm999_vm14, %v1613_v38, %v1615_v42  ;;  %3752 = vmatmul.mubr.msk.bf16.vlgmr.msra.gmra.mxu0 %vm529_vm3, %v3750_v39  ;;  %3760 = vmatprep.subr.msk.bf16.mxu1 %vm533_vm2, %v1687_v41  ;;  %v1692_v52 = vsel %vm533_vm2, %v1686_v45, 0 }
 0x22a   : > { %v1617_v47 = vpop.permute.xlu1 %1616  ;;  %1661 = vmatprep.mubr.bf16.mxu0 %v4115_v3  ;;  %v1624_v50 = vsel %vm533_vm2, %v1618_v44, 0 }
 0x22b   : > { %v1619_v49 = vsel %vm999_vm14, %v1615_v42, %v1617_v47 }
 0x22c   : > { %3757 = vmatprep.subr.msk.bf16.mxu0 %vm533_vm2, %v1619_v49 }
 0x22d   : > { %3755 = vmatmul.mubr.msk.bf16.vlgmr.msra.gmra.mxu1 %vm529_vm3, %v3753_v48  ;;  %1644 = vmatpush1.bf16.msra.mxu0 %v1624_v50 }
 0x22e   : > { %1712 = vmatpush1.bf16.msra.mxu1 %v1692_v52  ;;  %1729 = vmatprep.mubr.bf16.mxu1 %v4115_v3 }
 0x231   : > { %3758 = vmatmul.mubr.msk.bf16.vlgmr.msra.gmra.mxu0 %vm529_vm3, %v3756_v53 }
 0x232   : > { %1832 = vmatprep.mubr.bf16.mxu0 %v4115_v3 }
 0x235   : > { %3761 = vmatmul.mubr.msk.bf16.vlgmr.msra.gmra.mxu1 %vm529_vm3, %v3759_v54  ;;  %v1744_v42 = vpop.permute.xlu0 %1743 }
 0x236   : > { %1882 = vmatprep.mubr.bf16.mxu1 %v4115_v3 }
 0x2d2   : > { %v1215_v56 = vpop.f32.mrf.mxu1 }
 0x2d4   : > { %v1217_v57 = vpop.f32.mrf.mxu1 }
 0x2d6   : > { %v1219_v58 = vpop.f32.mrf.mxu1 }
 0x2d8   : > { %v1220_v59 = vpop.f32.mrf.mxu1 }
 0x2d9   : > { %v1265_v60 = vpop.f32.mrf.mxu0 }
 0x2da   : > { %v1266_v12 = vadd.f32 %v1265_v60, %v1215_v56 }
 0x2db   : > { %v1267_v62 = vpop.f32.mrf.mxu0 }
 0x2dc   : > { %v1268_v20 = vadd.f32 %v1267_v62, %v1217_v57 }
 0x2dd   : > { %v1269_v63 = vpop.f32.mrf.mxu0  ;;  %v1331_v1 = vpop.f32.mrf.mxu1 }
 0x2de   : > { %v1338_v21 = vadd.f32 %v1331_v1, %v1266_v12  ;;  %v4574_v63 = vld [vmem:[#allocation2 + $0x8] sm:$0xff]  ;;  %v1782_v1 = vpop.permute.xlu1 %1781 }
 0x2df   : > { %v1270_v4 = vpop.f32.mrf.mxu0  ;;  %v1333_v6 = vpop.f32.mrf.mxu1 }
 0x2e0   : > { %v1339_v23 = vadd.f32 %v1333_v6, %v1268_v20 }
 0x2e1   : > { %v1335_v8 = vpop.f32.mrf.mxu1  ;;  %v1399_v11 = vpop.f32.mrf.mxu0 }
 0x2e2   : > { %v1406_v24 = vadd.f32 %v1399_v11, %v1338_v21 }
 0x2e3   : > { %v1336_v13 = vpop.f32.mrf.mxu1  ;;  %v1401_v14 = vpop.f32.mrf.mxu0 }
 0x2e4   : > { %v1407_v7 = vadd.f32 %v1401_v14, %v1339_v23 }
 0x2e5   : > { %v1403_v15 = vpop.f32.mrf.mxu0  ;;  %v1453_v16 = vpop.f32.mrf.mxu1 }
 0x2e6   : > { %v1460_v27 = vadd.f32 %v1453_v16, %v1406_v24 }
 0x2e7   : > { %v1404_v17 = vpop.f32.mrf.mxu0  ;;  %v1455_v5 = vpop.f32.mrf.mxu1 }
 0x2e8   : > { %v1461_v29 = vadd.f32 %v1455_v5, %v1407_v7  ;;  %v3762_v17 = vld [vmem:[%s5026_s7 + $0x2] sm:$0x3] }
 0x2e9   : > { %v1457_v18 = vpop.f32.mrf.mxu1  ;;  %v1527_v19 = vpop.f32.mrf.mxu0 }
 0x2ea   : > { %v1534_v30 = vadd.f32 %v1527_v19, %v1460_v27 }
 0x2eb   : > { %v1458_v22 = vpop.f32.mrf.mxu1  ;;  %v1529_v10 = vpop.f32.mrf.mxu0 }
 0x2ec   : > { %v1535_v33 = vadd.f32 %v1529_v10, %v1461_v29  ;;  %v1770_v29 = vld [vmem:[%s5026_s7] sm:$0x3] }
 0x2ed   : > { %v1531_v25 = vpop.f32.mrf.mxu0  ;;  %v1595_v26 = vpop.f32.mrf.mxu1 }
 0x2ee   : > { %v1602_v34 = vadd.f32 %v1595_v26, %v1534_v30 }
 0x2ef   : > { %v1532_v9 = vpop.f32.mrf.mxu0  ;;  %v1597_v28 = vpop.f32.mrf.mxu1 }
 0x2f0   : > { %v1603_v38 = vadd.f32 %v1597_v28, %v1535_v33 }
 0x2f1   : > { %v1599_v31 = vpop.f32.mrf.mxu1  ;;  %v1663_v32 = vpop.f32.mrf.mxu0 }
 0x2f2   : > { %v1670_v39 = vadd.f32 %v1663_v32, %v1602_v34 }
 0x2f3   : > { %v1600_v35 = vpop.f32.mrf.mxu1  ;;  %v1665_v36 = vpop.f32.mrf.mxu0 }
 0x2f4   : > { %v1671_v44 = vadd.f32 %v1665_v36, %v1603_v38 }
 0x2f5   : > { %v1667_v40 = vpop.f32.mrf.mxu0  ;;  %v1731_v41 = vpop.f32.mrf.mxu1 }
 0x2f6   : > { %v1738_v45 = vadd.f32 %v1731_v41, %v1670_v39 }
 0x2f7   : > { %v1668_v47 = vpop.f32.mrf.mxu0  ;;  %v1733_v48 = vpop.f32.mrf.mxu1 }
 0x2f8   : > { %v1746_v49 = vadd.f32 %v1744_v42, %v1738_v45  ;;  %v1739_v50 = vadd.f32 %v1733_v48, %v1671_v44 }
 0x2f9   : > { %v1735_v52 = vpop.f32.mrf.mxu1 }
 0x2fa   : > { %v1748_v53 = vmax.f32 %v1746_v49, 0.0  ;;  %v1747_v54 = vadd.f32 %v1744_v42, %v1739_v50  ;;  %v3767_v42 = vld [vmem:[%s5026_s7 + $0x4] sm:$0x3] }
 0x2fb   : > { %v1736_v56 = vpop.f32.mrf.mxu1 }
 0x2fc   : > { %1750 = vst [vmem:[#allocation2 + $0x10] sm:$0xff] %v1748_v53  ;;  %v1749_v57 = vmax.f32 %v1747_v54, 0.0  ;;  %v4555_v58 = vpack.c.bf16 %v1748_v53, %v1748_v53  ;;  %v3958_v60 = vpack.i.bf16 %v1748_v53, %v4114_v0 }
 0x2fe   : > { %1751 = vst [vmem:[#allocation2 + $0x18] sm:$0xff] %v1749_v57  ;;  %1783 = vrot.lane.b32.xlu0 %v4555_v58, %s5071_s3  ;;  %v4559_v59 = vpack.c.bf16 %v1749_v57, %v1749_v57  ;;  %v3973_v62 = vpack.i.bf16 %v1749_v57, %v1748_v53  ;;  %v2033_v56 = vsel %vm1793_vm15, %v4555_v58, 0 }
 0x300   : > { %1785 = vrot.lane.b32.xlu1 %v4559_v59, %s5071_s3 }
 0x302   : > { %3959 = vrot.lane.b32.xlu0 %v3958_v60, %s5065_s23 }
 0x304   : > { %1762 = vrot.lane.b32.xlu1 %v1749_v57, %s5065_s23 }
 0x306   : > { %3964 = vrot.lane.b32.xlu0 %v3958_v60, %s5066_s24 }
 0x308   : > { %1895 = vrot.lane.b32.xlu1 %v1749_v57, %s5066_s24 }
 0x30a   : > { %3969 = vrot.lane.b32.xlu0 %v3958_v60, %s5067_s15 }
 0x30c   : > { %1963 = vrot.lane.b32.xlu1 %v1749_v57, %s5067_s15 }
 0x30e   : > { %3974 = vrot.lane.b32.xlu0 %v3973_v62, %s5068_s22 }
 0x310   : > { %2091 = vrot.lane.b32.xlu1 %v4114_v0, %s5068_s22  ;;  %v2359_v0 = vld [vmem:[%s5027_s8] sm:$0xf] }
 0x312   : > { %3979 = vrot.lane.b32.xlu0 %v3973_v62, %s5069_s30 }
 0x314   : > { %2159 = vrot.lane.b32.xlu1 %v4574_v63, %s5069_s30 }
 0x316   : > { %3984 = vrot.lane.b32.xlu0 %v3973_v62, %s5072_s0 }
 0x318   : > { %2295 = vrot.lane.b32.xlu1 %v4574_v63, %s5072_s0 }
 0x31a   : > { %2231 = vrot.lane.b32.xlu0 %v4555_v58, %s5073_s2 }
 0x31c   : > { %2233 = vrot.lane.b32.xlu1 %v4559_v59, %s5073_s2 }
 0x31e   : > { %2235 = vrot.lane.b32.xlu0 %v4124_v55, %s5073_s2 }
 0x320   : > { %2362 = vperm.xlu1 %3988, %v2359_v0  }
 0x370   : > { %v1784_v4 = vpop.permute.xlu0 %1783 }
 0x371   : > { %v1787_v6 = vsel %vm526_vm1, %v1782_v1, %v1784_v4 }
 0x372   : > { %v1786_v8 = vpop.permute.xlu1 %1785  ;;  %v1795_v13 = vsel %vm1793_vm15, %v1787_v6, 0 }
 0x373   : > { %v1788_v11 = vsel %vm526_vm1, %v1784_v4, %v1786_v8 }
 0x374   : > { %v3960_v14 = vpop.permute.xlu0 %3959  ;;  %3763 = vmatprep.subr.msk.bf16.mxu0 %vm1793_vm15, %v1788_v11 }
 0x375   : > { %v3962_v15 = vunpack.i.h.bf16 %v3960_v14  ;;  %v3961_v16 = vunpack.i.l.bf16 %v3960_v14  ;;  %1815 = vmatpush1.bf16.msra.mxu0 %v1795_v13 }
 0x376   : > { %v1763_v5 = vpop.permute.xlu1 %1762 }
 0x377   : > { %v1764_v12 = vsel %vm502_vm4, %v3961_v16, %v3962_v15  ;;  %v1765_v18 = vsel %vm502_vm4, %v3962_v15, %v1763_v5  ;;  %v3773_v16 = vld [vmem:[%s5026_s7 + $0x8] sm:$0x3] }
 0x378   : > { %v1769_v19 = vsel %vm4302_vm5, %v1765_v18, 0.0  ;;  %v3965_v20 = vpop.permute.xlu0 %3964  ;;  %3764 = vmatmul.mubr.msk.bf16.vlgmr.msra.gmra.mxu0 %vm1789_vm0, %v3762_v17  ;;  %v1768_v21 = vsel %vm491_vm6, %v1764_v12, 0.0 }
 0x379   : > { %v1772_v22 = vpack.c.bf16 %v1769_v19, %v1769_v19  ;;  %v3967_v10 = vunpack.i.h.bf16 %v3965_v20  ;;  %v3966_v23 = vunpack.i.l.bf16 %v3965_v20  ;;  %v1771_v24 = vpack.c.bf16 %v1768_v21, %v1768_v21  ;;  %1948 = vmatprep.mubr.bf16.mxu0 %v4115_v3 }
 0x37a   : > { %v1896_v25 = vpop.permute.xlu1 %1895 }
 0x37b   : > { %v1897_v26 = vsel %vm655_vm7, %v3966_v23, %v3967_v10  ;;  %v1898_v7 = vsel %vm655_vm7, %v3967_v10, %v1896_v25  ;;  %3765 = vmatprep.subr.msk.bf16.mxu1 %vm1793_vm15, %v1772_v22  ;;  %v1845_v27 = vsel %vm1793_vm15, %v1771_v24, 0  ;;  %v3776_v25 = vld [vmem:[%s5026_s7 + $0xa] sm:$0x3] }
 0x37c   : > { %v1902_v9 = vsel %vm4311_vm8, %v1898_v7, 0.0  ;;  %v3970_v28 = vpop.permute.xlu0 %3969  ;;  %1865 = vmatpush1.bf16.msra.mxu1 %v1845_v27  ;;  %v1901_v30 = vsel %vm647_vm9, %v1897_v26, 0.0 }
 0x37d   : > { %v1906_v31 = vpack.c.bf16 %v1902_v9, %v1902_v9  ;;  %v3972_v32 = vunpack.i.h.bf16 %v3970_v28  ;;  %v3971_v33 = vunpack.i.l.bf16 %v3970_v28  ;;  %v1905_v34 = vpack.c.bf16 %v1901_v30, %v1901_v30  ;;  %v3779_v30 = vld [vmem:[%s5026_s7 + $0xc] sm:$0x3] }
 0x37e   : > { %v1964_v35 = vpop.permute.xlu1 %1963 }
 0x37f   : > { %v1965_v36 = vsel %vm724_vm10, %v3971_v33, %v3972_v32  ;;  %v1966_v38 = vsel %vm724_vm10, %v3972_v32, %v1964_v35  ;;  %3766 = vmatmul.mubr.msk.bf16.vlgmr.msra.gmra.mxu1 %vm1789_vm0, %v1770_v29  ;;  %3768 = vmatprep.subr.msk.bf16.mxu0 %vm1793_vm15, %v1906_v31  ;;  %v1911_v39 = vsel %vm1793_vm15, %v1905_v34, 0  ;;  %v3782_v34 = vld [vmem:[%s5026_s7 + $0xe] sm:$0x3]  ;;  %v3785_v35 = vld [vmem:[%s5026_s7 + $0x10] sm:$0x3] }
 0x380   : > { %v1970_v40 = vsel %vm4302_vm5, %v1966_v38, 0.0  ;;  %v3975_v41 = vpop.permute.xlu0 %3974  ;;  %1931 = vmatpush1.bf16.msra.mxu0 %v1911_v39  ;;  %v1969_v44 = vsel %vm491_vm6, %v1965_v36, 0.0  ;;  %2016 = vmatprep.mubr.bf16.mxu1 %v4115_v3  ;;  %v4695_v36 = vld [vmem:[#allocation2 + $0x8] sm:$0xf] }
 0x381   : > { %v1974_v45 = vpack.c.bf16 %v1970_v40, %v1970_v40  ;;  %v3977_v47 = vunpack.i.h.bf16 %v3975_v41  ;;  %v3976_v48 = vunpack.i.l.bf16 %v3975_v41  ;;  %3774 = vmatprep.subr.msk.bf16.mxu0 %vm1793_vm15, %v4559_v59  ;;  %v1973_v49 = vpack.c.bf16 %v1969_v44, %v1969_v44  ;;  %v3770_v59 = vld [vmem:[%s5026_s7 + $0x6] sm:$0x3] }
 0x382   : > { %v2092_v50 = vpop.permute.xlu1 %2091  ;;  %v2401_v38 = vpack.c.bf16 %v4695_v36, %v4695_v36 }
 0x383   : > { %v2093_v52 = vsel %vm853_vm11, %v3976_v48, %v3977_v47  ;;  %v2094_v53 = vsel %vm853_vm11, %v3977_v47, %v2092_v50  ;;  %3769 = vmatmul.mubr.msk.bf16.vlgmr.msra.gmra.mxu0 %vm1789_vm0, %v3767_v42  ;;  %3771 = vmatprep.subr.msk.bf16.mxu1 %vm1793_vm15, %v1974_v45  ;;  %v1979_v54 = vsel %vm1793_vm15, %v1973_v49, 0 }
 0x384   : > { %v2098_v57 = vsel %vm4311_vm8, %v2094_v53, 0.0  ;;  %v3980_v60 = vpop.permute.xlu0 %3979  ;;  %1999 = vmatpush1.bf16.msra.mxu1 %v1979_v54  ;;  %2053 = vmatpush1.bf16.msra.mxu0 %v2033_v56  ;;  %v2097_v62 = vsel %vm647_vm9, %v2093_v52, 0.0 }
 0x385   : > { %v2102_v0 = vpack.c.bf16 %v2098_v57, %v2098_v57  ;;  %v3982_v1 = vunpack.i.h.bf16 %v3980_v60  ;;  %v3981_v4 = vunpack.i.l.bf16 %v3980_v60  ;;  %v2101_v6 = vpack.c.bf16 %v2097_v62, %v2097_v62  ;;  %2070 = vmatprep.mubr.bf16.mxu0 %v4115_v3  ;;  %2407 = vrot.lane.b32.xlu0 %v2401_v38, %s5071_s3 }
 0x386   : > { %v2160_v58 = vpop.permute.xlu1 %2159 }
 0x387   : > { %v2161_v8 = vsel %vm922_vm12, %v3981_v4, %v3982_v1  ;;  %v2162_v11 = vsel %vm922_vm12, %v3982_v1, %v2160_v58  ;;  %3772 = vmatmul.mubr.msk.bf16.vlgmr.msra.gmra.mxu1 %vm1789_vm0, %v3770_v59  ;;  %3777 = vmatprep.subr.msk.bf16.mxu1 %vm1793_vm15, %v2102_v0  ;;  %v2107_v13 = vsel %vm1793_vm15, %v2101_v6, 0 }
 0x388   : > { %v2166_v14 = vsel %vm4302_vm5, %v2162_v11, 0.0  ;;  %v3985_v15 = vpop.permute.xlu0 %3984  ;;  %2127 = vmatpush1.bf16.msra.mxu1 %v2107_v13  ;;  %v2165_v17 = vsel %vm491_vm6, %v2161_v8, 0.0  ;;  %2144 = vmatprep.mubr.bf16.mxu1 %v4115_v3 }
 0x389   : > { %v2170_v5 = vpack.c.bf16 %v2166_v14, %v2166_v14  ;;  %v3987_v12 = vunpack.i.h.bf16 %v3985_v15  ;;  %v3986_v18 = vunpack.i.l.bf16 %v3985_v15  ;;  %v2169_v19 = vpack.c.bf16 %v2165_v17, %v2165_v17 }
 0x38a   : > { %v2296_v20 = vpop.permute.xlu1 %2295 }
 0x38b   : > { %v2297_v21 = vsel %vm1060_vm13, %v3986_v18, %v3987_v12  ;;  %v2298_v22 = vsel %vm1060_vm13, %v3987_v12, %v2296_v20  ;;  %3775 = vmatmul.mubr.msk.bf16.vlgmr.msra.gmra.mxu0 %vm1789_vm0, %v3773_v16  ;;  %3780 = vmatprep.subr.msk.bf16.mxu0 %vm1793_vm15, %v2170_v5  ;;  %v2175_v10 = vsel %vm1793_vm15, %v2169_v19, 0 }
 0x38c   : > { %v2302_v23 = vsel %vm4311_vm8, %v2298_v22, 0.0  ;;  %v2232_v24 = vpop.permute.xlu0 %2231  ;;  %2195 = vmatpush1.bf16.msra.mxu0 %v2175_v10  ;;  %2212 = vmatprep.mubr.bf16.mxu0 %v4115_v3  ;;  %v2301_v26 = vsel %vm647_vm9, %v2297_v21, 0.0 }
 0x38d   : > { %v2306_v7 = vpack.c.bf16 %v2302_v23, %v2302_v23  ;;  %v2305_v28 = vpack.c.bf16 %v2301_v26, %v2301_v26 }
 0x38e   : > { %v2234_v27 = vpop.permute.xlu1 %2233 }
 0x38f   : > { %v2237_v9 = vsel %vm999_vm14, %v2232_v24, %v2234_v27  ;;  %3778 = vmatmul.mubr.msk.bf16.vlgmr.msra.gmra.mxu1 %vm1789_vm0, %v3776_v25  ;;  %3786 = vmatprep.subr.msk.bf16.mxu0 %vm1793_vm15, %v2306_v7  ;;  %v2311_v33 = vsel %vm1793_vm15, %v2305_v28, 0 }
 0x390   : > { %v2236_v29 = vpop.permute.xlu0 %2235  ;;  %2280 = vmatprep.mubr.bf16.mxu1 %v4115_v3  ;;  %v2243_v32 = vsel %vm1793_vm15, %v2237_v9, 0 }
 0x391   : > { %v2238_v31 = vsel %vm999_vm14, %v2234_v27, %v2236_v29 }
 0x392   : > { %3783 = vmatprep.subr.msk.bf16.mxu1 %vm1793_vm15, %v2238_v31 }
 0x393   : > { %3781 = vmatmul.mubr.msk.bf16.vlgmr.msra.gmra.mxu0 %vm1789_vm0, %v3779_v30  ;;  %2263 = vmatpush1.bf16.msra.mxu1 %v2243_v32  ;;  %v465_v32 = vld [vmem:[%s458_s5] sm:$0xff] }
 0x394   : > { %2331 = vmatpush1.bf16.msra.mxu0 %v2311_v33  ;;  %2348 = vmatprep.mubr.bf16.mxu0 %v4115_v3 }
 0x397   : > { %3784 = vmatmul.mubr.msk.bf16.vlgmr.msra.gmra.mxu1 %vm1789_vm0, %v3782_v34 }
 0x398   : > { %2456 = vmatprep.mubr.bf16.mxu1 %v4115_v3 }
 0x39b   : > { %3787 = vmatmul.mubr.msk.bf16.vlgmr.msra.gmra.mxu0 %vm1789_vm0, %v3785_v35  ;;  %v2363_v27 = vpop.permute.xlu1 %2362 }
 0x39c   : > { %2506 = vmatprep.mubr.bf16.mxu0 %v4115_v3 }
 0x438   : > { %v1834_v39 = vpop.f32.mrf.mxu0 }
 0x43a   : > { %v1836_v40 = vpop.f32.mrf.mxu0 }
 0x43c   : > { %v1838_v41 = vpop.f32.mrf.mxu0 }
 0x43e   : > { %v1839_v42 = vpop.f32.mrf.mxu0 }
 0x43f   : > { %v1884_v44 = vpop.f32.mrf.mxu1 }
 0x440   : > { %v1885_v0 = vadd.f32 %v1884_v44, %v1834_v39  ;;  %v2370_v39 = vcombine.high %v465_v32, %v465_v32 }
 0x441   : > { %v1886_v45 = vpop.f32.mrf.mxu1 }
 0x442   : > { %v1887_v6 = vadd.f32 %v1886_v45, %v1836_v40 }
 0x443   : > { %v1888_v47 = vpop.f32.mrf.mxu1  ;;  %v1950_v48 = vpop.f32.mrf.mxu0 }
 0x444   : > { %v1957_v58 = vadd.f32 %v1950_v48, %v1885_v0  ;;  %v2983_v0 = vld [vmem:[%s5029_s10] sm:$0xff] }
 0x445   : > { %v1889_v49 = vpop.f32.mrf.mxu1  ;;  %v1952_v50 = vpop.f32.mrf.mxu0 }
 0x446   : > { %v1958_v13 = vadd.f32 %v1952_v50, %v1887_v6 }
 0x447   : > { %v1954_v52 = vpop.f32.mrf.mxu0  ;;  %v2018_v53 = vpop.f32.mrf.mxu1 }
 0x448   : > { %v2025_v14 = vadd.f32 %v2018_v53, %v1957_v58 }
 0x449   : > { %v1955_v54 = vpop.f32.mrf.mxu0  ;;  %v2020_v56 = vpop.f32.mrf.mxu1 }
 0x44a   : > { %v2026_v17 = vadd.f32 %v2020_v56, %v1958_v13 }
 0x44b   : > { %v2022_v57 = vpop.f32.mrf.mxu1  ;;  %v2072_v60 = vpop.f32.mrf.mxu0 }
 0x44c   : > { %v2079_v5 = vadd.f32 %v2072_v60, %v2025_v14  ;;  %v2707_v60 = vld [vmem:[#allocation2] sm:$0xf] }
 0x44d   : > { %v2023_v59 = vpop.f32.mrf.mxu1  ;;  %v2074_v62 = vpop.f32.mrf.mxu0 }
 0x44e   : > { %v2080_v19 = vadd.f32 %v2074_v62, %v2026_v17  ;;  %v2851_v62 = vpack.c.bf16 %v2707_v60, %v2707_v60 }
 0x44f   : > { %v2076_v1 = vpop.f32.mrf.mxu0  ;;  %v2146_v4 = vpop.f32.mrf.mxu1 }
 0x450   : > { %v2153_v20 = vadd.f32 %v2146_v4, %v2079_v5  ;;  %v2408_v1 = vpop.permute.xlu0 %2407 }
 0x451   : > { %v2077_v8 = vpop.f32.mrf.mxu0  ;;  %v2148_v11 = vpop.f32.mrf.mxu1 }
 0x452   : > { %v2154_v10 = vadd.f32 %v2148_v11, %v2080_v19 }
 0x453   : > { %v2150_v15 = vpop.f32.mrf.mxu1  ;;  %v2214_v16 = vpop.f32.mrf.mxu0 }
 0x454   : > { %v2221_v23 = vadd.f32 %v2214_v16, %v2153_v20  ;;  %v3788_v16 = vld [vmem:[%s5028_s9 + $0x4] sm:$0xf] }
 0x455   : > { %v2151_v12 = vpop.f32.mrf.mxu1  ;;  %v2216_v18 = vpop.f32.mrf.mxu0 }
 0x456   : > { %v2222_v26 = vadd.f32 %v2216_v18, %v2154_v10 }
 0x457   : > { %v2218_v21 = vpop.f32.mrf.mxu0  ;;  %v2282_v22 = vpop.f32.mrf.mxu1 }
 0x458   : > { %v2289_v7 = vadd.f32 %v2282_v22, %v2221_v23 }
 0x459   : > { %v2219_v24 = vpop.f32.mrf.mxu0  ;;  %v2284_v25 = vpop.f32.mrf.mxu1 }
 0x45a   : > { %v2290_v29 = vadd.f32 %v2284_v25, %v2222_v26 }
 0x45b   : > { %v2286_v9 = vpop.f32.mrf.mxu1  ;;  %v2350_v28 = vpop.f32.mrf.mxu0 }
 0x45c   : > { %v2357_v30 = vadd.f32 %v2350_v28, %v2289_v7  ;;  %v2396_v28 = vld [vmem:[%s5028_s9] sm:$0xf] }
 0x45d   : > { %v2352_v31 = vpop.f32.mrf.mxu0  ;;  %v2287_v33 = vpop.f32.mrf.mxu1 }
 0x45e   : > { %v2358_v34 = vadd.f32 %v2352_v31, %v2290_v29  ;;  %v2365_v35 = vadd.f32 %v2363_v27, %v2357_v30 }
 0x45f   : > { %v2354_v38 = vpop.f32.mrf.mxu0 }
 0x460   : > { %v2366_v40 = vadd.f32 %v2363_v27, %v2358_v34  ;;  %v2367_v41 = vadd.f32 %v2365_v35, %v4415_v61 }
 0x461   : > { %v2355_v42 = vpop.f32.mrf.mxu0 }
 0x462   : > { %v2368_v44 = vadd.f32 %v2366_v40, %v4418_v2  ;;  %v4707_v45 = vadd.f32 %v2367_v41, %v465_v32  ;;  %v3793_v42 = vld [vmem:[%s5028_s9 + $0x8] sm:$0xf] }
 0x464   : > { %v4709_v47 = vadd.f32 %v2370_v39, %v2368_v44  ;;  %v2374_v48 = vmax.f32 %v4707_v45, 0.0 }
 0x466   : > { %v2375_v49 = vmax.f32 %v4709_v47, 0.0  ;;  %2376 = vst [vmem:[#allocation2 + $0x10] sm:$0xf] %v2374_v48 }
 0x468   : > { %2377 = vst [vmem:[#allocation2 + $0x18] sm:$0xf] %v2375_v49 }
 0x46d   : > { %v2379_v50 = vld [vmem:[#allocation2 + $0x10] sm:$0xf] }
 0x46e   : > { %v4713_v52 = vpack.c.bf16 %v2379_v50, %v2379_v50  ;;  %v3989_v2 = vpack.i.bf16 %v2379_v50, %v4695_v36  ;;  %v2705_v56 = vld [vmem:[#allocation2 + $0x10] sm:$0xf] }
 0x46f   : > { %v2380_v53 = vld [vmem:[#allocation2 + $0x18] sm:$0xf]  ;;  %v2849_v36 = vpack.c.bf16 %v2705_v56, %v2705_v56 }
 0x470   : > { %2409 = vrot.lane.b32.xlu1 %v4713_v52, %s5071_s3  ;;  %v4717_v61 = vpack.c.bf16 %v2380_v53, %v2380_v53  ;;  %v2706_v54 = vld [vmem:[#allocation2 + $0x18] sm:$0xf] }
 0x471   : > { %v4004_v57 = vpack.i.bf16 %v2706_v54, %v2705_v56  ;;  %v2850_v59 = vpack.c.bf16 %v2706_v54, %v2706_v54 }
 0x472   : > { %2411 = vrot.lane.b32.xlu0 %v4717_v61, %s5071_s3 }
 0x474   : > { %3990 = vrot.lane.b32.xlu1 %v3989_v2, %s5065_s23 }
 0x476   : > { %2388 = vrot.lane.b32.xlu0 %v2380_v53, %s5065_s23 }
 0x478   : > { %3995 = vrot.lane.b32.xlu1 %v3989_v2, %s5066_s24 }
 0x47a   : > { %2519 = vrot.lane.b32.xlu0 %v2380_v53, %s5066_s24 }
 0x47c   : > { %4000 = vrot.lane.b32.xlu1 %v3989_v2, %s5067_s15 }
 0x47e   : > { %2587 = vrot.lane.b32.xlu0 %v2380_v53, %s5067_s15 }
 0x480   : > { %4005 = vrot.lane.b32.xlu1 %v4004_v57, %s5068_s22 }
 0x482   : > { %2715 = vrot.lane.b32.xlu0 %v2707_v60, %s5068_s22 }
 0x484   : > { %4010 = vrot.lane.b32.xlu1 %v4004_v57, %s5069_s30 }
 0x486   : > { %2783 = vrot.lane.b32.xlu0 %v2707_v60, %s5069_s30 }
 0x488   : > { %4015 = vrot.lane.b32.xlu1 %v4004_v57, %s5072_s0 }
 0x48a   : > { %2919 = vrot.lane.b32.xlu0 %v2707_v60, %s5072_s0  ;;  %v2657_v60 = vsel %vm533_vm2, %v4713_v52, 0 }
 0x48c   : > { %2855 = vrot.lane.b32.xlu1 %v2849_v36, %s5073_s2 }
 0x48e   : > { %2857 = vrot.lane.b32.xlu0 %v2850_v59, %s5073_s2 }
 0x490   : > { %2859 = vrot.lane.b32.xlu1 %v2851_v62, %s5073_s2 }
 0x492   : > { %2986 = vperm.xlu0 %3927, %v2983_v0  }
 0x494   : > { %3024 = vrot.lane.b32.xlu1 %v4124_v55, %s5071_s3 }
 0x4e2   : > { %v2410_v4 = vpop.permute.xlu1 %2409 }
 0x4e3   : > { %v2413_v6 = vsel %vm526_vm1, %v2408_v1, %v2410_v4 }
 0x4e4   : > { %v2412_v58 = vpop.permute.xlu0 %2411  ;;  %v2419_v11 = vsel %vm533_vm2, %v2413_v6, 0 }
 0x4e5   : > { %v2414_v8 = vsel %vm526_vm1, %v2410_v4, %v2412_v58 }
 0x4e6   : > { %3789 = vmatprep.subr.msk.bf16.mxu1 %vm533_vm2, %v2414_v8  ;;  %v3991_v13 = vpop.permute.xlu1 %3990 }
 0x4e7   : > { %v3993_v14 = vunpack.i.h.bf16 %v3991_v13  ;;  %v3992_v15 = vunpack.i.l.bf16 %v3991_v13  ;;  %2439 = vmatpush1.bf16.msra.mxu1 %v2419_v11 }
 0x4e8   : > { %v2389_v17 = vpop.permute.xlu0 %2388 }
 0x4e9   : > { %v2390_v5 = vsel %vm502_vm4, %v3992_v15, %v3993_v14  ;;  %v2391_v12 = vsel %vm502_vm4, %v3993_v14, %v2389_v17  ;;  %v3799_v15 = vld [vmem:[%s5028_s9 + $0x10] sm:$0xf] }
 0x4ea   : > { %v2395_v18 = vsel %vm4302_vm5, %v2391_v12, 0.0  ;;  %3790 = vmatmul.mubr.msk.bf16.vlgmr.msra.gmra.mxu1 %vm529_vm3, %v3788_v16  ;;  %v3996_v19 = vpop.permute.xlu1 %3995  ;;  %v2394_v20 = vsel %vm491_vm6, %v2390_v5, 0.0 }
 0x4eb   : > { %v2398_v21 = vpack.c.bf16 %v2395_v18, %v2395_v18  ;;  %v3998_v22 = vunpack.i.h.bf16 %v3996_v19  ;;  %v3997_v10 = vunpack.i.l.bf16 %v3996_v19  ;;  %v2397_v23 = vpack.c.bf16 %v2394_v20, %v2394_v20  ;;  %2572 = vmatprep.mubr.bf16.mxu1 %v4115_v3 }
 0x4ec   : > { %v2520_v24 = vpop.permute.xlu0 %2519 }
 0x4ed   : > { %v2521_v25 = vsel %vm655_vm7, %v3997_v10, %v3998_v22  ;;  %v2522_v26 = vsel %vm655_vm7, %v3998_v22, %v2520_v24  ;;  %3791 = vmatprep.subr.msk.bf16.mxu0 %vm533_vm2, %v2398_v21  ;;  %v2469_v7 = vsel %vm533_vm2, %v2397_v23, 0  ;;  %v3802_v24 = vld [vmem:[%s5028_s9 + $0x14] sm:$0xf] }
 0x4ee   : > { %v2526_v27 = vsel %vm4311_vm8, %v2522_v26, 0.0  ;;  %v4001_v9 = vpop.permute.xlu1 %4000  ;;  %2489 = vmatpush1.bf16.msra.mxu0 %v2469_v7  ;;  %v2525_v29 = vsel %vm647_vm9, %v2521_v25, 0.0 }
 0x4ef   : > { %v2530_v30 = vpack.c.bf16 %v2526_v27, %v2526_v27  ;;  %v4003_v31 = vunpack.i.h.bf16 %v4001_v9  ;;  %v4002_v32 = vunpack.i.l.bf16 %v4001_v9  ;;  %v2529_v33 = vpack.c.bf16 %v2525_v29, %v2525_v29  ;;  %v3805_v29 = vld [vmem:[%s5028_s9 + $0x18] sm:$0xf] }
 0x4f0   : > { %v2588_v34 = vpop.permute.xlu0 %2587 }
 0x4f1   : > { %v2589_v35 = vsel %vm724_vm10, %v4002_v32, %v4003_v31  ;;  %v2590_v38 = vsel %vm724_vm10, %v4003_v31, %v2588_v34  ;;  %3792 = vmatmul.mubr.msk.bf16.vlgmr.msra.gmra.mxu0 %vm529_vm3, %v2396_v28  ;;  %3794 = vmatprep.subr.msk.bf16.mxu1 %vm533_vm2, %v2530_v30  ;;  %v2535_v39 = vsel %vm533_vm2, %v2529_v33, 0  ;;  %v3808_v33 = vld [vmem:[%s5028_s9 + $0x1c] sm:$0xf]  ;;  %v3811_v34 = vld [vmem:[%s5028_s9 + $0x20] sm:$0xf] }
 0x4f2   : > { %v2594_v40 = vsel %vm4302_vm5, %v2590_v38, 0.0  ;;  %v4006_v41 = vpop.permute.xlu1 %4005  ;;  %2555 = vmatpush1.bf16.msra.mxu1 %v2535_v39  ;;  %v2593_v44 = vsel %vm491_vm6, %v2589_v35, 0.0  ;;  %2640 = vmatprep.mubr.bf16.mxu0 %v4115_v3 }
 0x4f3   : > { %v2598_v48 = vpack.c.bf16 %v2594_v40, %v2594_v40  ;;  %v4008_v49 = vunpack.i.h.bf16 %v4006_v41  ;;  %v4007_v50 = vunpack.i.l.bf16 %v4006_v41  ;;  %3800 = vmatprep.subr.msk.bf16.mxu1 %vm533_vm2, %v4717_v61  ;;  %v2597_v53 = vpack.c.bf16 %v2593_v44, %v2593_v44  ;;  %v3796_v61 = vld [vmem:[%s5028_s9 + $0xc] sm:$0xf] }
 0x4f4   : > { %v2716_v2 = vpop.permute.xlu0 %2715 }
 0x4f5   : > { %v2717_v54 = vsel %vm853_vm11, %v4007_v50, %v4008_v49  ;;  %v2718_v56 = vsel %vm853_vm11, %v4008_v49, %v2716_v2  ;;  %3795 = vmatmul.mubr.msk.bf16.vlgmr.msra.gmra.mxu1 %vm529_vm3, %v3793_v42  ;;  %3797 = vmatprep.subr.msk.bf16.mxu0 %vm533_vm2, %v2598_v48  ;;  %v2603_v57 = vsel %vm533_vm2, %v2597_v53, 0 }
 0x4f6   : > { %v2722_v36 = vsel %vm4311_vm8, %v2718_v56, 0.0  ;;  %v4011_v59 = vpop.permute.xlu1 %4010  ;;  %2623 = vmatpush1.bf16.msra.mxu0 %v2603_v57  ;;  %2677 = vmatpush1.bf16.msra.mxu1 %v2657_v60  ;;  %v2721_v62 = vsel %vm647_vm9, %v2717_v54, 0.0 }
 0x4f7   : > { %v2726_v0 = vpack.c.bf16 %v2722_v36, %v2722_v36  ;;  %v4013_v1 = vunpack.i.h.bf16 %v4011_v59  ;;  %v4012_v4 = vunpack.i.l.bf16 %v4011_v59  ;;  %v2725_v6 = vpack.c.bf16 %v2721_v62, %v2721_v62  ;;  %2694 = vmatprep.mubr.bf16.mxu1 %v4115_v3 }
 0x4f8   : > { %v2784_v52 = vpop.permute.xlu0 %2783 }
 0x4f9   : > { %v2785_v58 = vsel %vm922_vm12, %v4012_v4, %v4013_v1  ;;  %v2786_v8 = vsel %vm922_vm12, %v4013_v1, %v2784_v52  ;;  %3798 = vmatmul.mubr.msk.bf16.vlgmr.msra.gmra.mxu0 %vm529_vm3, %v3796_v61  ;;  %3803 = vmatprep.subr.msk.bf16.mxu0 %vm533_vm2, %v2726_v0  ;;  %v2731_v11 = vsel %vm533_vm2, %v2725_v6, 0 }
 0x4fa   : > { %v2790_v13 = vsel %vm4302_vm5, %v2786_v8, 0.0  ;;  %v4016_v14 = vpop.permute.xlu1 %4015  ;;  %2751 = vmatpush1.bf16.msra.mxu0 %v2731_v11  ;;  %v2789_v16 = vsel %vm491_vm6, %v2785_v58, 0.0  ;;  %2768 = vmatprep.mubr.bf16.mxu0 %v4115_v3 }
 0x4fb   : > { %v2794_v17 = vpack.c.bf16 %v2790_v13, %v2790_v13  ;;  %v4018_v5 = vunpack.i.h.bf16 %v4016_v14  ;;  %v4017_v12 = vunpack.i.l.bf16 %v4016_v14  ;;  %v2793_v18 = vpack.c.bf16 %v2789_v16, %v2789_v16 }
 0x4fc   : > { %v2920_v19 = vpop.permute.xlu0 %2919 }
 0x4fd   : > { %v2921_v20 = vsel %vm1060_vm13, %v4017_v12, %v4018_v5  ;;  %v2922_v21 = vsel %vm1060_vm13, %v4018_v5, %v2920_v19  ;;  %3801 = vmatmul.mubr.msk.bf16.vlgmr.msra.gmra.mxu1 %vm529_vm3, %v3799_v15  ;;  %3806 = vmatprep.subr.msk.bf16.mxu1 %vm533_vm2, %v2794_v17  ;;  %v2799_v22 = vsel %vm533_vm2, %v2793_v18, 0 }
 0x4fe   : > { %v2926_v10 = vsel %vm4311_vm8, %v2922_v21, 0.0  ;;  %v2856_v23 = vpop.permute.xlu1 %2855  ;;  %2819 = vmatpush1.bf16.msra.mxu1 %v2799_v22  ;;  %2836 = vmatprep.mubr.bf16.mxu1 %v4115_v3  ;;  %v2925_v25 = vsel %vm647_vm9, %v2921_v20, 0.0 }
 0x4ff   : > { %v2930_v26 = vpack.c.bf16 %v2926_v10, %v2926_v10  ;;  %v2929_v9 = vpack.c.bf16 %v2925_v25, %v2925_v25 }
 0x500   : > { %v2858_v7 = vpop.permute.xlu0 %2857 }
 0x501   : > { %v2861_v27 = vsel %vm999_vm14, %v2856_v23, %v2858_v7  ;;  %3804 = vmatmul.mubr.msk.bf16.vlgmr.msra.gmra.mxu0 %vm529_vm3, %v3802_v24  ;;  %3812 = vmatprep.subr.msk.bf16.mxu1 %vm533_vm2, %v2930_v26  ;;  %v2935_v32 = vsel %vm533_vm2, %v2929_v9, 0 }
 0x502   : > { %v2860_v28 = vpop.permute.xlu1 %2859  ;;  %2904 = vmatprep.mubr.bf16.mxu0 %v4115_v3  ;;  %v2867_v31 = vsel %vm533_vm2, %v2861_v27, 0 }
 0x503   : > { %v2862_v30 = vsel %vm999_vm14, %v2858_v7, %v2860_v28 }
 0x504   : > { %3809 = vmatprep.subr.msk.bf16.mxu0 %vm533_vm2, %v2862_v30 }
 0x505   : > { %3807 = vmatmul.mubr.msk.bf16.vlgmr.msra.gmra.mxu1 %vm529_vm3, %v3805_v29  ;;  %2887 = vmatpush1.bf16.msra.mxu0 %v2867_v31 }
 0x506   : > { %2955 = vmatpush1.bf16.msra.mxu1 %v2935_v32  ;;  %2972 = vmatprep.mubr.bf16.mxu1 %v4115_v3 }
 0x509   : > { %3810 = vmatmul.mubr.msk.bf16.vlgmr.msra.gmra.mxu0 %vm529_vm3, %v3808_v33 }
 0x50a   : > { %3073 = vmatprep.mubr.bf16.mxu0 %v4115_v3 }
 0x50d   : > { %3813 = vmatmul.mubr.msk.bf16.vlgmr.msra.gmra.mxu1 %vm529_vm3, %v3811_v34  ;;  %v2987_v7 = vpop.permute.xlu0 %2986 }
 0x50e   : > { %3123 = vmatprep.mubr.bf16.mxu1 %v4115_v3 }
 0x5aa   : > { %v2458_v35 = vpop.f32.mrf.mxu1 }
 0x5ac   : > { %v2460_v38 = vpop.f32.mrf.mxu1 }
 0x5ae   : > { %v2462_v39 = vpop.f32.mrf.mxu1 }
 0x5b0   : > { %v2463_v40 = vpop.f32.mrf.mxu1 }
 0x5b1   : > { %v2508_v41 = vpop.f32.mrf.mxu0 }
 0x5b2   : > { %v2509_v61 = vadd.f32 %v2508_v41, %v2458_v35 }
 0x5b3   : > { %v2510_v42 = vpop.f32.mrf.mxu0 }
 0x5b4   : > { %v2511_v1 = vadd.f32 %v2510_v42, %v2460_v38 }
 0x5b5   : > { %v2512_v44 = vpop.f32.mrf.mxu0  ;;  %v2574_v48 = vpop.f32.mrf.mxu1 }
 0x5b6   : > { %v2581_v4 = vadd.f32 %v2574_v48, %v2509_v61  ;;  %v3600_v44 = vld [vmem:[%s5031_s12] sm:$0xf]  ;;  %v3025_v48 = vpop.permute.xlu1 %3024 }
 0x5b7   : > { %v2513_v49 = vpop.f32.mrf.mxu0  ;;  %v2576_v50 = vpop.f32.mrf.mxu1 }
 0x5b8   : > { %v2582_v58 = vadd.f32 %v2576_v50, %v2511_v1 }
 0x5b9   : > { %v2578_v53 = vpop.f32.mrf.mxu1  ;;  %v2642_v2 = vpop.f32.mrf.mxu0 }
 0x5ba   : > { %v2649_v8 = vadd.f32 %v2642_v2, %v2581_v4 }
 0x5bb   : > { %v2579_v54 = vpop.f32.mrf.mxu1  ;;  %v2644_v56 = vpop.f32.mrf.mxu0 }
 0x5bc   : > { %v2650_v14 = vadd.f32 %v2644_v56, %v2582_v58 }
 0x5bd   : > { %v2646_v57 = vpop.f32.mrf.mxu0  ;;  %v2696_v60 = vpop.f32.mrf.mxu1 }
 0x5be   : > { %v2703_v15 = vadd.f32 %v2696_v60, %v2649_v8 }
 0x5bf   : > { %v2647_v36 = vpop.f32.mrf.mxu0  ;;  %v2698_v59 = vpop.f32.mrf.mxu1 }
 0x5c0   : > { %v2704_v5 = vadd.f32 %v2698_v59, %v2650_v14 }
 0x5c1   : > { %v2700_v62 = vpop.f32.mrf.mxu1  ;;  %v2770_v0 = vpop.f32.mrf.mxu0 }
 0x5c2   : > { %v2777_v12 = vadd.f32 %v2770_v0, %v2703_v15 }
 0x5c3   : > { %v2701_v6 = vpop.f32.mrf.mxu1  ;;  %v2772_v52 = vpop.f32.mrf.mxu0 }
 0x5c4   : > { %v2778_v20 = vadd.f32 %v2772_v52, %v2704_v5 }
 0x5c5   : > { %v2774_v11 = vpop.f32.mrf.mxu0  ;;  %v2838_v13 = vpop.f32.mrf.mxu1 }
 0x5c6   : > { %v2845_v21 = vadd.f32 %v2838_v13, %v2777_v12 }
 0x5c7   : > { %v2775_v16 = vpop.f32.mrf.mxu0  ;;  %v2840_v17 = vpop.f32.mrf.mxu1 }
 0x5c8   : > { %v2846_v23 = vadd.f32 %v2840_v17, %v2778_v20  ;;  %v3013_v16 = vld [vmem:[%s5030_s11] sm:$0x3] }
 0x5c9   : > { %v2842_v18 = vpop.f32.mrf.mxu1  ;;  %v2906_v19 = vpop.f32.mrf.mxu0 }
 0x5ca   : > { %v2913_v24 = vadd.f32 %v2906_v19, %v2845_v21 }
 0x5cb   : > { %v2843_v22 = vpop.f32.mrf.mxu1  ;;  %v2908_v10 = vpop.f32.mrf.mxu0 }
 0x5cc   : > { %v2914_v27 = vadd.f32 %v2908_v10, %v2846_v23 }
 0x5cd   : > { %v2910_v25 = vpop.f32.mrf.mxu0  ;;  %v2974_v26 = vpop.f32.mrf.mxu1 }
 0x5ce   : > { %v2981_v9 = vadd.f32 %v2974_v26, %v2913_v24  ;;  %v3819_v25 = vld [vmem:[%s5030_s11 + $0x4] sm:$0x3] }
 0x5cf   : > { %v2911_v28 = vpop.f32.mrf.mxu0  ;;  %v2976_v29 = vpop.f32.mrf.mxu1 }
 0x5d0   : > { %v2989_v30 = vadd.f32 %v2987_v7, %v2981_v9  ;;  %v2982_v31 = vadd.f32 %v2976_v29, %v2914_v27 }
 0x5d1   : > { %v2978_v32 = vpop.f32.mrf.mxu1 }
 0x5d2   : > { %v2991_v33 = vmax.f32 %v2989_v30, 0.0  ;;  %v2990_v34 = vadd.f32 %v2987_v7, %v2982_v31 }
 0x5d3   : > { %v2979_v35 = vpop.f32.mrf.mxu1 }
 0x5d4   : > { %2993 = vst [vmem:[#allocation2 + $0x10] sm:$0xff] %v2991_v33  ;;  %v2992_v38 = vmax.f32 %v2990_v34, 0.0  ;;  %v4847_v39 = vpack.c.bf16 %v2991_v33, %v2991_v33  ;;  %v4019_v41 = vpack.i.bf16 %v2991_v33, %v4574_v63 }
 0x5d6   : > { %2994 = vst [vmem:[#allocation2 + $0x18] sm:$0xff] %v2992_v38  ;;  %3026 = vrot.lane.b32.xlu0 %v4847_v39, %s5071_s3  ;;  %v4851_v40 = vpack.c.bf16 %v2992_v38, %v2992_v38  ;;  %v4034_v42 = vpack.i.bf16 %v2992_v38, %v2991_v33  ;;  %v3274_v33 = vsel %vm1793_vm15, %v4847_v39, 0 }
 0x5d8   : > { %3028 = vrot.lane.b32.xlu1 %v4851_v40, %s5071_s3 }
 0x5da   : > { %4020 = vrot.lane.b32.xlu0 %v4019_v41, %s5065_s23 }
 0x5dc   : > { %3005 = vrot.lane.b32.xlu1 %v2992_v38, %s5065_s23  ;;  %s3628_s23 = scalar_lea.hbm %s5032_s13, %s3847_s21 }
 0x5de   : > { %4025 = vrot.lane.b32.xlu0 %v4019_v41, %s5066_s24 }
 0x5e0   : > { %3136 = vrot.lane.b32.xlu1 %v2992_v38, %s5066_s24 }
 0x5e2   : > { %4030 = vrot.lane.b32.xlu0 %v4019_v41, %s5067_s15 }
 0x5e4   : > { %3204 = vrot.lane.b32.xlu1 %v2992_v38, %s5067_s15  ;;  %v3822_v38 = vld [vmem:[%s5030_s11 + $0x6] sm:$0x3]  ;;  %s4056_s15 = sshll.u32 %s4125_s29, 4  ;;  %s4057_s15 = int_to_ptr.vmem [resolvable:$false] %s4056_s15 }
 0x5e6   : > { %4035 = vrot.lane.b32.xlu0 %v4034_v42, %s5068_s22 }
 0x5e8   : > { %3332 = vrot.lane.b32.xlu1 %v4574_v63, %s5068_s22  ;;  %s4058_s22 = scalar_lea.vmem %s4057_s15, 256 }
 0x5ea   : > { %4040 = vrot.lane.b32.xlu0 %v4034_v42, %s5069_s30 }
 0x5ec   : > { %3400 = vrot.lane.b32.xlu1 %v4574_v63, %s5069_s30 }
 0x5ee   : > { %4045 = vrot.lane.b32.xlu0 %v4034_v42, %s5072_s0 }
 0x5f0   : > { %3536 = vrot.lane.b32.xlu1 %v4574_v63, %s5072_s0 }
 0x5f2   : > { %3472 = vrot.lane.b32.xlu0 %v4847_v39, %s5073_s2 }
 0x5f4   : > { %3474 = vrot.lane.b32.xlu1 %v4851_v40, %s5073_s2 }
 0x5f6   : > { %3476 = vrot.lane.b32.xlu0 %v4124_v55, %s5073_s2  ;;  %v3814_v55 = vld [vmem:[%s5030_s11 + $0x2] sm:$0x3]  ;;  %s446_s2 = sand.u32 1, %s4104_s26  }
 0x5f7   : > { %s3705_s20 = sshll.u32 %s446_s2, 3  ;;  %s3616_s30 = scalar_lea.sflag [#allocation4], %s446_s2 }
 0x5f8   : > { %3603 = vperm.xlu1 %3988, %v3600_v44   ;;  %s448_s16 = scalar_lea.vmem [#allocation3], %s3705_s20 }
 0x5f9   : > { %s3630_s4 = sshll.u32 %s448_s16, 4  ;;  %s3631_s4 = int_to_ptr.vmem [resolvable:$true] %s3630_s4 }
 0x5fa   : > { %s4052_s24 = scalar_lea.vmem %s3631_s4, 128  ;;  %p4059_p0 = scmp.lt.s32.totalorder %s3631_s4, %s4057_s15 }
 0x5fb   : > { %p4053_p11 = scmp.ne.s32.totalorder %s3631_s4, %s4052_s24  ;;  %p4060_p1 = scmp.lt.s32.totalorder %s4058_s22, %s4052_s24 }
 0x5fd   : > { %p4054_p12 = pnand %p4053_p11, %p4234_p5  ;;  %p4061_p2 = por %p4060_p1, %p4059_p0 }
 0x5ff   : > { %p4055_p13 = pneg %p4054_p12 }
 0x601   : > { %p4062_p3 = pnand %p4061_p2, %p4055_p13 }
 0x648   : > { %v3027_v49 = vpop.permute.xlu0 %3026 }
 0x649   : > { %v3030_v50 = vsel %vm526_vm1, %v3025_v48, %v3027_v49 }
 0x64a   : > { %v3029_v53 = vpop.permute.xlu1 %3028  ;;  %v3036_v2 = vsel %vm1793_vm15, %v3030_v50, 0 }
 0x64b   : > { %v3031_v63 = vsel %vm526_vm1, %v3027_v49, %v3029_v53 }
 0x64c   : > { %v4021_v54 = vpop.permute.xlu0 %4020  ;;  %3815 = vmatprep.subr.msk.bf16.mxu0 %vm1793_vm15, %v3031_v63 }
 0x64d   : > { %v4023_v56 = vunpack.i.h.bf16 %v4021_v54  ;;  %v4022_v57 = vunpack.i.l.bf16 %v4021_v54  ;;  %3056 = vmatpush1.bf16.msra.mxu0 %v3036_v2  ;;  %v3825_v54 = vld [vmem:[%s5030_s11 + $0x8] sm:$0x3] }
 0x64e   : > { %v3006_v60 = vpop.permute.xlu1 %3005 }
 0x64f   : > { %v3007_v36 = vsel %vm502_vm4, %v4022_v57, %v4023_v56  ;;  %v3008_v59 = vsel %vm502_vm4, %v4023_v56, %v3006_v60 }
 0x650   : > { %v3012_v61 = vsel %vm4302_vm5, %v3008_v59, 0.0  ;;  %v4026_v62 = vpop.permute.xlu0 %4025  ;;  %3816 = vmatmul.mubr.msk.bf16.vlgmr.msra.gmra.mxu0 %vm1789_vm0, %v3814_v55  ;;  %v3011_v0 = vsel %vm491_vm6, %v3007_v36, 0.0 }
 0x651   : > { %v3015_v1 = vpack.c.bf16 %v3012_v61, %v3012_v61  ;;  %v4028_v4 = vunpack.i.h.bf16 %v4026_v62  ;;  %v4027_v6 = vunpack.i.l.bf16 %v4026_v62  ;;  %v3014_v52 = vpack.c.bf16 %v3011_v0, %v3011_v0  ;;  %3189 = vmatprep.mubr.bf16.mxu0 %v4115_v3 }
 0x652   : > { %v3137_v58 = vpop.permute.xlu1 %3136 }
 0x653   : > { %v3138_v8 = vsel %vm655_vm7, %v4027_v6, %v4028_v4  ;;  %v3139_v11 = vsel %vm655_vm7, %v4028_v4, %v3137_v58  ;;  %3817 = vmatprep.subr.msk.bf16.mxu1 %vm1793_vm15, %v3015_v1  ;;  %v3086_v13 = vsel %vm1793_vm15, %v3014_v52, 0  ;;  %v3828_v1 = vld [vmem:[%s5030_s11 + $0xa] sm:$0x3] }
 0x654   : > { %v3143_v14 = vsel %vm4311_vm8, %v3139_v11, 0.0  ;;  %v4031_v15 = vpop.permute.xlu0 %4030  ;;  %3106 = vmatpush1.bf16.msra.mxu1 %v3086_v13  ;;  %v3142_v17 = vsel %vm647_vm9, %v3138_v8, 0.0  ;;  %v3831_v11 = vld [vmem:[%s5030_s11 + $0xc] sm:$0x3] }
 0x655   : > { %v3147_v5 = vpack.c.bf16 %v3143_v14, %v3143_v14  ;;  %v4033_v12 = vunpack.i.h.bf16 %v4031_v15  ;;  %v4032_v18 = vunpack.i.l.bf16 %v4031_v15  ;;  %v3146_v19 = vpack.c.bf16 %v3142_v17, %v3142_v17  ;;  %v3834_v15 = vld [vmem:[%s5030_s11 + $0xe] sm:$0x3] }
 0x656   : > { %v3205_v20 = vpop.permute.xlu1 %3204 }
 0x657   : > { %v3206_v21 = vsel %vm724_vm10, %v4032_v18, %v4033_v12  ;;  %v3207_v22 = vsel %vm724_vm10, %v4033_v12, %v3205_v20  ;;  %3818 = vmatmul.mubr.msk.bf16.vlgmr.msra.gmra.mxu1 %vm1789_vm0, %v3013_v16  ;;  %3820 = vmatprep.subr.msk.bf16.mxu0 %vm1793_vm15, %v3147_v5  ;;  %v3152_v10 = vsel %vm1793_vm15, %v3146_v19, 0  ;;  %v3837_v16 = vld [vmem:[%s5030_s11 + $0x10] sm:$0x3] }
 0x658   : > { %v3211_v23 = vsel %vm4302_vm5, %v3207_v22, 0.0  ;;  %v4036_v24 = vpop.permute.xlu0 %4035  ;;  %3172 = vmatpush1.bf16.msra.mxu0 %v3152_v10  ;;  %v3210_v26 = vsel %vm491_vm6, %v3206_v21, 0.0  ;;  %3257 = vmatprep.mubr.bf16.mxu1 %v4115_v3 }
 0x659   : > { %v3215_v7 = vpack.c.bf16 %v3211_v23, %v3211_v23  ;;  %v4038_v27 = vunpack.i.h.bf16 %v4036_v24  ;;  %v4037_v9 = vunpack.i.l.bf16 %v4036_v24  ;;  %3826 = vmatprep.subr.msk.bf16.mxu0 %vm1793_vm15, %v4851_v40  ;;  %v3214_v28 = vpack.c.bf16 %v3210_v26, %v3210_v26 }
 0x65a   : > { %v3333_v29 = vpop.permute.xlu1 %3332 }
 0x65b   : > { %v3334_v30 = vsel %vm853_vm11, %v4037_v9, %v4038_v27  ;;  %v3335_v31 = vsel %vm853_vm11, %v4038_v27, %v3333_v29  ;;  %3821 = vmatmul.mubr.msk.bf16.vlgmr.msra.gmra.mxu0 %vm1789_vm0, %v3819_v25  ;;  %3823 = vmatprep.subr.msk.bf16.mxu1 %vm1793_vm15, %v3215_v7  ;;  %v3220_v32 = vsel %vm1793_vm15, %v3214_v28, 0 }
 0x65c   : > { %v3339_v34 = vsel %vm4311_vm8, %v3335_v31, 0.0  ;;  %v4041_v35 = vpop.permute.xlu0 %4040  ;;  %3240 = vmatpush1.bf16.msra.mxu1 %v3220_v32  ;;  %3294 = vmatpush1.bf16.msra.mxu0 %v3274_v33  ;;  %v3338_v40 = vsel %vm647_vm9, %v3334_v30, 0.0 }
 0x65d   : > { %v3343_v41 = vpack.c.bf16 %v3339_v34, %v3339_v34  ;;  %v4043_v42 = vunpack.i.h.bf16 %v4041_v35  ;;  %v4042_v44 = vunpack.i.l.bf16 %v4041_v35  ;;  %v3342_v48 = vpack.c.bf16 %v3338_v40, %v3338_v40  ;;  %3311 = vmatprep.mubr.bf16.mxu0 %v4115_v3 }
 0x65e   : > { %v3401_v39 = vpop.permute.xlu1 %3400 }
 0x65f   : > { %v3402_v49 = vsel %vm922_vm12, %v4042_v44, %v4043_v42  ;;  %v3403_v50 = vsel %vm922_vm12, %v4043_v42, %v3401_v39  ;;  %3824 = vmatmul.mubr.msk.bf16.vlgmr.msra.gmra.mxu1 %vm1789_vm0, %v3822_v38  ;;  %3829 = vmatprep.subr.msk.bf16.mxu1 %vm1793_vm15, %v3343_v41  ;;  %v3348_v53 = vsel %vm1793_vm15, %v3342_v48, 0 }
 0x660   : > { %v3407_v63 = vsel %vm4302_vm5, %v3403_v50, 0.0  ;;  %v4046_v2 = vpop.permute.xlu0 %4045  ;;  %3368 = vmatpush1.bf16.msra.mxu1 %v3348_v53  ;;  %v3406_v56 = vsel %vm491_vm6, %v3402_v49, 0.0  ;;  %3385 = vmatprep.mubr.bf16.mxu1 %v4115_v3 }
 0x661   : > { %v3411_v57 = vpack.c.bf16 %v3407_v63, %v3407_v63  ;;  %v4048_v55 = vunpack.i.h.bf16 %v4046_v2  ;;  %v4047_v60 = vunpack.i.l.bf16 %v4046_v2  ;;  %v3410_v36 = vpack.c.bf16 %v3406_v56, %v3406_v56 }
 0x662   : > { %v3537_v59 = vpop.permute.xlu1 %3536 }
 0x663   : > { %v3538_v61 = vsel %vm1060_vm13, %v4047_v60, %v4048_v55  ;;  %v3539_v46 = vsel %vm1060_vm13, %v4048_v55, %v3537_v59  ;;  %3827 = vmatmul.mubr.msk.bf16.vlgmr.msra.gmra.mxu0 %vm1789_vm0, %v3825_v54  ;;  %3832 = vmatprep.subr.msk.bf16.mxu0 %vm1793_vm15, %v3411_v57  ;;  %v3416_v62 = vsel %vm1793_vm15, %v3410_v36, 0 }
 0x664   : > { %v3543_v37 = vsel %vm4311_vm8, %v3539_v46, 0.0  ;;  %v3473_v0 = vpop.permute.xlu0 %3472  ;;  %3436 = vmatpush1.bf16.msra.mxu0 %v3416_v62  ;;  %3453 = vmatprep.mubr.bf16.mxu0 %v4115_v3  ;;  %v3542_v4 = vsel %vm647_vm9, %v3538_v61, 0.0 }
 0x665   : > { %v3547_v6 = vpack.c.bf16 %v3543_v37, %v3543_v37  ;;  %v3546_v51 = vpack.c.bf16 %v3542_v4, %v3542_v4 }
 0x666   : > { %v3475_v52 = vpop.permute.xlu1 %3474 }
 0x667   : > { %v3478_v58 = vsel %vm999_vm14, %v3473_v0, %v3475_v52  ;;  %3830 = vmatmul.mubr.msk.bf16.vlgmr.msra.gmra.mxu1 %vm1789_vm0, %v3828_v1  ;;  %3838 = vmatprep.subr.msk.bf16.mxu0 %vm1793_vm15, %v3547_v6  ;;  %v3552_v14 = vsel %vm1793_vm15, %v3546_v51, 0 }
 0x668   : > { %v3477_v8 = vpop.permute.xlu0 %3476  ;;  %3521 = vmatprep.mubr.bf16.mxu1 %v4115_v3  ;;  %v3484_v43 = vsel %vm1793_vm15, %v3478_v58, 0 }
 0x669   : > { %v3479_v13 = vsel %vm999_vm14, %v3475_v52, %v3477_v8 }
 0x66a   : > { %3835 = vmatprep.subr.msk.bf16.mxu1 %vm1793_vm15, %v3479_v13 }
 0x66b   : > { %3833 = vmatmul.mubr.msk.bf16.vlgmr.msra.gmra.mxu0 %vm1789_vm0, %v3831_v11  ;;  %3504 = vmatpush1.bf16.msra.mxu1 %v3484_v43 }
 0x66c   : > { %3572 = vmatpush1.bf16.msra.mxu0 %v3552_v14  ;;  %3589 = vmatprep.mubr.bf16.mxu0 %v4115_v3 }
 0x66f   : > { %3836 = vmatmul.mubr.msk.bf16.vlgmr.msra.gmra.mxu1 %vm1789_vm0, %v3834_v15 }
 0x673   : > { %3839 = vmatmul.mubr.msk.bf16.vlgmr.msra.gmra.mxu0 %vm1789_vm0, %v3837_v16  ;;  %v3604_v46 = vpop.permute.xlu1 %3603 }
 0x710   : > { %v3075_v17 = vpop.f32.mrf.mxu0 }
 0x712   : > { %v3077_v5 = vpop.f32.mrf.mxu0 }
 0x714   : > { %v3079_v12 = vpop.f32.mrf.mxu0 }
 0x716   : > { %v3080_v18 = vpop.f32.mrf.mxu0 }
 0x717   : > { %v3125_v19 = vpop.f32.mrf.mxu1 }
 0x718   : > { %v3126_v29 = vadd.f32 %v3125_v19, %v3075_v17 }
 0x719   : > { %v3127_v20 = vpop.f32.mrf.mxu1 }
 0x71a   : > { %v3128_v32 = vadd.f32 %v3127_v20, %v3077_v5 }
 0x71b   : > { %v3129_v21 = vpop.f32.mrf.mxu1  ;;  %v3191_v22 = vpop.f32.mrf.mxu0 }
 0x71c   : > { %v3198_v33 = vadd.f32 %v3191_v22, %v3126_v29 }
 0x71d   : > { %v3130_v10 = vpop.f32.mrf.mxu1  ;;  %v3193_v23 = vpop.f32.mrf.mxu0 }
 0x71e   : > { %v3199_v38 = vadd.f32 %v3193_v23, %v3128_v32 }
 0x71f   : > { %v3195_v24 = vpop.f32.mrf.mxu0  ;;  %v3259_v3 = vpop.f32.mrf.mxu1 }
 0x720   : > { %v3266_v40 = vadd.f32 %v3259_v3, %v3198_v33 }
 0x721   : > { %v3196_v25 = vpop.f32.mrf.mxu0  ;;  %v3261_v26 = vpop.f32.mrf.mxu1 }
 0x722   : > { %v3267_v44 = vadd.f32 %v3261_v26, %v3199_v38 }
 0x723   : > { %v3263_v7 = vpop.f32.mrf.mxu1  ;;  %v3313_v27 = vpop.f32.mrf.mxu0 }
 0x724   : > { %v3320_v48 = vadd.f32 %v3313_v27, %v3266_v40 }
 0x725   : > { %v3264_v9 = vpop.f32.mrf.mxu1  ;;  %v3315_v28 = vpop.f32.mrf.mxu0 }
 0x726   : > { %v3321_v50 = vadd.f32 %v3315_v28, %v3267_v44 }
 0x727   : > { %v3317_v30 = vpop.f32.mrf.mxu0  ;;  %v3387_v31 = vpop.f32.mrf.mxu1 }
 0x728   : > { %v3394_v53 = vadd.f32 %v3387_v31, %v3320_v48 }
 0x729   : > { %v3318_v34 = vpop.f32.mrf.mxu0  ;;  %v3389_v35 = vpop.f32.mrf.mxu1 }
 0x72a   : > { %v3395_v54 = vadd.f32 %v3389_v35, %v3321_v50 }
 0x72b   : > { %v3391_v41 = vpop.f32.mrf.mxu1  ;;  %v3455_v42 = vpop.f32.mrf.mxu0 }
 0x72c   : > { %v3462_v56 = vadd.f32 %v3455_v42, %v3394_v53 }
 0x72d   : > { %v3392_v39 = vpop.f32.mrf.mxu1  ;;  %v3457_v49 = vpop.f32.mrf.mxu0 }
 0x72e   : > { %v3463_v60 = vadd.f32 %v3457_v49, %v3395_v54 }
 0x72f   : > { %v3459_v63 = vpop.f32.mrf.mxu0  ;;  %v3523_v2 = vpop.f32.mrf.mxu1 }
 0x730   : > { %v3530_v36 = vadd.f32 %v3523_v2, %v3462_v56 }
 0x731   : > { %v3460_v57 = vpop.f32.mrf.mxu0  ;;  %v3525_v55 = vpop.f32.mrf.mxu1 }
 0x732   : > { %v3531_v62 = vadd.f32 %v3525_v55, %v3463_v60 }
 0x733   : > { %v3591_v59 = vpop.f32.mrf.mxu0  ;;  %v3527_v61 = vpop.f32.mrf.mxu1 }
 0x734   : > { %v3598_v37 = vadd.f32 %v3591_v59, %v3530_v36 }
 0x735   : > { %v3593_v0 = vpop.f32.mrf.mxu0  ;;  %v3528_v1 = vpop.f32.mrf.mxu1 }
 0x736   : > { %v3606_v4 = vadd.f32 %v3604_v46, %v3598_v37  ;;  %v3599_v6 = vadd.f32 %v3593_v0, %v3531_v62 }
 0x737   : > { %v3595_v52 = vpop.f32.mrf.mxu0 }
 0x738   : > { %v3607_v58 = vadd.f32 %v3604_v46, %v3599_v6  ;;  %v3608_v8 = vadd.f32 %v3606_v4, %v4707_v45 }
 0x739   : > { %v3596_v51 = vpop.f32.mrf.mxu0 }
 0x73a   : > { %v3609_v11 = vadd.f32 %v3607_v58, %v4709_v47 }
 0x73c   : > { %v3612_v13 = vcombine.low %v3608_v8, %v3609_v11 }
 0x73e   : > { %3614 = vst [vmem:[%s448_s16] sm:$0xff] %v3612_v13 }
 0x73f   : > { %4065 = shalt.err (!%p4062_p3)
}
 0x740   : > { %s4066_s0 = scalar_lea.hbm %s3628_s23, 128  ;;  %s4070_s21 = scalar_lea.hbm %s5032_s13, 256 }
 0x741   : > { %p4067_p4 = scmp.ne.s32.totalorder %s3628_s23, %s4066_s0  ;;  %p4071_p9 = scmp.lt.s32.totalorder %s3628_s23, %s5032_s13 }
 0x742   : > { %p4072_p10 = scmp.lt.s32.totalorder %s4070_s21, %s4066_s0 }
 0x743   : > { %p4068_p7 = pnand %p4067_p4, %p4234_p5 }
 0x744   : > { %p4073_p11 = por %p4072_p10, %p4071_p9 }
 0x745   : > { %p4069_p8 = pneg %p4068_p7 }
 0x747   : > { %p4074_p12 = pnand %p4073_p11, %p4069_p8 }
 0x749   : > { %4077 = shalt.err (!%p4074_p12)
}
 0x74a   : > { %3848 = dma.vmem_to_hbm [thread:$0]  (%p4234_p5), %s3631_s4, 128, %s3628_s23, %s3616_s30  }
 0x74b PF: > { %p3854_p13 = scmp.ge.s32.totalorder %s4112_s28, 2  ;;  %s3642_s3 = sand.u32 1, %s4100_s25  }
 0x74c   : > { %s3643_s24 = scalar_lea.sflag [#allocation4], %s3642_s3 }
 0x74d   : > { %p3851_p0 = pnand %p3854_p13, %p4238_p6 }
 0x74f   : > { %p3852_p1 = pneg %p3851_p0 }
 0x751   : > { %4095 = dma.done.wait (%p3852_p1), %s3643_s24, 128  }
 0x752   : > { %4097 = vsyncadd (%p3852_p1), %s3643_s24, 4294967168  ;;  %p23_p2 = scmp.ge.s32.totalorder %s4221_s14, 4   ;;  %s5075_s25 = smov %s4104_s26 }
 0x753   : > { %s5076_s26 = smov %s4108_s27  ;;  %s5077_s27 = smov %s4232_s17 }
 0x754   : > { %s5078_s28 = smov %s4221_s14  ;;  %25 = sbr.rel (!%p23_p2) target bundleno = 9 (0x9), region = 150 }
 0x759   :  { %3648 = vsyncpa [#allocation4], 1 }
 0x75a   :  { %3650 = vsyncpa [#allocation4 + $0x1], 1 }

</bundles_post_ra>
